<compile_context>
chip_gen: v7x
topology: tpu7x:2x2x1
jax: 0.10.0
libtpu: 0.0.40
codegen_flags: <defaults>
</compile_context>

<pallas_src>
import math

import jax
import jax.numpy as jnp
from jax.experimental import pallas as pl
from jax.experimental.pallas import tpu as pltpu


def _sigmoid(x):
    # sigmoid(x) == 0.5*(tanh(x/2)+1): a single EUP transcendental push.
    return 0.5 * (jnp.tanh(0.5 * x) + 1.0)


def _pick_vocab_tile(ntoken, nhid, max_tile_bytes=4 << 20, max_tile=1024):
    """Largest lane-dense tile (multiple of 128) dividing ntoken whose f32
    weight slab (nhid, tn) stays under max_tile_bytes per pipeline buffer."""
    cap = max(128, (max_tile_bytes // (nhid * 4)) // 128 * 128)
    cap = min(cap, max_tile, ntoken)
    best = 128
    tn = 128
    while tn <= cap:
        if ntoken % tn == 0:
            best = tn
        tn += 128
    return best


# -----------------------------------------------------------------------------
# Parameters (mirrors SimpleMultiRNNModel.__init__ + init_weights, PyTorch init)
# -----------------------------------------------------------------------------
def init_params(key, rnn_type, ntoken, ntag, ninp, nhid, nlayers):
    initrange = 0.1
    stdv = 1.0 / math.sqrt(nhid)              # PyTorch RNN/LSTM/GRU default init
    gates = {"LSTM": 4, "GRU": 3, "RNN_TANH": 1, "RNN_RELU": 1}[rnn_type]

    keys = iter(jax.random.split(key, 8 + 8 * nlayers))

    def u(shape, scale):
        return jax.random.uniform(next(keys), shape, jnp.float32, -scale, scale)

    params = {
        "emb_word": u((ntoken, ninp), initrange),
        "emb_tag": u((ntag, ninp), initrange),
        # Output heads pre-transposed to (in, out) for lane-dense matmuls.
        "w_word_out_t": u((nhid, ntoken), initrange),
        "b_word_out": jnp.zeros((1, ntoken), jnp.float32),
        "w_tag_out_t": u((nhid, ntag), initrange),
        "b_tag_out": jnp.zeros((1, ntag), jnp.float32),
    }
    for branch in ("word", "tag"):
        layers = []
        for l in range(nlayers):
            in_dim = ninp if l == 0 else nhid
            if rnn_type == "GRU":
                layers.append({
                    "wih_t": u((in_dim, gates * nhid), stdv),
                    "whh_t": u((nhid, gates * nhid), stdv),
                    "bih": u((1, gates * nhid), stdv),
                    "bhh": u((1, gates * nhid), stdv),
                })
            else:
                # LSTM / vanilla RNN: combine [Wih; Whh]^T and b_ih + b_hh so
                # the cell is a single MXU matmul on [x | h].
                wih_t = u((in_dim, gates * nhid), stdv)
                whh_t = u((nhid, gates * nhid), stdv)
                bih = u((1, gates * nhid), stdv)
                bhh = u((1, gates * nhid), stdv)
                layers.append({
                    "w": jnp.concatenate([wih_t, whh_t], axis=0),
                    "b": bih + bhh,
                })
        params[f"rnn_{branch}"] = layers
    return params


def init_hidden(rnn_type, nlayers, bsz, nhid):
    """Mirrors SimpleMultiRNNModel.init_hidden."""
    shape = (nlayers, bsz, nhid)
    if rnn_type == "LSTM":
        return (jnp.zeros(shape, jnp.float32), jnp.zeros(shape, jnp.float32))
    return jnp.zeros(shape, jnp.float32)


# -----------------------------------------------------------------------------
# Fused forward (one pallas_call per decode step)
# -----------------------------------------------------------------------------
def forward(params, input_token, input_tag, hidden_word, hidden_tag, *,
            rnn_type="LSTM"):
    """Single-step forward of SimpleMultiRNNModel (eval mode).

    input_token / input_tag: (1, B) int32 (seq_len == 1, as squeeze(0) implies).
    hidden_*: (h, c) of (nlayers, B, nhid) for LSTM, else a single array.
    Returns (p_word, p_tag, new_hidden_word, new_hidden_tag).
    """
    assert rnn_type in ("LSTM", "GRU", "RNN_TANH", "RNN_RELU")
    is_lstm = rnn_type == "LSTM"
    is_gru = rnn_type == "GRU"
    assert input_token.shape[0] == 1 and input_tag.shape[0] == 1

    # --- glue: embedding gather (eval-mode dropout = identity) ----------------
    # One-row gathers are best left to XLA; the kernel takes the dense rows.
    x_word = params["emb_word"][input_token[0]]          # (B, ninp)
    x_tag = params["emb_tag"][input_tag[0]]              # (B, ninp)

    if is_lstm:
        h0_w, c0_w = hidden_word
        h0_t, c0_t = hidden_tag
        state_in = [h0_w, c0_w, h0_t, c0_t]
    else:
        h0_w, h0_t = hidden_word, hidden_tag
        state_in = [h0_w, h0_t]
    n_state = len(state_in)

    nlayers, B, nhid = h0_w.shape
    ninp = x_word.shape[-1]
    ntoken = params["w_word_out_t"].shape[1]
    ntag = params["w_tag_out_t"].shape[1]

    # TODO(synk): pad to (8,128) multiples here for arbitrary shapes.
    assert B % 8 == 0, "batch must be a multiple of 8 sublanes"
    assert ninp % 128 == 0 and nhid % 128 == 0, "ninp/nhid must be multiples of 128"
    assert ntoken % 128 == 0 and ntag % 128 == 0, "ntoken/ntag must be multiples of 128"

    tn = _pick_vocab_tile(ntoken, nhid)
    num_vocab_tiles = ntoken // tn

    # --- flatten per-layer weights (order must match the kernel unpack) -------
    n_per_layer = 4 if is_gru else 2
    gates = {"LSTM": 4, "GRU": 3, "RNN_TANH": 1, "RNN_RELU": 1}[rnn_type]

    def _flat_layers(layers):
        flat = []
        for lp in layers:
            if is_gru:
                flat += [lp["wih_t"], lp["whh_t"], lp["bih"], lp["bhh"]]
            else:
                flat += [lp["w"], lp["b"]]
        return flat

    w_word_flat = _flat_layers(params["rnn_word"])
    w_tag_flat = _flat_layers(params["rnn_tag"])
    n_layer_refs = n_per_layer * nlayers

    # --- the fused kernel ------------------------------------------------------
    def kernel(*refs):
        pos = 0
        xw_ref, xt_ref = refs[0], refs[1]
        pos = 2
        state_refs = refs[pos:pos + n_state]; pos += n_state
        word_layer_refs = refs[pos:pos + n_layer_refs]; pos += n_layer_refs
        tag_layer_refs = refs[pos:pos + n_layer_refs]; pos += n_layer_refs
        w_tag_out_ref, b_tag_out_ref, w_word_out_ref, b_word_out_ref = \
            refs[pos:pos + 4]
        pos += 4
        p_word_ref, p_tag_ref = refs[pos], refs[pos + 1]
        pos += 2
        state_out_refs = refs[pos:pos + n_state]; pos += n_state
        sum_ref = refs[pos]                   # VMEM scratch: out_word + out_tag

        j = pl.program_id(0)

        def run_branch(x0, h0_ref, c0_ref, layer_refs, h_out_ref, c_out_ref):
            # Unrolled layer stack for one timestep; writes new states directly
            # into the stacked (nlayers, B, nhid) outputs; returns the top h.
            x = x0
            for l in range(nlayers):
                h_prev = h0_ref[l]
                if is_lstm:
                    c_prev = c0_ref[l]
                    w_ref, b_ref = layer_refs[2 * l], layer_refs[2 * l + 1]
                    xh = jnp.concatenate([x, h_prev], axis=-1)
                    g = jnp.dot(xh, w_ref[...],
                                preferred_element_type=jnp.float32) + b_ref[...]
                    i_g = _sigmoid(g[:, 0 * nhid:1 * nhid])
                    f_g = _sigmoid(g[:, 1 * nhid:2 * nhid])
                    g_g = jnp.tanh(g[:, 2 * nhid:3 * nhid])
                    o_g = _sigmoid(g[:, 3 * nhid:4 * nhid])
                    c_new = f_g * c_prev + i_g * g_g
                    h_new = o_g * jnp.tanh(c_new)
                    c_out_ref[l] = c_new
                elif is_gru:
                    wih_ref, whh_ref, bih_ref, bhh_ref = \
                        layer_refs[4 * l:4 * l + 4]
                    gi = jnp.dot(x, wih_ref[...],
                                 preferred_element_type=jnp.float32) + bih_ref[...]
                    gh = jnp.dot(h_prev, whh_ref[...],
                                 preferred_element_type=jnp.float32) + bhh_ref[...]
                    r = _sigmoid(gi[:, 0 * nhid:1 * nhid] + gh[:, 0 * nhid:1 * nhid])
                    z = _sigmoid(gi[:, 1 * nhid:2 * nhid] + gh[:, 1 * nhid:2 * nhid])
                    n = jnp.tanh(gi[:, 2 * nhid:3 * nhid]
                                 + r * gh[:, 2 * nhid:3 * nhid])
                    h_new = (1.0 - z) * n + z * h_prev
                else:  # RNN_TANH / RNN_RELU
                    w_ref, b_ref = layer_refs[2 * l], layer_refs[2 * l + 1]
                    xh = jnp.concatenate([x, h_prev], axis=-1)
                    pre = jnp.dot(xh, w_ref[...],
                                  preferred_element_type=jnp.float32) + b_ref[...]
                    h_new = (jnp.tanh(pre) if rnn_type == "RNN_TANH"
                             else jnp.maximum(pre, 0.0))
                h_out_ref[l] = h_new
                x = h_new          # inter-layer dropout: identity in eval mode
            return x

        # Grid step 0: run both RNN stacks + the (small) tag head once; stash
        # (out_word + out_tag) in VMEM scratch for the tiled vocab projection.
        @pl.when(j == 0)
        def _():
            if is_lstm:
                h0w_ref, c0w_ref, h0t_ref, c0t_ref = state_refs
                hw_out_ref, cw_out_ref, ht_out_ref, ct_out_ref = state_out_refs
                out_word = run_branch(xw_ref[...], h0w_ref, c0w_ref,
                                      word_layer_refs, hw_out_ref, cw_out_ref)
                out_tag = run_branch(xt_ref[...], h0t_ref, c0t_ref,
                                     tag_layer_refs, ht_out_ref, ct_out_ref)
            else:
                h0w_ref, h0t_ref = state_refs
                hw_out_ref, ht_out_ref = state_out_refs
                out_word = run_branch(xw_ref[...], h0w_ref, None,
                                      word_layer_refs, hw_out_ref, None)
                out_tag = run_branch(xt_ref[...], h0t_ref, None,
                                     tag_layer_refs, ht_out_ref, None)

            sum_ref[...] = out_word + out_tag
            p_tag_ref[...] = (
                jnp.dot(out_tag, w_tag_out_ref[...],
                        preferred_element_type=jnp.float32)
                + b_tag_out_ref[...]).astype(p_tag_ref.dtype)

        # Every grid step: one lane-dense (B, tn) tile of the word logits.
        p_word_ref[...] = (
            jnp.dot(sum_ref[...], w_word_out_ref[...],
                    preferred_element_type=jnp.float32)
            + b_word_out_ref[...]).astype(p_word_ref.dtype)

    # --- specs -----------------------------------------------------------------
    def _whole(a):
        nd = a.ndim
        return pl.BlockSpec(a.shape, lambda j, _nd=nd: (0,) * _nd)

    inputs = ([x_word, x_tag] + state_in + w_word_flat + w_tag_flat
              + [params["w_tag_out_t"], params["b_tag_out"],
                 params["w_word_out_t"], params["b_word_out"]])

    in_specs = ([_whole(x_word), _whole(x_tag)]
                + [_whole(s) for s in state_in]
                + [_whole(a) for a in (w_word_flat + w_tag_flat)]
                + [_whole(params["w_tag_out_t"]), _whole(params["b_tag_out"])]
                + [pl.BlockSpec((nhid, tn), lambda j: (0, j)),   # W_word_out tile
                   pl.BlockSpec((1, tn), lambda j: (0, j))])     # b_word_out tile

    out_shape = [jax.ShapeDtypeStruct((B, ntoken), jnp.float32),
                 jax.ShapeDtypeStruct((B, ntag), jnp.float32)]
    out_specs = [pl.BlockSpec((B, tn), lambda j: (0, j)),        # p_word tiles
                 pl.BlockSpec((B, ntag), lambda j: (0, 0))]      # p_tag (step 0)
    for s in state_in:                                           # stacked h/c out
        out_shape.append(jax.ShapeDtypeStruct(s.shape, jnp.float32))
        out_specs.append(pl.BlockSpec(s.shape, lambda j: (0, 0, 0)))

    # Rough cost estimate so XLA's scheduler knows this call is non-trivial.
    rnn_flops = 0
    for l in range(nlayers):
        in_dim = ninp if l == 0 else nhid
        rnn_flops += 2 * B * (in_dim + nhid) * gates * nhid
    rnn_flops *= 2                                     # two branches
    head_flops = 2 * B * nhid * (ntoken + ntag)
    bytes_accessed = 4 * (sum(int(a.size) for a in inputs)
                          + sum(int(s.size) for s in
                                (jax.ShapeDtypeStruct((B, ntoken), jnp.float32),))
                          + B * ntag + n_state * nlayers * B * nhid)
    cost = pl.CostEstimate(flops=rnn_flops + head_flops,
                           transcendentals=2 * 2 * nlayers * B * gates * nhid,
                           bytes_accessed=bytes_accessed)

    outs = pl.pallas_call(
        kernel,
        out_shape=tuple(out_shape),
        grid_spec=pltpu.PrefetchScalarGridSpec(
            num_scalar_prefetch=0,
            grid=(num_vocab_tiles,),
            in_specs=in_specs,
            out_specs=tuple(out_specs),
            scratch_shapes=[pltpu.VMEM((B, nhid), jnp.float32)],
        ),
        compiler_params=pltpu.CompilerParams(
            # Vocab axis must be "arbitrary": step 0 computes the RNN state
            # into core-local VMEM scratch that later vocab tiles consume.
            dimension_semantics=("arbitrary",),
            vmem_limit_bytes=32 * 1024 * 1024,
        ),
        cost_estimate=cost,
    )(*inputs)

    p_word, p_tag = outs[0], outs[1]
    if is_lstm:
        new_hidden_word = (outs[2], outs[3])
        new_hidden_tag = (outs[4], outs[5])
    else:
        new_hidden_word, new_hidden_tag = outs[2], outs[3]
    return p_word, p_tag, new_hidden_word, new_hidden_tag


# -----------------------------------------------------------------------------
# Pure-JAX reference (no Pallas) for numerical sanity checking
# -----------------------------------------------------------------------------
def forward_ref(params, input_token, input_tag, hidden_word, hidden_tag, *,
                rnn_type="LSTM"):
    hp = jax.lax.Precision.HIGHEST

    def dot(a, b):
        return jnp.dot(a, b, precision=hp)

    def run_rnn(x, hidden, layers):
        if rnn_type == "LSTM":
            h0, c0 = hidden
        else:
            h0, c0 = hidden, None
        nhid = h0.shape[-1]
        hs, cs = [], []
        for l in range(h0.shape[0]):
            lp = layers[l]
            h_prev = h0[l]
            if rnn_type == "LSTM":
                g = dot(jnp.concatenate([x, h_prev], -1), lp["w"]) + lp["b"]
                i = jax.nn.sigmoid(g[:, :nhid])
                f = jax.nn.sigmoid(g[:, nhid:2 * nhid])
                gg = jnp.tanh(g[:, 2 * nhid:3 * nhid])
                o = jax.nn.sigmoid(g[:, 3 * nhid:])
                c_new = f * c0[l] + i * gg
                h_new = o * jnp.tanh(c_new)
                cs.append(c_new)
            elif rnn_type == "GRU":
                gi = dot(x, lp["wih_t"]) + lp["bih"]
                gh = dot(h_prev, lp["whh_t"]) + lp["bhh"]
                r = jax.nn.sigmoid(gi[:, :nhid] + gh[:, :nhid])
                z = jax.nn.sigmoid(gi[:, nhid:2 * nhid] + gh[:, nhid:2 * nhid])
                n = jnp.tanh(gi[:, 2 * nhid:] + r * gh[:, 2 * nhid:])
                h_new = (1.0 - z) * n + z * h_prev
            else:
                pre = dot(jnp.concatenate([x, h_prev], -1), lp["w"]) + lp["b"]
                h_new = jnp.tanh(pre) if rnn_type == "RNN_TANH" else jax.nn.relu(pre)
            hs.append(h_new)
            x = h_new
        new_hidden = ((jnp.stack(hs), jnp.stack(cs)) if rnn_type == "LSTM"
                      else jnp.stack(hs))
        return x, new_hidden

    x_word = params["emb_word"][input_token[0]]
    x_tag = params["emb_tag"][input_tag[0]]
    out_word, hw = run_rnn(x_word, hidden_word, params["rnn_word"])
    out_tag, ht = run_rnn(x_tag, hidden_tag, params["rnn_tag"])
    p_tag = dot(out_tag, params["w_tag_out_t"]) + params["b_tag_out"]
    p_word = dot(out_tag + out_word, params["w_word_out_t"]) + params["b_word_out"]
    return p_word, p_tag, hw, ht


# -----------------------------------------------------------------------------
if __name__ == "__main__":
    # Small, TPU-aligned shapes consistent with the module's single-step forward
    # (squeeze(0) => seq_len == 1).  nhid/ninp multiples of 128 keep every gate
    # slice lane-aligned; B = 8 fills the sublanes; ntoken = 2048 exercises the
    # 1024-wide vocab tiling (grid of 2).
    ntoken, ntag, ninp, nhid, nlayers = 2048, 128, 128, 128, 2
    batch, seq_len = 8, 1

    key = jax.random.PRNGKey(0)
    fwd = jax.jit(forward, static_argnames=("rnn_type",))

    for idx, rnn_type in enumerate(("LSTM", "GRU", "RNN_TANH", "RNN_RELU")):
        kcase = jax.random.fold_in(key, idx)
        kp, kt, kg, kh = jax.random.split(kcase, 4)
        params = init_params(kp, rnn_type, ntoken, ntag, ninp, nhid, nlayers)
        input_token = jax.random.randint(kt, (seq_len, batch), 0, ntoken,
                                         dtype=jnp.int32)
        input_tag = jax.random.randint(kg, (seq_len, batch), 0, ntag,
                                       dtype=jnp.int32)

        # Nonzero hidden state (mid-sequence) to exercise the W_hh path; the
        # module's init_hidden (zeros) is also supported via init_hidden().
        def rand_state(k):
            return 0.1 * jax.random.normal(k, (nlayers, batch, nhid), jnp.float32)
        if rnn_type == "LSTM":
            k1, k2, k3, k4 = jax.random.split(kh, 4)
            hidden_word = (rand_state(k1), rand_state(k2))
            hidden_tag = (rand_state(k3), rand_state(k4))
        else:
            k1, k2 = jax.random.split(kh, 2)
            hidden_word = rand_state(k1)
            hidden_tag = rand_state(k2)

        p_word, p_tag, hw, ht = fwd(params, input_token, input_tag,
                                    hidden_word, hidden_tag, rnn_type=rnn_type)
        jax.block_until_ready((p_word, p_tag, hw, ht))

        # --- numerical check against the pure-JAX reference ---
        p_word_r, p_tag_r, hw_r, ht_r = forward_ref(
            params, input_token, input_tag, hidden_word, hidden_tag,
            rnn_type=rnn_type)

        assert p_word.shape == (batch, ntoken)
        assert p_tag.shape == (batch, ntag)

        def close(a, b):
            return bool(jnp.allclose(a, b, atol=1e-4, rtol=1e-4))

        assert close(p_word, p_word_r), f"{rnn_type}: p_word mismatch"
        assert close(p_tag, p_tag_r), f"{rnn_type}: p_tag mismatch"
        if rnn_type == "LSTM":
            assert close(hw[0], hw_r[0]) and close(hw[1], hw_r[1]), \
                f"{rnn_type}: hidden_word mismatch"
            assert close(ht[0], ht_r[0]) and close(ht[1], ht_r[1]), \
                f"{rnn_type}: hidden_tag mismatch"
        else:
            assert close(hw, hw_r), f"{rnn_type}: hidden_word mismatch"
            assert close(ht, ht_r), f"{rnn_type}: hidden_tag mismatch"

    print("KERNEL_OK")
</pallas_src>

<mosaic_0001>
module attributes {stable_mosaic.version = 11 : i64} {
  func.func @kernel(%arg0: i32, %arg1: memref<8x128xf32, #tpu.memory_space<vmem>>, %arg2: memref<8x128xf32, #tpu.memory_space<vmem>>, %arg3: memref<2x8x128xf32, #tpu.memory_space<vmem>>, %arg4: memref<2x8x128xf32, #tpu.memory_space<vmem>>, %arg5: memref<2x8x128xf32, #tpu.memory_space<vmem>>, %arg6: memref<2x8x128xf32, #tpu.memory_space<vmem>>, %arg7: memref<256x512xf32, #tpu.memory_space<vmem>>, %arg8: memref<1x512xf32, #tpu.memory_space<vmem>>, %arg9: memref<256x512xf32, #tpu.memory_space<vmem>>, %arg10: memref<1x512xf32, #tpu.memory_space<vmem>>, %arg11: memref<256x512xf32, #tpu.memory_space<vmem>>, %arg12: memref<1x512xf32, #tpu.memory_space<vmem>>, %arg13: memref<256x512xf32, #tpu.memory_space<vmem>>, %arg14: memref<1x512xf32, #tpu.memory_space<vmem>>, %arg15: memref<128x128xf32, #tpu.memory_space<vmem>>, %arg16: memref<1x128xf32, #tpu.memory_space<vmem>>, %arg17: memref<128x1024xf32, #tpu.memory_space<vmem>>, %arg18: memref<1x1024xf32, #tpu.memory_space<vmem>>, %arg19: memref<8x1024xf32, #tpu.memory_space<vmem>>, %arg20: memref<8x128xf32, #tpu.memory_space<vmem>>, %arg21: memref<2x8x128xf32, #tpu.memory_space<vmem>>, %arg22: memref<2x8x128xf32, #tpu.memory_space<vmem>>, %arg23: memref<2x8x128xf32, #tpu.memory_space<vmem>>, %arg24: memref<2x8x128xf32, #tpu.memory_space<vmem>>, %arg25: memref<8x128xf32, #tpu.memory_space<vmem>>) attributes {dimension_semantics = [#tpu.dimension_semantics<arbitrary>], iteration_bounds = array<i64: 2>, scalar_prefetch = 0 : i64, scratch_operands = 1 : i64, tpu.core_type = #tpu.core_type<tc>, window_params = [{pipeline_mode = #tpu.pipeline_mode<synchronous>, transform_indices = @transform_0, window_bounds = array<i64: 8, 128>}, {pipeline_mode = #tpu.pipeline_mode<synchronous>, transform_indices = @transform_1, window_bounds = array<i64: 8, 128>}, {pipeline_mode = #tpu.pipeline_mode<synchronous>, transform_indices = @transform_2, window_bounds = array<i64: 2, 8, 128>}, {pipeline_mode = #tpu.pipeline_mode<synchronous>, transform_indices = @transform_3, window_bounds = array<i64: 2, 8, 128>}, {pipeline_mode = #tpu.pipeline_mode<synchronous>, transform_indices = @transform_4, window_bounds = array<i64: 2, 8, 128>}, {pipeline_mode = #tpu.pipeline_mode<synchronous>, transform_indices = @transform_5, window_bounds = array<i64: 2, 8, 128>}, {pipeline_mode = #tpu.pipeline_mode<synchronous>, transform_indices = @transform_6, window_bounds = array<i64: 256, 512>}, {pipeline_mode = #tpu.pipeline_mode<synchronous>, transform_indices = @transform_7, window_bounds = array<i64: 1, 512>}, {pipeline_mode = #tpu.pipeline_mode<synchronous>, transform_indices = @transform_8, window_bounds = array<i64: 256, 512>}, {pipeline_mode = #tpu.pipeline_mode<synchronous>, transform_indices = @transform_9, window_bounds = array<i64: 1, 512>}, {pipeline_mode = #tpu.pipeline_mode<synchronous>, transform_indices = @transform_10, window_bounds = array<i64: 256, 512>}, {pipeline_mode = #tpu.pipeline_mode<synchronous>, transform_indices = @transform_11, window_bounds = array<i64: 1, 512>}, {pipeline_mode = #tpu.pipeline_mode<synchronous>, transform_indices = @transform_12, window_bounds = array<i64: 256, 512>}, {pipeline_mode = #tpu.pipeline_mode<synchronous>, transform_indices = @transform_13, window_bounds = array<i64: 1, 512>}, {pipeline_mode = #tpu.pipeline_mode<synchronous>, transform_indices = @transform_14, window_bounds = array<i64: 128, 128>}, {pipeline_mode = #tpu.pipeline_mode<synchronous>, transform_indices = @transform_15, window_bounds = array<i64: 1, 128>}, {transform_indices = @transform_16, window_bounds = array<i64: 128, 1024>}, {transform_indices = @transform_17, window_bounds = array<i64: 1, 1024>}, {transform_indices = @transform_18, window_bounds = array<i64: 8, 1024>}, {pipeline_mode = #tpu.pipeline_mode<synchronous>, transform_indices = @transform_19, window_bounds = array<i64: 8, 128>}, {pipeline_mode = #tpu.pipeline_mode<synchronous>, transform_indices = @transform_20, window_bounds = array<i64: 2, 8, 128>}, {pipeline_mode = #tpu.pipeline_mode<synchronous>, transform_indices = @transform_21, window_bounds = array<i64: 2, 8, 128>}, {pipeline_mode = #tpu.pipeline_mode<synchronous>, transform_indices = @transform_22, window_bounds = array<i64: 2, 8, 128>}, {pipeline_mode = #tpu.pipeline_mode<synchronous>, transform_indices = @transform_23, window_bounds = array<i64: 2, 8, 128>}]} {
    %c0_i32 = arith.constant 0 : i32
    %0 = arith.cmpi eq, %arg0, %c0_i32 : i32
    %1 = arith.extui %0 : i1 to i32
    %c0_i32_0 = arith.constant 0 : i32
    %2 = arith.cmpi ne, %1, %c0_i32_0 : i32
    scf.if %2 {
      %c0_8 = arith.constant 0 : index
      %c0_9 = arith.constant 0 : index
      %10 = vector.load %arg1[%c0_8, %c0_9] : memref<8x128xf32, #tpu.memory_space<vmem>>, vector<8x128xf32>
      %c0_10 = arith.constant 0 : index
      %c0_11 = arith.constant 0 : index
      %c0_12 = arith.constant 0 : index
      %11 = vector.load %arg3[%c0_10, %c0_11, %c0_12] : memref<2x8x128xf32, #tpu.memory_space<vmem>>, vector<1x8x128xf32>
      %12 = vector.shape_cast %11 : vector<1x8x128xf32> to vector<8x128xf32>
      %c0_13 = arith.constant 0 : index
      %c0_14 = arith.constant 0 : index
      %c0_15 = arith.constant 0 : index
      %13 = vector.load %arg4[%c0_13, %c0_14, %c0_15] : memref<2x8x128xf32, #tpu.memory_space<vmem>>, vector<1x8x128xf32>
      %14 = vector.shape_cast %13 : vector<1x8x128xf32> to vector<8x128xf32>
      %15 = tpu.concatenate %10, %12 in 1 : vector<8x128xf32>, vector<8x128xf32> -> vector<8x256xf32>
      %c0_16 = arith.constant 0 : index
      %c0_17 = arith.constant 0 : index
      %16 = vector.load %arg7[%c0_16, %c0_17] : memref<256x512xf32, #tpu.memory_space<vmem>>, vector<256x512xf32>
      %cst_18 = arith.constant dense<0.000000e+00> : vector<8x512xf32>
      %17 = tpu.matmul %15, %16, %cst_18 {dimension_numbers = #tpu.dot_dimension_numbers<[1], [0], [0], [1], [0, 0, 1, 1], [], []>} : vector<8x256xf32>, vector<256x512xf32>, vector<8x512xf32> -> vector<8x512xf32>
      %c0_19 = arith.constant 0 : index
      %c0_20 = arith.constant 0 : index
      %18 = vector.load %arg8[%c0_19, %c0_20] : memref<1x512xf32, #tpu.memory_space<vmem>>, vector<1x512xf32>
      %19 = vector.broadcast %18 : vector<1x512xf32> to vector<8x512xf32>
      %20 = arith.addf %17, %19 : vector<8x512xf32>
      %21 = vector.extract_strided_slice %20 {offsets = [0, 0], sizes = [8, 128], strides = [1, 1]} : vector<8x512xf32> to vector<8x128xf32>
      %cst_21 = arith.constant 5.000000e-01 : f32
      %22 = vector.broadcast %cst_21 : f32 to vector<8x128xf32>
      %23 = arith.mulf %22, %21 : vector<8x128xf32>
      %24 = math.tanh %23 : vector<8x128xf32>
      %cst_22 = arith.constant 1.000000e+00 : f32
      %25 = vector.broadcast %cst_22 : f32 to vector<8x128xf32>
      %26 = arith.addf %24, %25 : vector<8x128xf32>
      %cst_23 = arith.constant 5.000000e-01 : f32
      %27 = vector.broadcast %cst_23 : f32 to vector<8x128xf32>
      %28 = arith.mulf %27, %26 : vector<8x128xf32>
      %29 = vector.extract_strided_slice %20 {offsets = [0, 128], sizes = [8, 128], strides = [1, 1]} : vector<8x512xf32> to vector<8x128xf32>
      %cst_24 = arith.constant 5.000000e-01 : f32
      %30 = vector.broadcast %cst_24 : f32 to vector<8x128xf32>
      %31 = arith.mulf %30, %29 : vector<8x128xf32>
      %32 = math.tanh %31 : vector<8x128xf32>
      %cst_25 = arith.constant 1.000000e+00 : f32
      %33 = vector.broadcast %cst_25 : f32 to vector<8x128xf32>
      %34 = arith.addf %32, %33 : vector<8x128xf32>
      %cst_26 = arith.constant 5.000000e-01 : f32
      %35 = vector.broadcast %cst_26 : f32 to vector<8x128xf32>
      %36 = arith.mulf %35, %34 : vector<8x128xf32>
      %37 = vector.extract_strided_slice %20 {offsets = [0, 256], sizes = [8, 128], strides = [1, 1]} : vector<8x512xf32> to vector<8x128xf32>
      %38 = math.tanh %37 : vector<8x128xf32>
      %39 = vector.extract_strided_slice %20 {offsets = [0, 384], sizes = [8, 128], strides = [1, 1]} : vector<8x512xf32> to vector<8x128xf32>
      %cst_27 = arith.constant 5.000000e-01 : f32
      %40 = vector.broadcast %cst_27 : f32 to vector<8x128xf32>
      %41 = arith.mulf %40, %39 : vector<8x128xf32>
      %42 = math.tanh %41 : vector<8x128xf32>
      %cst_28 = arith.constant 1.000000e+00 : f32
      %43 = vector.broadcast %cst_28 : f32 to vector<8x128xf32>
      %44 = arith.addf %42, %43 : vector<8x128xf32>
      %cst_29 = arith.constant 5.000000e-01 : f32
      %45 = vector.broadcast %cst_29 : f32 to vector<8x128xf32>
      %46 = arith.mulf %45, %44 : vector<8x128xf32>
      %47 = arith.mulf %36, %14 : vector<8x128xf32>
      %48 = arith.mulf %28, %38 : vector<8x128xf32>
      %49 = arith.addf %47, %48 : vector<8x128xf32>
      %50 = math.tanh %49 : vector<8x128xf32>
      %51 = arith.mulf %46, %50 : vector<8x128xf32>
      %c0_30 = arith.constant 0 : index
      %c0_31 = arith.constant 0 : index
      %c0_32 = arith.constant 0 : index
      %52 = vector.load %arg22[%c0_30, %c0_31, %c0_32] : memref<2x8x128xf32, #tpu.memory_space<vmem>>, vector<1x8x128xf32>
      %53 = vector.shape_cast %52 : vector<1x8x128xf32> to vector<8x128xf32>
      %54 = vector.shape_cast %49 : vector<8x128xf32> to vector<1x8x128xf32>
      tpu.vector_store %arg22[%c0_30, %c0_31, %c0_32], %54 {strides = array<i32>} : memref<2x8x128xf32, #tpu.memory_space<vmem>>, vector<1x8x128xf32>,
      %c0_33 = arith.constant 0 : index
      %c0_34 = arith.constant 0 : index
      %c0_35 = arith.constant 0 : index
      %55 = vector.load %arg21[%c0_33, %c0_34, %c0_35] : memref<2x8x128xf32, #tpu.memory_space<vmem>>, vector<1x8x128xf32>
      %56 = vector.shape_cast %55 : vector<1x8x128xf32> to vector<8x128xf32>
      %57 = vector.shape_cast %51 : vector<8x128xf32> to vector<1x8x128xf32>
      tpu.vector_store %arg21[%c0_33, %c0_34, %c0_35], %57 {strides = array<i32>} : memref<2x8x128xf32, #tpu.memory_space<vmem>>, vector<1x8x128xf32>,
      %c1 = arith.constant 1 : index
      %c0_36 = arith.constant 0 : index
      %c0_37 = arith.constant 0 : index
      %58 = vector.load %arg3[%c1, %c0_36, %c0_37] : memref<2x8x128xf32, #tpu.memory_space<vmem>>, vector<1x8x128xf32>
      %59 = vector.shape_cast %58 : vector<1x8x128xf32> to vector<8x128xf32>
      %c1_38 = arith.constant 1 : index
      %c0_39 = arith.constant 0 : index
      %c0_40 = arith.constant 0 : index
      %60 = vector.load %arg4[%c1_38, %c0_39, %c0_40] : memref<2x8x128xf32, #tpu.memory_space<vmem>>, vector<1x8x128xf32>
      %61 = vector.shape_cast %60 : vector<1x8x128xf32> to vector<8x128xf32>
      %62 = tpu.concatenate %51, %59 in 1 : vector<8x128xf32>, vector<8x128xf32> -> vector<8x256xf32>
      %c0_41 = arith.constant 0 : index
      %c0_42 = arith.constant 0 : index
      %63 = vector.load %arg9[%c0_41, %c0_42] : memref<256x512xf32, #tpu.memory_space<vmem>>, vector<256x512xf32>
      %cst_43 = arith.constant dense<0.000000e+00> : vector<8x512xf32>
      %64 = tpu.matmul %62, %63, %cst_43 {dimension_numbers = #tpu.dot_dimension_numbers<[1], [0], [0], [1], [0, 0, 1, 1], [], []>} : vector<8x256xf32>, vector<256x512xf32>, vector<8x512xf32> -> vector<8x512xf32>
      %c0_44 = arith.constant 0 : index
      %c0_45 = arith.constant 0 : index
      %65 = vector.load %arg10[%c0_44, %c0_45] : memref<1x512xf32, #tpu.memory_space<vmem>>, vector<1x512xf32>
      %66 = vector.broadcast %65 : vector<1x512xf32> to vector<8x512xf32>
      %67 = arith.addf %64, %66 : vector<8x512xf32>
      %68 = vector.extract_strided_slice %67 {offsets = [0, 0], sizes = [8, 128], strides = [1, 1]} : vector<8x512xf32> to vector<8x128xf32>
      %cst_46 = arith.constant 5.000000e-01 : f32
      %69 = vector.broadcast %cst_46 : f32 to vector<8x128xf32>
      %70 = arith.mulf %69, %68 : vector<8x128xf32>
      %71 = math.tanh %70 : vector<8x128xf32>
      %cst_47 = arith.constant 1.000000e+00 : f32
      %72 = vector.broadcast %cst_47 : f32 to vector<8x128xf32>
      %73 = arith.addf %71, %72 : vector<8x128xf32>
      %cst_48 = arith.constant 5.000000e-01 : f32
      %74 = vector.broadcast %cst_48 : f32 to vector<8x128xf32>
      %75 = arith.mulf %74, %73 : vector<8x128xf32>
      %76 = vector.extract_strided_slice %67 {offsets = [0, 128], sizes = [8, 128], strides = [1, 1]} : vector<8x512xf32> to vector<8x128xf32>
      %cst_49 = arith.constant 5.000000e-01 : f32
      %77 = vector.broadcast %cst_49 : f32 to vector<8x128xf32>
      %78 = arith.mulf %77, %76 : vector<8x128xf32>
      %79 = math.tanh %78 : vector<8x128xf32>
      %cst_50 = arith.constant 1.000000e+00 : f32
      %80 = vector.broadcast %cst_50 : f32 to vector<8x128xf32>
      %81 = arith.addf %79, %80 : vector<8x128xf32>
      %cst_51 = arith.constant 5.000000e-01 : f32
      %82 = vector.broadcast %cst_51 : f32 to vector<8x128xf32>
      %83 = arith.mulf %82, %81 : vector<8x128xf32>
      %84 = vector.extract_strided_slice %67 {offsets = [0, 256], sizes = [8, 128], strides = [1, 1]} : vector<8x512xf32> to vector<8x128xf32>
      %85 = math.tanh %84 : vector<8x128xf32>
      %86 = vector.extract_strided_slice %67 {offsets = [0, 384], sizes = [8, 128], strides = [1, 1]} : vector<8x512xf32> to vector<8x128xf32>
      %cst_52 = arith.constant 5.000000e-01 : f32
      %87 = vector.broadcast %cst_52 : f32 to vector<8x128xf32>
      %88 = arith.mulf %87, %86 : vector<8x128xf32>
      %89 = math.tanh %88 : vector<8x128xf32>
      %cst_53 = arith.constant 1.000000e+00 : f32
      %90 = vector.broadcast %cst_53 : f32 to vector<8x128xf32>
      %91 = arith.addf %89, %90 : vector<8x128xf32>
      %cst_54 = arith.constant 5.000000e-01 : f32
      %92 = vector.broadcast %cst_54 : f32 to vector<8x128xf32>
      %93 = arith.mulf %92, %91 : vector<8x128xf32>
      %94 = arith.mulf %83, %61 : vector<8x128xf32>
      %95 = arith.mulf %75, %85 : vector<8x128xf32>
      %96 = arith.addf %94, %95 : vector<8x128xf32>
      %97 = math.tanh %96 : vector<8x128xf32>
      %98 = arith.mulf %93, %97 : vector<8x128xf32>
      %c1_55 = arith.constant 1 : index
      %c0_56 = arith.constant 0 : index
      %c0_57 = arith.constant 0 : index
      %99 = vector.load %arg22[%c1_55, %c0_56, %c0_57] : memref<2x8x128xf32, #tpu.memory_space<vmem>>, vector<1x8x128xf32>
      %100 = vector.shape_cast %99 : vector<1x8x128xf32> to vector<8x128xf32>
      %101 = vector.shape_cast %96 : vector<8x128xf32> to vector<1x8x128xf32>
      tpu.vector_store %arg22[%c1_55, %c0_56, %c0_57], %101 {strides = array<i32>} : memref<2x8x128xf32, #tpu.memory_space<vmem>>, vector<1x8x128xf32>,
      %c1_58 = arith.constant 1 : index
      %c0_59 = arith.constant 0 : index
      %c0_60 = arith.constant 0 : index
      %102 = vector.load %arg21[%c1_58, %c0_59, %c0_60] : memref<2x8x128xf32, #tpu.memory_space<vmem>>, vector<1x8x128xf32>
      %103 = vector.shape_cast %102 : vector<1x8x128xf32> to vector<8x128xf32>
      %104 = vector.shape_cast %98 : vector<8x128xf32> to vector<1x8x128xf32>
      tpu.vector_store %arg21[%c1_58, %c0_59, %c0_60], %104 {strides = array<i32>} : memref<2x8x128xf32, #tpu.memory_space<vmem>>, vector<1x8x128xf32>,
      %c0_61 = arith.constant 0 : index
      %c0_62 = arith.constant 0 : index
      %105 = vector.load %arg2[%c0_61, %c0_62] : memref<8x128xf32, #tpu.memory_space<vmem>>, vector<8x128xf32>
      %c0_63 = arith.constant 0 : index
      %c0_64 = arith.constant 0 : index
      %c0_65 = arith.constant 0 : index
      %106 = vector.load %arg5[%c0_63, %c0_64, %c0_65] : memref<2x8x128xf32, #tpu.memory_space<vmem>>, vector<1x8x128xf32>
      %107 = vector.shape_cast %106 : vector<1x8x128xf32> to vector<8x128xf32>
      %c0_66 = arith.constant 0 : index
      %c0_67 = arith.constant 0 : index
      %c0_68 = arith.constant 0 : index
      %108 = vector.load %arg6[%c0_66, %c0_67, %c0_68] : memref<2x8x128xf32, #tpu.memory_space<vmem>>, vector<1x8x128xf32>
      %109 = vector.shape_cast %108 : vector<1x8x128xf32> to vector<8x128xf32>
      %110 = tpu.concatenate %105, %107 in 1 : vector<8x128xf32>, vector<8x128xf32> -> vector<8x256xf32>
      %c0_69 = arith.constant 0 : index
      %c0_70 = arith.constant 0 : index
      %111 = vector.load %arg11[%c0_69, %c0_70] : memref<256x512xf32, #tpu.memory_space<vmem>>, vector<256x512xf32>
      %cst_71 = arith.constant dense<0.000000e+00> : vector<8x512xf32>
      %112 = tpu.matmul %110, %111, %cst_71 {dimension_numbers = #tpu.dot_dimension_numbers<[1], [0], [0], [1], [0, 0, 1, 1], [], []>} : vector<8x256xf32>, vector<256x512xf32>, vector<8x512xf32> -> vector<8x512xf32>
      %c0_72 = arith.constant 0 : index
      %c0_73 = arith.constant 0 : index
      %113 = vector.load %arg12[%c0_72, %c0_73] : memref<1x512xf32, #tpu.memory_space<vmem>>, vector<1x512xf32>
      %114 = vector.broadcast %113 : vector<1x512xf32> to vector<8x512xf32>
      %115 = arith.addf %112, %114 : vector<8x512xf32>
      %116 = vector.extract_strided_slice %115 {offsets = [0, 0], sizes = [8, 128], strides = [1, 1]} : vector<8x512xf32> to vector<8x128xf32>
      %cst_74 = arith.constant 5.000000e-01 : f32
      %117 = vector.broadcast %cst_74 : f32 to vector<8x128xf32>
      %118 = arith.mulf %117, %116 : vector<8x128xf32>
      %119 = math.tanh %118 : vector<8x128xf32>
      %cst_75 = arith.constant 1.000000e+00 : f32
      %120 = vector.broadcast %cst_75 : f32 to vector<8x128xf32>
      %121 = arith.addf %119, %120 : vector<8x128xf32>
      %cst_76 = arith.constant 5.000000e-01 : f32
      %122 = vector.broadcast %cst_76 : f32 to vector<8x128xf32>
      %123 = arith.mulf %122, %121 : vector<8x128xf32>
      %124 = vector.extract_strided_slice %115 {offsets = [0, 128], sizes = [8, 128], strides = [1, 1]} : vector<8x512xf32> to vector<8x128xf32>
      %cst_77 = arith.constant 5.000000e-01 : f32
      %125 = vector.broadcast %cst_77 : f32 to vector<8x128xf32>
      %126 = arith.mulf %125, %124 : vector<8x128xf32>
      %127 = math.tanh %126 : vector<8x128xf32>
      %cst_78 = arith.constant 1.000000e+00 : f32
      %128 = vector.broadcast %cst_78 : f32 to vector<8x128xf32>
      %129 = arith.addf %127, %128 : vector<8x128xf32>
      %cst_79 = arith.constant 5.000000e-01 : f32
      %130 = vector.broadcast %cst_79 : f32 to vector<8x128xf32>
      %131 = arith.mulf %130, %129 : vector<8x128xf32>
      %132 = vector.extract_strided_slice %115 {offsets = [0, 256], sizes = [8, 128], strides = [1, 1]} : vector<8x512xf32> to vector<8x128xf32>
      %133 = math.tanh %132 : vector<8x128xf32>
      %134 = vector.extract_strided_slice %115 {offsets = [0, 384], sizes = [8, 128], strides = [1, 1]} : vector<8x512xf32> to vector<8x128xf32>
      %cst_80 = arith.constant 5.000000e-01 : f32
      %135 = vector.broadcast %cst_80 : f32 to vector<8x128xf32>
      %136 = arith.mulf %135, %134 : vector<8x128xf32>
      %137 = math.tanh %136 : vector<8x128xf32>
      %cst_81 = arith.constant 1.000000e+00 : f32
      %138 = vector.broadcast %cst_81 : f32 to vector<8x128xf32>
      %139 = arith.addf %137, %138 : vector<8x128xf32>
      %cst_82 = arith.constant 5.000000e-01 : f32
      %140 = vector.broadcast %cst_82 : f32 to vector<8x128xf32>
      %141 = arith.mulf %140, %139 : vector<8x128xf32>
      %142 = arith.mulf %131, %109 : vector<8x128xf32>
      %143 = arith.mulf %123, %133 : vector<8x128xf32>
      %144 = arith.addf %142, %143 : vector<8x128xf32>
      %145 = math.tanh %144 : vector<8x128xf32>
      %146 = arith.mulf %141, %145 : vector<8x128xf32>
      %c0_83 = arith.constant 0 : index
      %c0_84 = arith.constant 0 : index
      %c0_85 = arith.constant 0 : index
      %147 = vector.load %arg24[%c0_83, %c0_84, %c0_85] : memref<2x8x128xf32, #tpu.memory_space<vmem>>, vector<1x8x128xf32>
      %148 = vector.shape_cast %147 : vector<1x8x128xf32> to vector<8x128xf32>
      %149 = vector.shape_cast %144 : vector<8x128xf32> to vector<1x8x128xf32>
      tpu.vector_store %arg24[%c0_83, %c0_84, %c0_85], %149 {strides = array<i32>} : memref<2x8x128xf32, #tpu.memory_space<vmem>>, vector<1x8x128xf32>,
      %c0_86 = arith.constant 0 : index
      %c0_87 = arith.constant 0 : index
      %c0_88 = arith.constant 0 : index
      %150 = vector.load %arg23[%c0_86, %c0_87, %c0_88] : memref<2x8x128xf32, #tpu.memory_space<vmem>>, vector<1x8x128xf32>
      %151 = vector.shape_cast %150 : vector<1x8x128xf32> to vector<8x128xf32>
      %152 = vector.shape_cast %146 : vector<8x128xf32> to vector<1x8x128xf32>
      tpu.vector_store %arg23[%c0_86, %c0_87, %c0_88], %152 {strides = array<i32>} : memref<2x8x128xf32, #tpu.memory_space<vmem>>, vector<1x8x128xf32>,
      %c1_89 = arith.constant 1 : index
      %c0_90 = arith.constant 0 : index
      %c0_91 = arith.constant 0 : index
      %153 = vector.load %arg5[%c1_89, %c0_90, %c0_91] : memref<2x8x128xf32, #tpu.memory_space<vmem>>, vector<1x8x128xf32>
      %154 = vector.shape_cast %153 : vector<1x8x128xf32> to vector<8x128xf32>
      %c1_92 = arith.constant 1 : index
      %c0_93 = arith.constant 0 : index
      %c0_94 = arith.constant 0 : index
      %155 = vector.load %arg6[%c1_92, %c0_93, %c0_94] : memref<2x8x128xf32, #tpu.memory_space<vmem>>, vector<1x8x128xf32>
      %156 = vector.shape_cast %155 : vector<1x8x128xf32> to vector<8x128xf32>
      %157 = tpu.concatenate %146, %154 in 1 : vector<8x128xf32>, vector<8x128xf32> -> vector<8x256xf32>
      %c0_95 = arith.constant 0 : index
      %c0_96 = arith.constant 0 : index
      %158 = vector.load %arg13[%c0_95, %c0_96] : memref<256x512xf32, #tpu.memory_space<vmem>>, vector<256x512xf32>
      %cst_97 = arith.constant dense<0.000000e+00> : vector<8x512xf32>
      %159 = tpu.matmul %157, %158, %cst_97 {dimension_numbers = #tpu.dot_dimension_numbers<[1], [0], [0], [1], [0, 0, 1, 1], [], []>} : vector<8x256xf32>, vector<256x512xf32>, vector<8x512xf32> -> vector<8x512xf32>
      %c0_98 = arith.constant 0 : index
      %c0_99 = arith.constant 0 : index
      %160 = vector.load %arg14[%c0_98, %c0_99] : memref<1x512xf32, #tpu.memory_space<vmem>>, vector<1x512xf32>
      %161 = vector.broadcast %160 : vector<1x512xf32> to vector<8x512xf32>
      %162 = arith.addf %159, %161 : vector<8x512xf32>
      %163 = vector.extract_strided_slice %162 {offsets = [0, 0], sizes = [8, 128], strides = [1, 1]} : vector<8x512xf32> to vector<8x128xf32>
      %cst_100 = arith.constant 5.000000e-01 : f32
      %164 = vector.broadcast %cst_100 : f32 to vector<8x128xf32>
      %165 = arith.mulf %164, %163 : vector<8x128xf32>
      %166 = math.tanh %165 : vector<8x128xf32>
      %cst_101 = arith.constant 1.000000e+00 : f32
      %167 = vector.broadcast %cst_101 : f32 to vector<8x128xf32>
      %168 = arith.addf %166, %167 : vector<8x128xf32>
      %cst_102 = arith.constant 5.000000e-01 : f32
      %169 = vector.broadcast %cst_102 : f32 to vector<8x128xf32>
      %170 = arith.mulf %169, %168 : vector<8x128xf32>
      %171 = vector.extract_strided_slice %162 {offsets = [0, 128], sizes = [8, 128], strides = [1, 1]} : vector<8x512xf32> to vector<8x128xf32>
      %cst_103 = arith.constant 5.000000e-01 : f32
      %172 = vector.broadcast %cst_103 : f32 to vector<8x128xf32>
      %173 = arith.mulf %172, %171 : vector<8x128xf32>
      %174 = math.tanh %173 : vector<8x128xf32>
      %cst_104 = arith.constant 1.000000e+00 : f32
      %175 = vector.broadcast %cst_104 : f32 to vector<8x128xf32>
      %176 = arith.addf %174, %175 : vector<8x128xf32>
      %cst_105 = arith.constant 5.000000e-01 : f32
      %177 = vector.broadcast %cst_105 : f32 to vector<8x128xf32>
      %178 = arith.mulf %177, %176 : vector<8x128xf32>
      %179 = vector.extract_strided_slice %162 {offsets = [0, 256], sizes = [8, 128], strides = [1, 1]} : vector<8x512xf32> to vector<8x128xf32>
      %180 = math.tanh %179 : vector<8x128xf32>
      %181 = vector.extract_strided_slice %162 {offsets = [0, 384], sizes = [8, 128], strides = [1, 1]} : vector<8x512xf32> to vector<8x128xf32>
      %cst_106 = arith.constant 5.000000e-01 : f32
      %182 = vector.broadcast %cst_106 : f32 to vector<8x128xf32>
      %183 = arith.mulf %182, %181 : vector<8x128xf32>
      %184 = math.tanh %183 : vector<8x128xf32>
      %cst_107 = arith.constant 1.000000e+00 : f32
      %185 = vector.broadcast %cst_107 : f32 to vector<8x128xf32>
      %186 = arith.addf %184, %185 : vector<8x128xf32>
      %cst_108 = arith.constant 5.000000e-01 : f32
      %187 = vector.broadcast %cst_108 : f32 to vector<8x128xf32>
      %188 = arith.mulf %187, %186 : vector<8x128xf32>
      %189 = arith.mulf %178, %156 : vector<8x128xf32>
      %190 = arith.mulf %170, %180 : vector<8x128xf32>
      %191 = arith.addf %189, %190 : vector<8x128xf32>
      %192 = math.tanh %191 : vector<8x128xf32>
      %193 = arith.mulf %188, %192 : vector<8x128xf32>
      %c1_109 = arith.constant 1 : index
      %c0_110 = arith.constant 0 : index
      %c0_111 = arith.constant 0 : index
      %194 = vector.load %arg24[%c1_109, %c0_110, %c0_111] : memref<2x8x128xf32, #tpu.memory_space<vmem>>, vector<1x8x128xf32>
      %195 = vector.shape_cast %194 : vector<1x8x128xf32> to vector<8x128xf32>
      %196 = vector.shape_cast %191 : vector<8x128xf32> to vector<1x8x128xf32>
      tpu.vector_store %arg24[%c1_109, %c0_110, %c0_111], %196 {strides = array<i32>} : memref<2x8x128xf32, #tpu.memory_space<vmem>>, vector<1x8x128xf32>,
      %c1_112 = arith.constant 1 : index
      %c0_113 = arith.constant 0 : index
      %c0_114 = arith.constant 0 : index
      %197 = vector.load %arg23[%c1_112, %c0_113, %c0_114] : memref<2x8x128xf32, #tpu.memory_space<vmem>>, vector<1x8x128xf32>
      %198 = vector.shape_cast %197 : vector<1x8x128xf32> to vector<8x128xf32>
      %199 = vector.shape_cast %193 : vector<8x128xf32> to vector<1x8x128xf32>
      tpu.vector_store %arg23[%c1_112, %c0_113, %c0_114], %199 {strides = array<i32>} : memref<2x8x128xf32, #tpu.memory_space<vmem>>, vector<1x8x128xf32>,
      %200 = arith.addf %98, %193 : vector<8x128xf32>
      %c0_115 = arith.constant 0 : index
      %c0_116 = arith.constant 0 : index
      %201 = vector.load %arg25[%c0_115, %c0_116] : memref<8x128xf32, #tpu.memory_space<vmem>>, vector<8x128xf32>
      tpu.vector_store %arg25[%c0_115, %c0_116], %200 {strides = array<i32>} : memref<8x128xf32, #tpu.memory_space<vmem>>, vector<8x128xf32>,
      %c0_117 = arith.constant 0 : index
      %c0_118 = arith.constant 0 : index
      %202 = vector.load %arg15[%c0_117, %c0_118] : memref<128x128xf32, #tpu.memory_space<vmem>>, vector<128x128xf32>
      %cst_119 = arith.constant dense<0.000000e+00> : vector<8x128xf32>
      %203 = tpu.matmul %193, %202, %cst_119 {dimension_numbers = #tpu.dot_dimension_numbers<[1], [0], [0], [1], [0, 0, 1, 1], [], []>} : vector<8x128xf32>, vector<128x128xf32>, vector<8x128xf32> -> vector<8x128xf32>
      %c0_120 = arith.constant 0 : index
      %c0_121 = arith.constant 0 : index
      %204 = vector.load %arg16[%c0_120, %c0_121] : memref<1x128xf32, #tpu.memory_space<vmem>>, vector<1x128xf32>
      %205 = vector.broadcast %204 : vector<1x128xf32> to vector<8x128xf32>
      %206 = arith.addf %203, %205 : vector<8x128xf32>
      %c0_122 = arith.constant 0 : index
      %c0_123 = arith.constant 0 : index
      %207 = vector.load %arg20[%c0_122, %c0_123] : memref<8x128xf32, #tpu.memory_space<vmem>>, vector<8x128xf32>
      tpu.vector_store %arg20[%c0_122, %c0_123], %206 {strides = array<i32>} : memref<8x128xf32, #tpu.memory_space<vmem>>, vector<8x128xf32>,
    } else {
    }
    %c0 = arith.constant 0 : index
    %c0_1 = arith.constant 0 : index
    %3 = vector.load %arg25[%c0, %c0_1] : memref<8x128xf32, #tpu.memory_space<vmem>>, vector<8x128xf32>
    %c0_2 = arith.constant 0 : index
    %c0_3 = arith.constant 0 : index
    %4 = vector.load %arg17[%c0_2, %c0_3] : memref<128x1024xf32, #tpu.memory_space<vmem>>, vector<128x1024xf32>
    %cst = arith.constant dense<0.000000e+00> : vector<8x1024xf32>
    %5 = tpu.matmul %3, %4, %cst {dimension_numbers = #tpu.dot_dimension_numbers<[1], [0], [0], [1], [0, 0, 1, 1], [], []>} : vector<8x128xf32>, vector<128x1024xf32>, vector<8x1024xf32> -> vector<8x1024xf32>
    %c0_4 = arith.constant 0 : index
    %c0_5 = arith.constant 0 : index
    %6 = vector.load %arg18[%c0_4, %c0_5] : memref<1x1024xf32, #tpu.memory_space<vmem>>, vector<1x1024xf32>
    %7 = vector.broadcast %6 : vector<1x1024xf32> to vector<8x1024xf32>
    %8 = arith.addf %5, %7 : vector<8x1024xf32>
    %c0_6 = arith.constant 0 : index
    %c0_7 = arith.constant 0 : index
    %9 = vector.load %arg19[%c0_6, %c0_7] : memref<8x1024xf32, #tpu.memory_space<vmem>>, vector<8x1024xf32>
    tpu.vector_store %arg19[%c0_6, %c0_7], %8 {strides = array<i32>} : memref<8x1024xf32, #tpu.memory_space<vmem>>, vector<8x1024xf32>,
    return
  }
  func.func @transform_0(%arg0: i32) -> (i32, i32) {
    %c0_i32 = arith.constant 0 : i32
    %c0_i32_0 = arith.constant 0 : i32
    %c0_i32_1 = arith.constant 0 : i32
    return %c0_i32, %c0_i32_0 : i32, i32
  }
  func.func @transform_1(%arg0: i32) -> (i32, i32) {
    %c0_i32 = arith.constant 0 : i32
    %c0_i32_0 = arith.constant 0 : i32
    %c0_i32_1 = arith.constant 0 : i32
    return %c0_i32, %c0_i32_0 : i32, i32
  }
  func.func @transform_2(%arg0: i32) -> (i32, i32, i32) {
    %c0_i32 = arith.constant 0 : i32
    %c0_i32_0 = arith.constant 0 : i32
    %c0_i32_1 = arith.constant 0 : i32
    %c0_i32_2 = arith.constant 0 : i32
    return %c0_i32, %c0_i32_0, %c0_i32_1 : i32, i32, i32
  }
  func.func @transform_3(%arg0: i32) -> (i32, i32, i32) {
    %c0_i32 = arith.constant 0 : i32
    %c0_i32_0 = arith.constant 0 : i32
    %c0_i32_1 = arith.constant 0 : i32
    %c0_i32_2 = arith.constant 0 : i32
    return %c0_i32, %c0_i32_0, %c0_i32_1 : i32, i32, i32
  }
  func.func @transform_4(%arg0: i32) -> (i32, i32, i32) {
    %c0_i32 = arith.constant 0 : i32
    %c0_i32_0 = arith.constant 0 : i32
    %c0_i32_1 = arith.constant 0 : i32
    %c0_i32_2 = arith.constant 0 : i32
    return %c0_i32, %c0_i32_0, %c0_i32_1 : i32, i32, i32
  }
  func.func @transform_5(%arg0: i32) -> (i32, i32, i32) {
    %c0_i32 = arith.constant 0 : i32
    %c0_i32_0 = arith.constant 0 : i32
    %c0_i32_1 = arith.constant 0 : i32
    %c0_i32_2 = arith.constant 0 : i32
    return %c0_i32, %c0_i32_0, %c0_i32_1 : i32, i32, i32
  }
  func.func @transform_6(%arg0: i32) -> (i32, i32) {
    %c0_i32 = arith.constant 0 : i32
    %c0_i32_0 = arith.constant 0 : i32
    %c0_i32_1 = arith.constant 0 : i32
    return %c0_i32, %c0_i32_0 : i32, i32
  }
  func.func @transform_7(%arg0: i32) -> (i32, i32) {
    %c0_i32 = arith.constant 0 : i32
    %c0_i32_0 = arith.constant 0 : i32
    %c0_i32_1 = arith.constant 0 : i32
    return %c0_i32, %c0_i32_0 : i32, i32
  }
  func.func @transform_8(%arg0: i32) -> (i32, i32) {
    %c0_i32 = arith.constant 0 : i32
    %c0_i32_0 = arith.constant 0 : i32
    %c0_i32_1 = arith.constant 0 : i32
    return %c0_i32, %c0_i32_0 : i32, i32
  }
  func.func @transform_9(%arg0: i32) -> (i32, i32) {
    %c0_i32 = arith.constant 0 : i32
    %c0_i32_0 = arith.constant 0 : i32
    %c0_i32_1 = arith.constant 0 : i32
    return %c0_i32, %c0_i32_0 : i32, i32
  }
  func.func @transform_10(%arg0: i32) -> (i32, i32) {
    %c0_i32 = arith.constant 0 : i32
    %c0_i32_0 = arith.constant 0 : i32
    %c0_i32_1 = arith.constant 0 : i32
    return %c0_i32, %c0_i32_0 : i32, i32
  }
  func.func @transform_11(%arg0: i32) -> (i32, i32) {
    %c0_i32 = arith.constant 0 : i32
    %c0_i32_0 = arith.constant 0 : i32
    %c0_i32_1 = arith.constant 0 : i32
    return %c0_i32, %c0_i32_0 : i32, i32
  }
  func.func @transform_12(%arg0: i32) -> (i32, i32) {
    %c0_i32 = arith.constant 0 : i32
    %c0_i32_0 = arith.constant 0 : i32
    %c0_i32_1 = arith.constant 0 : i32
    return %c0_i32, %c0_i32_0 : i32, i32
  }
  func.func @transform_13(%arg0: i32) -> (i32, i32) {
    %c0_i32 = arith.constant 0 : i32
    %c0_i32_0 = arith.constant 0 : i32
    %c0_i32_1 = arith.constant 0 : i32
    return %c0_i32, %c0_i32_0 : i32, i32
  }
  func.func @transform_14(%arg0: i32) -> (i32, i32) {
    %c0_i32 = arith.constant 0 : i32
    %c0_i32_0 = arith.constant 0 : i32
    %c0_i32_1 = arith.constant 0 : i32
    return %c0_i32, %c0_i32_0 : i32, i32
  }
  func.func @transform_15(%arg0: i32) -> (i32, i32) {
    %c0_i32 = arith.constant 0 : i32
    %c0_i32_0 = arith.constant 0 : i32
    %c0_i32_1 = arith.constant 0 : i32
    return %c0_i32, %c0_i32_0 : i32, i32
  }
  func.func @transform_16(%arg0: i32) -> (i32, i32) {
    %c0_i32 = arith.constant 0 : i32
    %c0_i32_0 = arith.constant 0 : i32
    return %c0_i32, %arg0 : i32, i32
  }
  func.func @transform_17(%arg0: i32) -> (i32, i32) {
    %c0_i32 = arith.constant 0 : i32
    %c0_i32_0 = arith.constant 0 : i32
    return %c0_i32, %arg0 : i32, i32
  }
  func.func @transform_18(%arg0: i32) -> (i32, i32) {
    %c0_i32 = arith.constant 0 : i32
    %c0_i32_0 = arith.constant 0 : i32
    return %c0_i32, %arg0 : i32, i32
  }
  func.func @transform_19(%arg0: i32) -> (i32, i32) {
    %c0_i32 = arith.constant 0 : i32
    %c0_i32_0 = arith.constant 0 : i32
    %c0_i32_1 = arith.constant 0 : i32
    return %c0_i32, %c0_i32_0 : i32, i32
  }
  func.func @transform_20(%arg0: i32) -> (i32, i32, i32) {
    %c0_i32 = arith.constant 0 : i32
    %c0_i32_0 = arith.constant 0 : i32
    %c0_i32_1 = arith.constant 0 : i32
    %c0_i32_2 = arith.constant 0 : i32
    return %c0_i32, %c0_i32_0, %c0_i32_1 : i32, i32, i32
  }
  func.func @transform_21(%arg0: i32) -> (i32, i32, i32) {
    %c0_i32 = arith.constant 0 : i32
    %c0_i32_0 = arith.constant 0 : i32
    %c0_i32_1 = arith.constant 0 : i32
    %c0_i32_2 = arith.constant 0 : i32
    return %c0_i32, %c0_i32_0, %c0_i32_1 : i32, i32, i32
  }
  func.func @transform_22(%arg0: i32) -> (i32, i32, i32) {
    %c0_i32 = arith.constant 0 : i32
    %c0_i32_0 = arith.constant 0 : i32
    %c0_i32_1 = arith.constant 0 : i32
    %c0_i32_2 = arith.constant 0 : i32
    return %c0_i32, %c0_i32_0, %c0_i32_1 : i32, i32, i32
  }
  func.func @transform_23(%arg0: i32) -> (i32, i32, i32) {
    %c0_i32 = arith.constant 0 : i32
    %c0_i32_0 = arith.constant 0 : i32
    %c0_i32_1 = arith.constant 0 : i32
    %c0_i32_2 = arith.constant 0 : i32
    return %c0_i32, %c0_i32_0, %c0_i32_1 : i32, i32, i32
  }
}

</mosaic_0001>

<bundles_post_ra>
// kernel: forward.1
= control target key start
LH: loop header
LB: loop body
LE: loop exit
PB: predicated region body
PF: predicated region fallthrough
CT: control target
= control target key end

     0   :  { %s5176_s0 = inlined_call_operand.vmem [shape: f32[8,128], index: 0, kind: input, shape index: {}]   ;;  %s5177_s1 = inlined_call_operand.vmem [shape: f32[8,128], index: 1, kind: input, shape index: {}]   ;;  %s5178_s2 = inlined_call_operand.vmem [shape: f32[2,8,128], index: 2, kind: input, shape index: {}]   ;;  %s5179_s3 = inlined_call_operand.vmem [shape: f32[2,8,128], index: 3, kind: input, shape index: {}]   ;;  %s5180_s4 = inlined_call_operand.vmem [shape: f32[2,8,128], index: 4, kind: input, shape index: {}]   ;;  %s5181_s5 = inlined_call_operand.vmem [shape: f32[2,8,128], index: 5, kind: input, shape index: {}]   ;;  %s5182_s6 = inlined_call_operand.hbm [shape: f32[256,512], index: 6, kind: input, shape index: {}]   ;;  %s5183_s7 = inlined_call_operand.vmem [shape: f32[1,512], index: 7, kind: input, shape index: {}]   ;;  %s5184_s8 = inlined_call_operand.hbm [shape: f32[256,512], index: 8, kind: input, shape index: {}]   ;;  %s5185_s9 = inlined_call_operand.vmem [shape: f32[1,512], index: 9, kind: input, shape index: {}]   ;;  %s5186_s10 = inlined_call_operand.hbm [shape: f32[256,512], index: 10, kind: input, shape index: {}]   ;;  %s5187_s11 = inlined_call_operand.hbm [shape: f32[1,512], index: 11, kind: input, shape index: {}]   ;;  %s5188_s12 = inlined_call_operand.hbm [shape: f32[256,512], index: 12, kind: input, shape index: {}]   ;;  %s5189_s13 = inlined_call_operand.hbm [shape: f32[1,512], index: 13, kind: input, shape index: {}]   ;;  %s5190_s14 = inlined_call_operand.vmem [shape: f32[128,128], index: 14, kind: input, shape index: {}]   ;;  %s5191_s15 = inlined_call_operand.vmem [shape: f32[1,128], index: 15, kind: input, shape index: {}]   ;;  %s5192_s16 = inlined_call_operand.hbm [shape: f32[128,2048], index: 16, kind: input, shape index: {}]   ;;  %s5193_s17 = inlined_call_operand.vmem [shape: f32[1,2048], index: 17, kind: input, shape index: {}]   ;;  %s5194_s18 = inlined_call_operand.hbm [shape: f32[8,2048], index: 18, kind: output, shape index: {0}]   ;;  %s5195_s19 = inlined_call_operand.hbm [shape: f32[8,128], index: 19, kind: output, shape index: {1}]   ;;  %s5196_s20 = inlined_call_operand.hbm [shape: f32[2,8,128], index: 20, kind: output, shape index: {2}]   ;;  %s5197_s21 = inlined_call_operand.hbm [shape: f32[2,8,128], index: 21, kind: output, shape index: {3}]   ;;  %s5198_s22 = inlined_call_operand.hbm [shape: f32[2,8,128], index: 22, kind: output, shape index: {4}]   ;;  %s5199_s23 = inlined_call_operand.hbm [shape: f32[2,8,128], index: 23, kind: output, shape index: {5}]  }
   0x1   :  { %5223 = sst [smem:[#allocation33_spill]] %s5176_s0 }
   0x2   :  { %5224 = sst [smem:[#allocation34_spill]] %s5177_s1 }
   0x3   :  { %5225 = sst [smem:[#allocation35_spill]] %s5178_s2 }
   0x4   :  { %5226 = sst [smem:[#allocation36_spill]] %s5179_s3 }
   0x5   :  { %5227 = sst [smem:[#allocation37_spill]] %s5180_s4 }
   0x6   :  { %5228 = sst [smem:[#allocation38_spill]] %s5181_s5 }
   0x7   :  { %5229 = sst [smem:[#allocation39_spill]] %s5182_s6 }
   0x8   :  { %5230 = sst [smem:[#allocation40_spill]] %s5183_s7 }
   0x9   :  { %5231 = sst [smem:[#allocation41_spill]] %s5184_s8 }
   0xa   :  { %5232 = sst [smem:[#allocation42_spill]] %s5185_s9 }
   0xb   :  { %5233 = sst [smem:[#allocation43_spill]] %s5186_s10 }
   0xc   :  { %5234 = sst [smem:[#allocation44_spill]] %s5187_s11 }
   0xd   :  { %5235 = sst [smem:[#allocation45_spill]] %s5188_s12 }
   0xe   :  { %5236 = sst [smem:[#allocation46_spill]] %s5189_s13 }
   0xf   :  { %5237 = sst [smem:[#allocation47_spill]] %s5190_s14 }
  0x10   :  { %5238 = sst [smem:[#allocation48_spill]] %s5191_s15 }
  0x11   :  { %5239 = sst [smem:[#allocation49_spill]] %s5194_s18 }
  0x12   :  { %5240 = sst [smem:[#allocation50_spill]] %s5195_s19 }
  0x13   :  { %5241 = sst [smem:[#allocation51_spill]] %s5196_s20 }
  0x14   :  { %5242 = sst [smem:[#allocation52_spill]] %s5197_s21 }
  0x15   :  { %5243 = sst [smem:[#allocation53_spill]] %s5198_s22 }
  0x16   :  { %5244 = sst [smem:[#allocation54_spill]] %s5199_s23 }
  0x17   :  { %29 = vsyncpa [#allocation4], 0 }
  0x18   :  { %30 = vsyncpa [#allocation7], 0 }
  0x19   :  { %31 = vsyncpa [#allocation10], 0 }
  0x1a   :  { %32 = vsyncpa [#allocation13], 0 }
  0x1b   :  { %33 = vsyncpa [#allocation5], 0 }
  0x1c   :  { %35 = vsyncpa [#allocation5 + $0x1], 0 }
  0x1d   :  { %36 = vsyncpa [#allocation17], 0 }
  0x1e   :  { %37 = vsyncpa [#allocation20], 0 }
  0x1f   :  { %38 = vsyncpa [#allocation23], 0  ;;  %s4438_s4 = smov 0   ;;  %s4440_s30 = smov 0  }
  0x20   :  { %s4442_s24 = smov 0   ;;  %s4444_s25 = smov 0  }
  0x21 LB: > { %s4294_s5 = smov [#allocation3]   ;;  %s4459_s26 = sadd.s32 4294967295, %s4292_s25   ;;  %s4292_s25 = sphi %s4444_s25, %s5316_s25   ;;  %s4288_s24 = sphi %s4442_s24, %s5315_s24   ;;  %s4284_s30 = sphi %s4440_s30, %s5314_s30   ;;  %s4280_s4 = sphi %s4438_s4, %s5313_s4  }
  0x22   : > { %s598_s1 = sshll.u32 %s4294_s5, 4  ;;  %p2917_p0 = scmp.ge.s32.totalorder %s4292_s25, 1  ;;  %s4465_s1 = int_to_ptr.vmem [resolvable:$true] %s598_s1 }
  0x23   : > { %p5214_p1 = scmp.eq.s32.totalorder %s4459_s26, 0  ;;  %p568_p2 = scmp.lt.s32.totalorder %s4292_s25, 3 }
  0x24   : > { %s4295_s6 = smov [#allocation6]   ;;  %s4296_s28 = smov [#allocation9]  }
  0x25   : > { %p4467_p4 = pnand %p2917_p0, %p568_p2  ;;  %s614_s27 = sshll.u32 %s4295_s6, 4  ;;  %s4480_s27 = int_to_ptr.vmem [resolvable:$true] %s614_s27 }
  0x26   : > { %s644_s29 = sshll.u32 %s4296_s28, 4  ;;  %s5247_s5 = sld [smem:[#allocation39_spill]]  ;;  %s4482_s29 = int_to_ptr.vmem [resolvable:$true] %s644_s29 }
  0x27   : > { %s5245_s2 = scalar_select %p4467_p4, 1, 0 }
  0x28   : > { %p3725_p6 = pneg %p4467_p4 }
  0x2a   : > { %p4476_p7 = pnand %p3725_p6, %p5214_p1 }
  0x2c   : > { %s3870_s18 = scalar_lea.hbm %s5247_s5, 16384  ;;  %p4492_p9 = pneg %p4476_p7 }
  0x2d   : > { %p3871_p8 = scmp.ne.s32.totalorder %s5247_s5, %s3870_s18  ;;  %p3877_p12 = scmp.lt.u32.totalorder %s3870_s18, %s5247_s5 }
  0x2f   : > { %p3873_p10 = pnand %p4492_p9, %p3871_p8 }
  0x31   : > { %p3874_p11 = pneg %p3873_p10 }
  0x33   : > { %p3879_p13 = pnand %p3877_p12, %p3874_p11 }
  0x35   : > { %3882 = shalt.err (!%p3879_p13)
}
  0x36   : > { %s3883_s22 = scalar_lea.vmem %s4465_s1, 16384  ;;  %p3891_p5 = scmp.lt.s32.totalorder %s4465_s1, %s4465_s1 }
  0x37   : > { %p3884_p0 = scmp.ne.s32.totalorder %s4465_s1, %s3883_s22  ;;  %p3892_p3 = scmp.lt.s32.totalorder %s3883_s22, %s3883_s22 }
  0x39   : > { %p3886_p2 = pnand %p3884_p0, %p4492_p9  ;;  %p3893_p8 = por %p3892_p3, %p3891_p5 }
  0x3b   : > { %p3887_p6 = pneg %p3886_p2 }
  0x3d   : > { %p3894_p10 = pnand %p3893_p8, %p3887_p6 }
  0x3f   : > { %3897 = shalt.err (!%p3894_p10)
}
  0x40   : > { %s5212_s23 = smov 512   ;;  %s4298_s18 = smov 32  }
  0x41   : > { %3728 = dma.hbm_to_vmem [thread:$0]  (!%p4476_p7), %s5247_s5, 16384, %s4465_s1, [#allocation4], %s5212_s23, %s5212_s23, %s4298_s18  }
  0x42   : > { %s5249_s8 = sld [smem:[#allocation41_spill]] }
  0x48   : > { %s3898_s22 = scalar_lea.hbm %s5249_s8, 16384 }
  0x49   : > { %p3899_p3 = scmp.ne.s32.totalorder %s5249_s8, %s3898_s22  ;;  %p3905_p12 = scmp.lt.u32.totalorder %s3898_s22, %s5249_s8 }
  0x4b   : > { %p3901_p5 = pnand %p3899_p3, %p4492_p9 }
  0x4d   : > { %p3902_p11 = pneg %p3901_p5 }
  0x4f   : > { %p3907_p13 = pnand %p3905_p12, %p3902_p11 }
  0x51   : > { %3910 = shalt.err (!%p3907_p13)
}
  0x52   : > { %s3911_s1 = scalar_lea.vmem %s4480_s27, 16384  ;;  %p3919_p8 = scmp.lt.s32.totalorder %s4480_s27, %s4480_s27 }
  0x53   : > { %p3912_p0 = scmp.ne.s32.totalorder %s4480_s27, %s3911_s1  ;;  %p3920_p10 = scmp.lt.s32.totalorder %s3911_s1, %s3911_s1 }
  0x55   : > { %p3914_p2 = pnand %p3912_p0, %p4492_p9  ;;  %p3921_p3 = por %p3920_p10, %p3919_p8 }
  0x57   : > { %p3915_p6 = pneg %p3914_p2 }
  0x59   : > { %p3922_p5 = pnand %p3921_p3, %p3915_p6 }
  0x5b   : > { %3925 = shalt.err (!%p3922_p5)
}
  0x5c   : > { %3731 = dma.hbm_to_vmem [thread:$0]  (!%p4476_p7), %s5249_s8, 16384, %s4480_s27, [#allocation7], %s5212_s23, %s5212_s23, %s4298_s18  }
  0x5d   : > { %s5250_s11 = sld [smem:[#allocation44_spill]] }
  0x63   : > { %s3926_s20 = scalar_lea.hbm %s5250_s11, 64 }
  0x64   : > { %p3927_p11 = scmp.ne.s32.totalorder %s5250_s11, %s3926_s20  ;;  %p3933_p0 = scmp.lt.u32.totalorder %s3926_s20, %s5250_s11 }
  0x66   : > { %p3929_p12 = pnand %p3927_p11, %p4492_p9 }
  0x68   : > { %p3930_p13 = pneg %p3929_p12 }
  0x6a   : > { %p3935_p2 = pnand %p3933_p0, %p3930_p13 }
  0x6c   : > { %3938 = shalt.err (!%p3935_p2)
}
  0x6d   : > { %s3939_s27 = scalar_lea.vmem %s4482_s29, 64  ;;  %p3947_p3 = scmp.lt.s32.totalorder %s4482_s29, %s4482_s29 }
  0x6e   : > { %p3940_p6 = scmp.ne.s32.totalorder %s4482_s29, %s3939_s27  ;;  %p3948_p5 = scmp.lt.s32.totalorder %s3939_s27, %s3939_s27 }
  0x70   : > { %p3942_p8 = pnand %p3940_p6, %p4492_p9  ;;  %p3949_p11 = por %p3948_p5, %p3947_p3 }
  0x72   : > { %p3943_p10 = pneg %p3942_p8 }
  0x74   : > { %p3950_p12 = pnand %p3949_p11, %p3943_p10 }
  0x76   : > { %3953 = shalt.err (!%p3950_p12)
}
  0x77   : > { %3737 = dma.hbm_to_vmem [thread:$0]  (!%p4476_p7), %s5250_s11, 64, %s4482_s29, [#allocation10]  }
  0x78   : > { %s4299_s15 = smov [#allocation8]   ;;  %s4300_s21 = smov [#allocation11]  }
  0x79   : > { %s630_s19 = sshll.u32 %s4299_s15, 4  ;;  %s654_s20 = sshll.u32 %s4300_s21, 4  ;;  %s631_s19 = int_to_ptr.vmem [resolvable:$true] %s630_s19  ;;  %s655_s20 = int_to_ptr.vmem [resolvable:$true] %s654_s20 }
  0x7a   : > { %s5251_s10 = sld [smem:[#allocation43_spill]] }
  0x80   : > { %s3954_s28 = scalar_lea.hbm %s5251_s10, 16384 }
  0x81   : > { %p3955_p13 = scmp.ne.s32.totalorder %s5251_s10, %s3954_s28  ;;  %p3961_p6 = scmp.lt.u32.totalorder %s3954_s28, %s5251_s10 }
  0x83   : > { %p3957_p0 = pnand %p3955_p13, %p4492_p9 }
  0x85   : > { %p3958_p2 = pneg %p3957_p0 }
  0x87   : > { %p3963_p8 = pnand %p3961_p6, %p3958_p2 }
  0x89   : > { %3966 = shalt.err (!%p3963_p8)
}
  0x8a   : > { %s3967_s29 = scalar_lea.vmem %s631_s19, 16384  ;;  %p3975_p11 = scmp.lt.s32.totalorder %s631_s19, %s631_s19 }
  0x8b   : > { %p3968_p10 = scmp.ne.s32.totalorder %s631_s19, %s3967_s29  ;;  %p3976_p12 = scmp.lt.s32.totalorder %s3967_s29, %s3967_s29 }
  0x8d   : > { %p3970_p3 = pnand %p3968_p10, %p4492_p9  ;;  %p3977_p1 = por %p3976_p12, %p3975_p11 }
  0x8f   : > { %p3971_p5 = pneg %p3970_p3 }
  0x91   : > { %p3978_p4 = pnand %p3977_p1, %p3971_p5 }
  0x93   : > { %3981 = shalt.err (!%p3978_p4)
}
  0x94   : > { %s5252_s14 = smov 512   ;;  %s5253_s12 = sld [smem:[#allocation45_spill]] }
  0x95   : > { %3734 = dma.hbm_to_vmem [thread:$0]  (!%p4476_p7), %s5251_s10, 16384, %s631_s19, [#allocation7], %s5252_s14, %s5252_s14, %s4298_s18  }
  0x9a   : > { %s3982_s0 = scalar_lea.hbm %s5253_s12, 16384 }
  0x9b   : > { %p3983_p1 = scmp.ne.s32.totalorder %s5253_s12, %s3982_s0  ;;  %p3989_p0 = scmp.lt.u32.totalorder %s3982_s0, %s5253_s12 }
  0x9d   : > { %p3985_p4 = pnand %p3983_p1, %p4492_p9 }
  0x9f   : > { %p3986_p13 = pneg %p3985_p4 }
  0xa1   : > { %p3991_p2 = pnand %p3989_p0, %p3986_p13 }
  0xa3   : > { %3994 = shalt.err (!%p3991_p2)
}
  0xa4   : > { %s3995_s29 = scalar_lea.vmem %s655_s20, 16384  ;;  %p4003_p3 = scmp.lt.s32.totalorder %s655_s20, %s655_s20 }
  0xa5   : > { %p3996_p6 = scmp.ne.s32.totalorder %s655_s20, %s3995_s29  ;;  %p4004_p5 = scmp.lt.s32.totalorder %s3995_s29, %s3995_s29 }
  0xa7   : > { %p3998_p8 = pnand %p3996_p6, %p4492_p9  ;;  %p4005_p11 = por %p4004_p5, %p4003_p3 }
  0xa9   : > { %p3999_p10 = pneg %p3998_p8 }
  0xab   : > { %p4006_p12 = pnand %p4005_p11, %p3999_p10 }
  0xad   : > { %4009 = shalt.err (!%p4006_p12)
}
  0xae   : > { %3740 = dma.hbm_to_vmem [thread:$0]  (!%p4476_p7), %s5253_s12, 16384, %s655_s20, [#allocation10], %s5252_s14, %s5252_s14, %s4298_s18  }
  0xaf   : > { %s4301_s15 = smov [#allocation12]   ;;  %s5254_s13 = sld [smem:[#allocation46_spill]] }
  0xb0   : > { %s668_s21 = sshll.u32 %s4301_s15, 4  ;;  %s669_s21 = int_to_ptr.vmem [resolvable:$true] %s668_s21 }
  0xb5   : > { %s4010_s28 = scalar_lea.hbm %s5254_s13, 64 }
  0xb6   : > { %p4011_p1 = scmp.ne.s32.totalorder %s5254_s13, %s4010_s28  ;;  %p4017_p0 = scmp.lt.u32.totalorder %s4010_s28, %s5254_s13 }
  0xb8   : > { %p4013_p4 = pnand %p4011_p1, %p4492_p9 }
  0xba   : > { %p4014_p13 = pneg %p4013_p4 }
  0xbc   : > { %p4019_p2 = pnand %p4017_p0, %p4014_p13 }
  0xbe   : > { %4022 = shalt.err (!%p4019_p2)
}
  0xbf   : > { %s4023_s18 = scalar_lea.vmem %s669_s21, 64  ;;  %p4031_p3 = scmp.lt.s32.totalorder %s669_s21, %s669_s21 }
  0xc0   : > { %p4024_p6 = scmp.ne.s32.totalorder %s669_s21, %s4023_s18  ;;  %p4032_p5 = scmp.lt.s32.totalorder %s4023_s18, %s4023_s18 }
  0xc2   : > { %p4026_p8 = pnand %p4024_p6, %p4492_p9  ;;  %p4033_p11 = por %p4032_p5, %p4031_p3 }
  0xc4   : > { %p4027_p10 = pneg %p4026_p8 }
  0xc6   : > { %p4034_p12 = pnand %p4033_p11, %p4027_p10 }
  0xc8   : > { %4037 = shalt.err (!%p4034_p12)
}
  0xc9   : > { %3743 = dma.hbm_to_vmem [thread:$0]  (!%p4476_p7), %s5254_s13, 64, %s669_s21, [#allocation13]  }
  0xca   : > { %s2916_s7 = sadd.s32 4294967294, %s4292_s25   ;;  %s4627_s6 = sadd.s32 1, %s4292_s25  }
  0xcb   : > { %s384_s19 = ssub.s32 %s4292_s25, %s4627_s6  ;;  %s387_s23 = sadd.s32 1, %s4288_s24 }
  0xcc   : > { %p385_p9 = scmp.eq.s32.totalorder %s384_s19, 0  ;;  %p394_p1 = scmp.ne.s32.totalorder %s4288_s24, %s4284_s30 }
  0xcd   : > { %p395_p4 = scmp.eq.s32.totalorder %s4292_s25, 0  ;;  %p400_p13 = scmp.ne.s32.totalorder %s4284_s30, %s4280_s4 }
  0xce   : > { %s4638_s15 = scalar_select %p385_p9, %s4288_s24, %s387_s23  }
  0xcf   : > { %p4640_p0 = por %p395_p4, %p394_p1  ;;  %p5256_p7 = scmp.eq.s32.totalorder %s4459_s26, 0 }
  0xd0   : > { %p5216_p6 = scmp.eq.s32.totalorder %s4459_s26, 1  ;;  %p456_p8 = scmp.eq.s32.totalorder %s2916_s7, 1 }
  0xd1   : > { %p4646_p2 = por %p5256_p7, %p400_p13  ;;  %p3758_p10 = scmp.lt.s32.totalorder %s4292_s25, 2 }
  0xd2   : > { %s685_s0 = sand.u32 1, %s4292_s25   ;;  %p4655_p3 = por %p5216_p6, %p394_p1 }
  0xd3   : > { %p4659_p5 = por %p456_p8, %p400_p13  ;;  %s687_s27 = sand.u32 1, %s4288_s24  }
  0xd4   : > { %s5258_s28 = scalar_select %p4655_p3, 1, 0 }
  0xd5   : > { %s5259_s22 = scalar_select %p4659_p5, 1, 0 }
  0xd6   : > { %s2925_s1 = sshll.u32 %s687_s27, 10  ;;  %s2959_s29 = sshll.u32 %s4292_s25, 10 }
  0xd7   : > { %s4668_s14 = scalar_lea.hbm %s5192_s16, %s2959_s29  ;;  %s689_s7 = scalar_lea.vmem [#allocation14], %s2925_s1 }
  0xd8   : > { %s696_s19 = sshll.u32 %s689_s7, 4  ;;  %p4672_p11 = pnand %p3758_p10, %p4640_p0  ;;  %s4676_s19 = int_to_ptr.vmem [resolvable:$true] %s696_s19 }
  0xd9   : > { %s4678_s27 = scalar_lea.sflag [#allocation4], %s685_s0  ;;  %s4038_s18 = scalar_lea.hbm %s4668_s14, 16384 }
  0xda   : > { %p4039_p12 = scmp.ne.s32.totalorder %s4668_s14, %s4038_s18  ;;  %p4040_p9 = pneg %p4672_p11 }
  0xdb   : > { %s4043_s29 = scalar_lea.hbm %s5192_s16, 32768  ;;  %p4044_p13 = scmp.lt.u32.totalorder %s4668_s14, %s5192_s16 }
  0xdc   : > { %p4041_p1 = pnand %p4040_p9, %p4039_p12  ;;  %p4045_p0 = scmp.lt.u32.totalorder %s4043_s29, %s4038_s18 }
  0xdd   : > { %p4047_p8 = scmp.lt.u32.totalorder %s4038_s18, %s4668_s14 }
  0xde   : > { %p4042_p4 = pneg %p4041_p1  ;;  %p4046_p7 = por %p4045_p0, %p4044_p13 }
  0xe0   : > { %p4048_p10 = por %p4047_p8, %p4046_p7 }
  0xe2   : > { %p4049_p6 = pnand %p4048_p10, %p4042_p4 }
  0xe4   : > { %4052 = shalt.err (!%p4049_p6)
}
  0xe5   : > { %s4053_s0 = scalar_lea.vmem %s4676_s19, 16384  ;;  %s4302_s1 = smov [#allocation14]  }
  0xe6   : > { %p4054_p12 = scmp.ne.s32.totalorder %s4676_s19, %s4053_s0  ;;  %s4058_s3 = sshll.u32 %s4302_s1, 4  ;;  %s4059_s3 = int_to_ptr.vmem [resolvable:$false] %s4058_s3 }
  0xe7   : > { %s4060_s20 = scalar_lea.vmem %s4059_s3, 32768  ;;  %p4061_p3 = scmp.lt.s32.totalorder %s4676_s19, %s4059_s3 }
  0xe8   : > { %p4056_p1 = pnand %p4054_p12, %p4040_p9  ;;  %p4062_p13 = scmp.lt.s32.totalorder %s4060_s20, %s4053_s0 }
  0xea   : > { %p4057_p5 = pneg %p4056_p1  ;;  %p4063_p0 = por %p4062_p13, %p4061_p3 }
  0xec   : > { %p4064_p7 = pnand %p4063_p0, %p4057_p5 }
  0xee   : > { %4067 = shalt.err (!%p4064_p7)
}
  0xef   : > { %s4303_s18 = smov 2048   ;;  %s4304_s29 = smov 1024  }
  0xf0   : > { %s4305_s7 = smov 64   ;;  %p5261_p6 = scmp.ne.s32.totalorder %s5245_s2, 0 }
  0xf1   : > { %3747 = dma.hbm_to_vmem [thread:$0]  (!%p4672_p11), %s4668_s14, 16384, %s4676_s19, %s4678_s27, %s4303_s18, %s4304_s29, %s4305_s7  }
  0xf2   : > { %716 = sbr.rel (%p5261_p6) target bundleno = 1670 (0x686), region = 92  ;;  %p5262_p9 = scmp.eq.s32.totalorder (!%p5261_p6), %s4459_s26, 0 }
  0xf9   : > { %4243 = dma.done.wait (%p5262_p9), [#allocation4], 16384   ;;  %p5263_p4 = pmov %p5262_p9 }
  0xfb   : > { %4245 = vsyncadd (%p5263_p4), [#allocation4], 4294950912  ;;  %p5264_p3 = pmov %p5263_p4 }
  0xfd   : > { %4247 = dma.done.wait (%p5264_p3), [#allocation7], 32768   ;;  %p5265_p5 = pmov %p5264_p3 }
  0xfe   : > { %p5266_p8 = pmov %p5264_p3 }
  0xff   : > { %4249 = vsyncadd (%p5265_p5), [#allocation7], 4294934528 }
 0x100   : > { %4251 = dma.done.wait (%p5266_p8), [#allocation10], 16448   ;;  %p5267_p11 = pmov %p5264_p3 }
 0x101   : > { %p5268_p10 = pmov %p5264_p3 }
 0x102   : > { %4253 = vsyncadd (%p5267_p11), [#allocation10], 4294950848 }
 0x103   : > { %4255 = dma.done.wait (%p5268_p10), [#allocation13], 64   ;;  %p5269_p12 = pmov %p5264_p3 }
 0x104   : > { %s742_s2 = sand.u32 1, %s4459_s26   ;;  %s4726_s14 = sand.u32 1, %s4284_s30  }
 0x105   : > { %4257 = vsyncadd (%p5269_p12), [#allocation13], 4294967232  ;;  %s2935_s19 = sshll.u32 %s4726_s14, 10  ;;  %s743_s23 = scalar_lea.sflag [#allocation4], %s742_s2 }
 0x106   : > { %s4729_s27 = scalar_lea.vmem [#allocation14], %s2935_s19 }
 0x107   : > { %4259 = dma.done.wait (%p4646_p2), %s743_s23, 16384  }
 0x108   : > { %4261 = vsyncadd (%p4646_p2), %s743_s23, 4294950912  ;;  %s2936_s0 = sshll.u32 %s4726_s14, 6  ;;  %s2937_s1 = sshll.u32 %s4459_s26, 3 }
 0x109   : > { %p815_p1 = scmp.lt.s32.totalorder %s2937_s1, 15  ;;  %s4743_s29 = scalar_lea.vmem [#allocation15], %s2936_s0 }
 0x10a   : > { %p5270_p13 = scmp.ne.s32.totalorder %s4459_s26, 0 }
 0x10b   : > { %s5318_s1 = smov (!%p815_p1, %s2937_s1), 15  ;;  %v828_v0 = vld [vmem:[#allocation3 + $0x8] sm:$0xff] (!%p5270_p13)  ;;  %v827_v2 = vld [vmem:[#allocation3] sm:$0xff] (!%p5270_p13)  ;;  %v830_v11 = vld [vmem:[#allocation3 + $0x18] sm:$0xff] (!%p5270_p13)  ;;  %s5271_s2 = sld [smem:[#allocation35_spill]] (!%p5270_p13)  ;;  %vm4307_vm0 = vmmov (!%p5270_p13), 0  }
 0x10c   : > { %823 = sbr.rel (%p5270_p13) target bundleno = 1361 (0x551), region = 124  ;;  %v832_v1 = vld [vmem:[#allocation3 + $0x28] sm:$0xff] (!%p5270_p13)  ;;  %v831_v4 = vld [vmem:[#allocation3 + $0x20] sm:$0xff] (!%p5270_p13)  ;;  %v834_v12 = vld [vmem:[#allocation3 + $0x38] sm:$0xff] (!%p5270_p13)  ;;  %s5272_s0 = sld [smem:[#allocation33_spill]] (!%p5270_p13) }
 0x10d   : > { %v3013_v3 = vpack.c.bf16 (!%p5270_p13), %v832_v1, %v828_v0  ;;  %v836_v5 = vld [vmem:[#allocation3 + $0x48] sm:$0xff] (!%p5270_p13)  ;;  %v3015_v7 = vpack.c.bf16 (!%p5270_p13), %v831_v4, %v827_v2  ;;  %v835_v9 = vld [vmem:[#allocation3 + $0x40] sm:$0xff] (!%p5270_p13)  ;;  %v829_v13 = vld [vmem:[#allocation3 + $0x10] sm:$0xff] (!%p5270_p13)  ;;  %v3077_v16 = vpack.c.bf16 (!%p5270_p13), %v834_v12, %v830_v11  ;;  %s5273_s19 = sld [smem:[#allocation40_spill]] (!%p5270_p13)  ;;  %s5274_s3 = sld [smem:[#allocation36_spill]] (!%p5270_p13) }
 0x10e   : > { %v840_v6 = vld [vmem:[#allocation3 + $0x68] sm:$0xff] (!%p5270_p13)  ;;  %v839_v10 = vld [vmem:[#allocation3 + $0x60] sm:$0xff] (!%p5270_p13)  ;;  %v833_v14 = vld [vmem:[#allocation3 + $0x30] sm:$0xff] (!%p5270_p13)  ;;  %s5275_s7 = sld [smem:[#allocation37_spill]] (!%p5270_p13)  ;;  %s5277_s9 = sld [smem:[#allocation42_spill]] (!%p5270_p13) }
 0x10f   : > { %v3017_v8 = vpack.c.bf16 (!%p5270_p13), %v840_v6, %v836_v5  ;;  %3014 = vmatprep.subr.bf16.mxu0 (!%p5270_p13), %v3013_v3  ;;  %v3019_v15 = vpack.c.bf16 (!%p5270_p13), %v839_v10, %v835_v9  ;;  %v3079_v17 = vpack.c.bf16 (!%p5270_p13), %v833_v14, %v829_v13  ;;  %v844_v18 = vld [vmem:[#allocation3 + $0x88] sm:$0xff] (!%p5270_p13)  ;;  %v843_v20 = vld [vmem:[#allocation3 + $0x80] sm:$0xff] (!%p5270_p13)  ;;  %v838_v23 = vld [vmem:[#allocation3 + $0x58] sm:$0xff] (!%p5270_p13)  ;;  %3078 = vmatprep.subr.bf16.mxu1 (!%p5270_p13), %v3077_v16  ;;  %s5278_s23 = sld [smem:[#allocation38_spill]] (!%p5270_p13)  ;;  %s5279_s18 = sld [smem:[#allocation47_spill]] (!%p5270_p13) }
 0x110   : > { %3016 = vmatpush1.bf16.msra.mxu0 (!%p5270_p13), %v3015_v7  ;;  %v848_v19 = vld [vmem:[#allocation3 + $0xa8] sm:$0xff] (!%p5270_p13)  ;;  %v847_v22 = vld [vmem:[#allocation3 + $0xa0] sm:$0xff] (!%p5270_p13)  ;;  %v842_v24 = vld [vmem:[#allocation3 + $0x78] sm:$0xff] (!%p5270_p13) }
 0x111   : > { %3018 = vmatprep.subr.bf16.mxu0 (!%p5270_p13), %v3017_v8  ;;  %v3021_v21 = vpack.c.bf16 (!%p5270_p13), %v848_v19, %v844_v18  ;;  %v3081_v25 = vpack.c.bf16 (!%p5270_p13), %v842_v24, %v838_v23  ;;  %v837_v26 = vld [vmem:[#allocation3 + $0x50] sm:$0xff] (!%p5270_p13)  ;;  %v852_v28 = vld [vmem:[#allocation3 + $0xc8] sm:$0xff] (!%p5270_p13)  ;;  %3080 = vmatpush1.bf16.msra.mxu1 (!%p5270_p13), %v3079_v17  ;;  %v3023_v31 = vpack.c.bf16 (!%p5270_p13), %v847_v22, %v843_v20  ;;  %v846_v32 = vld [vmem:[#allocation3 + $0x98] sm:$0xff] (!%p5270_p13) }
 0x112   : > { %v841_v27 = vld [vmem:[#allocation3 + $0x70] sm:$0xff] (!%p5270_p13)  ;;  %v856_v30 = vld [vmem:[#allocation3 + $0xe8] sm:$0xff] (!%p5270_p13)  ;;  %v850_v33 = vld [vmem:[#allocation3 + $0xb8] sm:$0xff] (!%p5270_p13) }
 0x113   : > { %v3083_v29 = vpack.c.bf16 %v841_v27, %v837_v26  ;;  %3082 = vmatprep.subr.bf16.mxu1 %v3081_v25  ;;  %v845_v34 = vld [vmem:[#allocation3 + $0x90] sm:$0xff]  ;;  %v3025_v35 = vpack.c.bf16 %v856_v30, %v852_v28  ;;  %v851_v36 = vld [vmem:[#allocation3 + $0xc0] sm:$0xff]  ;;  %v3085_v38 = vpack.c.bf16 %v850_v33, %v846_v32  ;;  %v860_v40 = vld [vmem:[#allocation3 + $0x108] sm:$0xff] }
 0x114   : > { %3020 = vmatpush1.bf16.msra.mxu0 %v3019_v15  ;;  %v855_v37 = vld [vmem:[#allocation3 + $0xe0] sm:$0xff]  ;;  %v849_v39 = vld [vmem:[#allocation3 + $0xb0] sm:$0xff]  ;;  %v864_v41 = vld [vmem:[#allocation3 + $0x128] sm:$0xff] }
 0x115   : > { %3022 = vmatprep.subr.bf16.mxu0 %v3021_v21  ;;  %v854_v42 = vld [vmem:[#allocation3 + $0xd8] sm:$0xff]  ;;  %3084 = vmatpush1.bf16.msra.mxu1 %v3083_v29  ;;  %v3087_v43 = vpack.c.bf16 %v849_v39, %v845_v34  ;;  %v3027_v45 = vpack.c.bf16 %v855_v37, %v851_v36  ;;  %v859_v46 = vld [vmem:[#allocation3 + $0x100] sm:$0xff]  ;;  %v853_v48 = vld [vmem:[#allocation3 + $0xd0] sm:$0xff]  ;;  %v3029_v50 = vpack.c.bf16 %v864_v41, %v860_v40 }
 0x116   : > { %v858_v44 = vld [vmem:[#allocation3 + $0xf8] sm:$0xff]  ;;  %3086 = vmatprep.subr.bf16.mxu1 %v3085_v38  ;;  %v857_v49 = vld [vmem:[#allocation3 + $0xf0] sm:$0xff]  ;;  %v863_v51 = vld [vmem:[#allocation3 + $0x120] sm:$0xff] }
 0x117   : > { %v3089_v47 = vpack.c.bf16 %v858_v44, %v854_v42  ;;  %v862_v52 = vld [vmem:[#allocation3 + $0x118] sm:$0xff]  ;;  %v868_v54 = vld [vmem:[#allocation3 + $0x148] sm:$0xff]  ;;  %v3091_v56 = vpack.c.bf16 %v857_v49, %v853_v48  ;;  %v3031_v57 = vpack.c.bf16 %v863_v51, %v859_v46  ;;  %v867_v58 = vld [vmem:[#allocation3 + $0x140] sm:$0xff] }
 0x118   : > { %3024 = vmatpush1.bf16.msra.mxu0 %v3023_v31  ;;  %v866_v53 = vld [vmem:[#allocation3 + $0x138] sm:$0xff]  ;;  %v872_v55 = vld [vmem:[#allocation3 + $0x168] sm:$0xff]  ;;  %v861_v60 = vld [vmem:[#allocation3 + $0x110] sm:$0xff] }
 0x119   : > { %3026 = vmatprep.subr.bf16.mxu0 %v3025_v35  ;;  %3088 = vmatpush1.bf16.msra.mxu1 %v3087_v43  ;;  %v3093_v59 = vpack.c.bf16 %v866_v53, %v862_v52  ;;  %v865_v61 = vld [vmem:[#allocation3 + $0x130] sm:$0xff]  ;;  %v3033_v62 = vpack.c.bf16 %v872_v55, %v868_v54  ;;  %v871_v63 = vld [vmem:[#allocation3 + $0x160] sm:$0xff]  ;;  %v870_v0 = vld [vmem:[#allocation3 + $0x158] sm:$0xff] }
 0x11a   : > { %3090 = vmatprep.subr.bf16.mxu1 %v3089_v47  ;;  %v874_v1 = vld [vmem:[#allocation3 + $0x178] sm:$0xff]  ;;  %v876_v2 = vld [vmem:[#allocation3 + $0x188] sm:$0xff]  ;;  %v3095_v4 = vpack.c.bf16 %v865_v61, %v861_v60  ;;  %v3035_v5 = vpack.c.bf16 %v871_v63, %v867_v58  ;;  %v875_v6 = vld [vmem:[#allocation3 + $0x180] sm:$0xff] }
 0x11b   : > { %v880_v3 = vld [vmem:[#allocation3 + $0x1a8] sm:$0xff]  ;;  %v3097_v7 = vpack.c.bf16 %v874_v1, %v870_v0  ;;  %v869_v8 = vld [vmem:[#allocation3 + $0x150] sm:$0xff]  ;;  %v879_v11 = vld [vmem:[#allocation3 + $0x1a0] sm:$0xff] }
 0x11c   : > { %3028 = vmatpush1.bf16.msra.mxu0 %v3027_v45  ;;  %v873_v9 = vld [vmem:[#allocation3 + $0x170] sm:$0xff]  ;;  %v3037_v10 = vpack.c.bf16 %v880_v3, %v876_v2  ;;  %v878_v12 = vld [vmem:[#allocation3 + $0x198] sm:$0xff]  ;;  %v884_v14 = vld [vmem:[#allocation3 + $0x1c8] sm:$0xff]  ;;  %v3039_v17 = vpack.c.bf16 %v879_v11, %v875_v6 }
 0x11d   : > { %3030 = vmatprep.subr.bf16.mxu0 %v3029_v50  ;;  %3092 = vmatpush1.bf16.msra.mxu1 %v3091_v56  ;;  %v882_v13 = vld [vmem:[#allocation3 + $0x1b8] sm:$0xff]  ;;  %v888_v15 = vld [vmem:[#allocation3 + $0x1e8] sm:$0xff]  ;;  %v3099_v16 = vpack.c.bf16 %v873_v9, %v869_v8  ;;  %v883_v18 = vld [vmem:[#allocation3 + $0x1c0] sm:$0xff] }
 0x11e   : > { %3094 = vmatprep.subr.bf16.mxu1 %v3093_v59  ;;  %v3101_v19 = vpack.c.bf16 %v882_v13, %v878_v12  ;;  %v877_v20 = vld [vmem:[#allocation3 + $0x190] sm:$0xff]  ;;  %v3041_v22 = vpack.c.bf16 %v888_v15, %v884_v14  ;;  %v887_v23 = vld [vmem:[#allocation3 + $0x1e0] sm:$0xff]  ;;  %v886_v24 = vld [vmem:[#allocation3 + $0x1d8] sm:$0xff] }
 0x11f   : > { %v881_v21 = vld [vmem:[#allocation3 + $0x1b0] sm:$0xff]  ;;  %v890_v25 = vld [vmem:[#allocation3 + $0x1f8] sm:$0xff]  ;;  %v892_v26 = vld [vmem:[#allocation3 + $0x208] sm:$0xff]  ;;  %v3043_v29 = vpack.c.bf16 %v887_v23, %v883_v18 }
 0x120   : > { %3032 = vmatpush1.bf16.msra.mxu0 %v3031_v57  ;;  %v896_v27 = vld [vmem:[#allocation3 + $0x228] sm:$0xff]  ;;  %v3103_v28 = vpack.c.bf16 %v881_v21, %v877_v20  ;;  %v891_v30 = vld [vmem:[#allocation3 + $0x200] sm:$0xff]  ;;  %v3105_v31 = vpack.c.bf16 %v890_v25, %v886_v24  ;;  %v885_v32 = vld [vmem:[#allocation3 + $0x1d0] sm:$0xff] }
 0x121   : > { %3034 = vmatprep.subr.bf16.mxu0 %v3033_v62  ;;  %3096 = vmatpush1.bf16.msra.mxu1 %v3095_v4  ;;  %v889_v33 = vld [vmem:[#allocation3 + $0x1f0] sm:$0xff]  ;;  %v3045_v34 = vpack.c.bf16 %v896_v27, %v892_v26  ;;  %v895_v35 = vld [vmem:[#allocation3 + $0x220] sm:$0xff]  ;;  %v894_v36 = vld [vmem:[#allocation3 + $0x218] sm:$0xff] }
 0x122   : > { %3098 = vmatprep.subr.bf16.mxu1 %v3097_v7  ;;  %v898_v37 = vld [vmem:[#allocation3 + $0x238] sm:$0xff]  ;;  %v900_v38 = vld [vmem:[#allocation3 + $0x248] sm:$0xff]  ;;  %v3107_v40 = vpack.c.bf16 %v889_v33, %v885_v32  ;;  %v3047_v41 = vpack.c.bf16 %v895_v35, %v891_v30  ;;  %v899_v42 = vld [vmem:[#allocation3 + $0x240] sm:$0xff] }
 0x123   : > { %v904_v39 = vld [vmem:[#allocation3 + $0x268] sm:$0xff]  ;;  %v3109_v43 = vpack.c.bf16 %v898_v37, %v894_v36  ;;  %v893_v44 = vld [vmem:[#allocation3 + $0x210] sm:$0xff]  ;;  %v903_v47 = vld [vmem:[#allocation3 + $0x260] sm:$0xff] }
 0x124   : > { %3036 = vmatpush1.bf16.msra.mxu0 %v3035_v5  ;;  %v897_v45 = vld [vmem:[#allocation3 + $0x230] sm:$0xff]  ;;  %v3049_v46 = vpack.c.bf16 %v904_v39, %v900_v38  ;;  %v902_v48 = vld [vmem:[#allocation3 + $0x258] sm:$0xff]  ;;  %v908_v50 = vld [vmem:[#allocation3 + $0x288] sm:$0xff]  ;;  %v3051_v53 = vpack.c.bf16 %v903_v47, %v899_v42 }
 0x125   : > { %3038 = vmatprep.subr.bf16.mxu0 %v3037_v10  ;;  %3100 = vmatpush1.bf16.msra.mxu1 %v3099_v16  ;;  %v906_v49 = vld [vmem:[#allocation3 + $0x278] sm:$0xff]  ;;  %v912_v51 = vld [vmem:[#allocation3 + $0x2a8] sm:$0xff]  ;;  %v3111_v52 = vpack.c.bf16 %v897_v45, %v893_v44  ;;  %v907_v54 = vld [vmem:[#allocation3 + $0x280] sm:$0xff] }
 0x126   : > { %3102 = vmatprep.subr.bf16.mxu1 %v3101_v19  ;;  %v3113_v55 = vpack.c.bf16 %v906_v49, %v902_v48  ;;  %v901_v56 = vld [vmem:[#allocation3 + $0x250] sm:$0xff]  ;;  %v3053_v58 = vpack.c.bf16 %v912_v51, %v908_v50  ;;  %v911_v59 = vld [vmem:[#allocation3 + $0x2a0] sm:$0xff]  ;;  %v910_v60 = vld [vmem:[#allocation3 + $0x298] sm:$0xff] }
 0x127   : > { %v905_v57 = vld [vmem:[#allocation3 + $0x270] sm:$0xff]  ;;  %v914_v61 = vld [vmem:[#allocation3 + $0x2b8] sm:$0xff]  ;;  %v916_v62 = vld [vmem:[#allocation3 + $0x2c8] sm:$0xff]  ;;  %v3055_v2 = vpack.c.bf16 %v911_v59, %v907_v54 }
 0x128   : > { %3040 = vmatpush1.bf16.msra.mxu0 %v3039_v17  ;;  %v920_v63 = vld [vmem:[#allocation3 + $0x2e8] sm:$0xff]  ;;  %v3115_v0 = vpack.c.bf16 %v905_v57, %v901_v56  ;;  %v915_v1 = vld [vmem:[#allocation3 + $0x2c0] sm:$0xff]  ;;  %v3117_v3 = vpack.c.bf16 %v914_v61, %v910_v60  ;;  %v909_v4 = vld [vmem:[#allocation3 + $0x290] sm:$0xff] }
 0x129   : > { %3042 = vmatprep.subr.bf16.mxu0 %v3041_v22  ;;  %3104 = vmatpush1.bf16.msra.mxu1 %v3103_v28  ;;  %v913_v5 = vld [vmem:[#allocation3 + $0x2b0] sm:$0xff]  ;;  %v825_v6 = vld [vmem:[%s5271_s2] sm:$0xff]  ;;  %v3057_v7 = vpack.c.bf16 %v920_v63, %v916_v62  ;;  %v919_v8 = vld [vmem:[#allocation3 + $0x2e0] sm:$0xff] }
 0x12a   : > { %3106 = vmatprep.subr.bf16.mxu1 %v3105_v31  ;;  %v918_v9 = vld [vmem:[#allocation3 + $0x2d8] sm:$0xff]  ;;  %1041 = vmatprep.mubr.f32.mxu0 %v825_v6  ;;  %v924_v11 = vld [vmem:[#allocation3 + $0x308] sm:$0xff]  ;;  %v3119_v13 = vpack.c.bf16 %v913_v5, %v909_v4  ;;  %v3059_v14 = vpack.c.bf16 %v919_v8, %v915_v1  ;;  %v923_v15 = vld [vmem:[#allocation3 + $0x300] sm:$0xff] }
 0x12b   : > { %v922_v10 = vld [vmem:[#allocation3 + $0x2f8] sm:$0xff]  ;;  %v928_v12 = vld [vmem:[#allocation3 + $0x328] sm:$0xff]  ;;  %1112 = vmatprep.mubr.f32.mxu1 %v825_v6  ;;  %v917_v17 = vld [vmem:[#allocation3 + $0x2d0] sm:$0xff] }
 0x12c   : > { %3044 = vmatpush1.bf16.msra.mxu0 %v3043_v29  ;;  %v3121_v16 = vpack.c.bf16 %v922_v10, %v918_v9  ;;  %v921_v18 = vld [vmem:[#allocation3 + $0x2f0] sm:$0xff]  ;;  %v3061_v19 = vpack.c.bf16 %v928_v12, %v924_v11  ;;  %v927_v20 = vld [vmem:[#allocation3 + $0x320] sm:$0xff]  ;;  %v926_v21 = vld [vmem:[#allocation3 + $0x318] sm:$0xff] }
 0x12d   : > { %3046 = vmatprep.subr.bf16.mxu0 %v3045_v34  ;;  %3108 = vmatpush1.bf16.msra.mxu1 %v3107_v40  ;;  %v930_v22 = vld [vmem:[#allocation3 + $0x338] sm:$0xff]  ;;  %v932_v23 = vld [vmem:[#allocation3 + $0x348] sm:$0xff]  ;;  %v3123_v25 = vpack.c.bf16 %v921_v18, %v917_v17  ;;  %v3063_v26 = vpack.c.bf16 %v927_v20, %v923_v15  ;;  %v931_v27 = vld [vmem:[#allocation3 + $0x340] sm:$0xff] }
 0x12e   : > { %3110 = vmatprep.subr.bf16.mxu1 %v3109_v43  ;;  %v936_v24 = vld [vmem:[#allocation3 + $0x368] sm:$0xff]  ;;  %v3125_v28 = vpack.c.bf16 %v930_v22, %v926_v21  ;;  %v925_v29 = vld [vmem:[#allocation3 + $0x310] sm:$0xff]  ;;  %v935_v32 = vld [vmem:[#allocation3 + $0x360] sm:$0xff] }
 0x12f   : > { %v929_v30 = vld [vmem:[#allocation3 + $0x330] sm:$0xff]  ;;  %v3065_v31 = vpack.c.bf16 %v936_v24, %v932_v23  ;;  %v934_v33 = vld [vmem:[#allocation3 + $0x358] sm:$0xff]  ;;  %v940_v35 = vld [vmem:[#allocation3 + $0x388] sm:$0xff]  ;;  %v3067_v38 = vpack.c.bf16 %v935_v32, %v931_v27 }
 0x130   : > { %3048 = vmatpush1.bf16.msra.mxu0 %v3047_v41  ;;  %v938_v34 = vld [vmem:[#allocation3 + $0x378] sm:$0xff]  ;;  %v944_v36 = vld [vmem:[#allocation3 + $0x3a8] sm:$0xff]  ;;  %v3127_v37 = vpack.c.bf16 %v929_v30, %v925_v29  ;;  %v939_v39 = vld [vmem:[#allocation3 + $0x380] sm:$0xff] }
 0x131   : > { %3050 = vmatprep.subr.bf16.mxu0 %v3049_v46  ;;  %3112 = vmatpush1.bf16.msra.mxu1 %v3111_v52  ;;  %v3129_v40 = vpack.c.bf16 %v938_v34, %v934_v33  ;;  %v933_v41 = vld [vmem:[#allocation3 + $0x350] sm:$0xff]  ;;  %v3069_v43 = vpack.c.bf16 %v944_v36, %v940_v35  ;;  %v943_v44 = vld [vmem:[#allocation3 + $0x3a0] sm:$0xff]  ;;  %v942_v45 = vld [vmem:[#allocation3 + $0x398] sm:$0xff] }
 0x132   : > { %3114 = vmatprep.subr.bf16.mxu1 %v3113_v55  ;;  %v937_v42 = vld [vmem:[#allocation3 + $0x370] sm:$0xff]  ;;  %v946_v46 = vld [vmem:[#allocation3 + $0x3b8] sm:$0xff]  ;;  %v948_v47 = vld [vmem:[#allocation3 + $0x3c8] sm:$0xff]  ;;  %v3071_v50 = vpack.c.bf16 %v943_v44, %v939_v39 }
 0x133   : > { %v952_v48 = vld [vmem:[#allocation3 + $0x3e8] sm:$0xff]  ;;  %v3131_v49 = vpack.c.bf16 %v937_v42, %v933_v41  ;;  %v947_v51 = vld [vmem:[#allocation3 + $0x3c0] sm:$0xff]  ;;  %v3133_v52 = vpack.c.bf16 %v946_v46, %v942_v45  ;;  %v945_v54 = vld [vmem:[#allocation3 + $0x3b0] sm:$0xff] }
 0x134   : > { %3052 = vmatpush1.bf16.msra.mxu0 %v3051_v53  ;;  %v941_v53 = vld [vmem:[#allocation3 + $0x390] sm:$0xff]  ;;  %v3073_v55 = vpack.c.bf16 %v952_v48, %v948_v47  ;;  %v951_v56 = vld [vmem:[#allocation3 + $0x3e0] sm:$0xff]  ;;  %v950_v57 = vld [vmem:[#allocation3 + $0x3d8] sm:$0xff] }
 0x135   : > { %3054 = vmatprep.subr.bf16.mxu0 %v3053_v58  ;;  %3116 = vmatpush1.bf16.msra.mxu1 %v3115_v0  ;;  %v954_v58 = vld [vmem:[#allocation3 + $0x3f8] sm:$0xff]  ;;  %v1144_v59 = vld [vmem:[#allocation6 + $0x8] sm:$0xff]  ;;  %v3135_v61 = vpack.c.bf16 %v945_v54, %v941_v53  ;;  %v3075_v62 = vpack.c.bf16 %v951_v56, %v947_v51  ;;  %v949_v0 = vld [vmem:[#allocation3 + $0x3d0] sm:$0xff] }
 0x136   : > { %3118 = vmatprep.subr.bf16.mxu1 %v3117_v3  ;;  %v1148_v60 = vld [vmem:[#allocation6 + $0x28] sm:$0xff]  ;;  %v3137_v63 = vpack.c.bf16 %v954_v58, %v950_v57  ;;  %v953_v1 = vld [vmem:[#allocation3 + $0x3f0] sm:$0xff]  ;;  %v1147_v4 = vld [vmem:[#allocation6 + $0x20] sm:$0xff] }
 0x137   : > { %v3141_v3 = vpack.c.bf16 %v1148_v60, %v1144_v59  ;;  %v1146_v5 = vld [vmem:[#allocation6 + $0x18] sm:$0xff]  ;;  %v1156_v8 = vld [vmem:[#allocation6 + $0x68] sm:$0xff]  ;;  %v3139_v10 = vpack.c.bf16 %v953_v1, %v949_v0  ;;  %v1151_v15 = vld [vmem:[#allocation6 + $0x40] sm:$0xff] }
 0x138   : > { %3056 = vmatpush1.bf16.msra.mxu0 %v3055_v2  ;;  %v1143_v2 = vld [vmem:[#allocation6] sm:$0xff]  ;;  %v1150_v6 = vld [vmem:[#allocation6 + $0x38] sm:$0xff]  ;;  %v1160_v20 = vld [vmem:[#allocation6 + $0x88] sm:$0xff] }
 0x139   : > { %3058 = vmatprep.subr.bf16.mxu0 %v3057_v7  ;;  %3120 = vmatpush1.bf16.msra.mxu1 %v3119_v13  ;;  %v1152_v7 = vld [vmem:[#allocation6 + $0x48] sm:$0xff]  ;;  %v824_v9 = vld [vmem:[%s5272_s0] sm:$0xff]  ;;  %v3143_v11 = vpack.c.bf16 %v1147_v4, %v1143_v2  ;;  %v3205_v12 = vpack.c.bf16 %v1150_v6, %v1146_v5  ;;  %v1145_v13 = vld [vmem:[#allocation6 + $0x10] sm:$0xff]  ;;  %s5276_s0 = sld [smem:[#allocation34_spill]] }
 0x13a   : > { %3122 = vmatprep.subr.bf16.mxu1 %v3121_v16  ;;  %v3145_v16 = vpack.c.bf16 %v1156_v8, %v1152_v7  ;;  %v1155_v17 = vld [vmem:[#allocation6 + $0x60] sm:$0xff]  ;;  %v1154_v18 = vld [vmem:[#allocation6 + $0x58] sm:$0xff]  ;;  %v1164_v21 = vld [vmem:[#allocation6 + $0xa8] sm:$0xff] }
 0x13b   : > { %v3147_v23 = vpack.c.bf16 %v1155_v17, %v1151_v15  ;;  %v1159_v27 = vld [vmem:[#allocation6 + $0x80] sm:$0xff]  ;;  %v1162_v30 = vld [vmem:[#allocation6 + $0x98] sm:$0xff]  ;;  %v1168_v32 = vld [vmem:[#allocation6 + $0xc8] sm:$0xff] }
 0x13c   : > { %3060 = vmatpush1.bf16.msra.mxu0 %v3059_v14  ;;  %v1149_v14 = vld [vmem:[#allocation6 + $0x30] sm:$0xff]  ;;  %v1163_v29 = vld [vmem:[#allocation6 + $0xa0] sm:$0xff]  ;;  %v1172_v33 = vld [vmem:[#allocation6 + $0xe8] sm:$0xff] }
 0x13d   : > { %3062 = vmatprep.subr.bf16.mxu0 %v3061_v19  ;;  %3124 = vmatpush1.bf16.msra.mxu1 %v3123_v25  ;;  %v1158_v19 = vld [vmem:[#allocation6 + $0x78] sm:$0xff]  ;;  %v3207_v22 = vpack.c.bf16 %v1149_v14, %v1145_v13  ;;  %v1153_v25 = vld [vmem:[#allocation6 + $0x50] sm:$0xff]  ;;  %v3151_v35 = vpack.c.bf16 %v1163_v29, %v1159_v27  ;;  %v1167_v39 = vld [vmem:[#allocation6 + $0xc0] sm:$0xff] }
 0x13e   : > { %3126 = vmatprep.subr.bf16.mxu1 %v3125_v28  ;;  %v3209_v24 = vpack.c.bf16 %v1158_v19, %v1154_v18  ;;  %v3149_v28 = vpack.c.bf16 %v1164_v21, %v1160_v20  ;;  %v1171_v41 = vld [vmem:[#allocation6 + $0xe0] sm:$0xff]  ;;  %v1170_v42 = vld [vmem:[#allocation6 + $0xd8] sm:$0xff]  ;;  %v1176_v44 = vld [vmem:[#allocation6 + $0x108] sm:$0xff] }
 0x13f   : > { %v1180_v45 = vld [vmem:[#allocation6 + $0x128] sm:$0xff]  ;;  %v3155_v47 = vpack.c.bf16 %v1171_v41, %v1167_v39  ;;  %v1175_v51 = vld [vmem:[#allocation6 + $0x100] sm:$0xff]  ;;  %v1178_v54 = vld [vmem:[#allocation6 + $0x118] sm:$0xff] }
 0x140   : > { %3064 = vmatpush1.bf16.msra.mxu0 %v3063_v26  ;;  %v1157_v26 = vld [vmem:[#allocation6 + $0x70] sm:$0xff]  ;;  %v1179_v53 = vld [vmem:[#allocation6 + $0x120] sm:$0xff]  ;;  %v1184_v56 = vld [vmem:[#allocation6 + $0x148] sm:$0xff] }
 0x141   : > { %3066 = vmatprep.subr.bf16.mxu0 %v3065_v31  ;;  %3128 = vmatpush1.bf16.msra.mxu1 %v3127_v37  ;;  %v1166_v31 = vld [vmem:[#allocation6 + $0xb8] sm:$0xff]  ;;  %v3211_v34 = vpack.c.bf16 %v1157_v26, %v1153_v25  ;;  %v1161_v37 = vld [vmem:[#allocation6 + $0x90] sm:$0xff]  ;;  %v1188_v57 = vld [vmem:[#allocation6 + $0x168] sm:$0xff]  ;;  %v3159_v59 = vpack.c.bf16 %v1179_v53, %v1175_v51 }
 0x142   : > { %3130 = vmatprep.subr.bf16.mxu1 %v3129_v40  ;;  %v3213_v36 = vpack.c.bf16 %v1166_v31, %v1162_v30  ;;  %v3153_v40 = vpack.c.bf16 %v1172_v33, %v1168_v32  ;;  %v3161_v0 = vpack.c.bf16 %v1188_v57, %v1184_v56  ;;  %v1187_v1 = vld [vmem:[#allocation6 + $0x160] sm:$0xff]  ;;  %v1186_v2 = vld [vmem:[#allocation6 + $0x158] sm:$0xff]  ;;  %v1192_v4 = vld [vmem:[#allocation6 + $0x188] sm:$0xff] }
 0x143   : > { %v1196_v5 = vld [vmem:[#allocation6 + $0x1a8] sm:$0xff]  ;;  %v1195_v13 = vld [vmem:[#allocation6 + $0x1a0] sm:$0xff]  ;;  %v1194_v14 = vld [vmem:[#allocation6 + $0x198] sm:$0xff] }
 0x144   : > { %3068 = vmatpush1.bf16.msra.mxu0 %v3067_v38  ;;  %v1165_v38 = vld [vmem:[#allocation6 + $0xb0] sm:$0xff]  ;;  %v1198_v15 = vld [vmem:[#allocation6 + $0x1b8] sm:$0xff]  ;;  %v1199_v25 = vld [vmem:[#allocation6 + $0x1c0] sm:$0xff] }
 0x145   : > { %3070 = vmatprep.subr.bf16.mxu0 %v3069_v43  ;;  %3132 = vmatpush1.bf16.msra.mxu1 %v3131_v49  ;;  %v1174_v43 = vld [vmem:[#allocation6 + $0xf8] sm:$0xff]  ;;  %v3215_v46 = vpack.c.bf16 %v1165_v38, %v1161_v37  ;;  %v1169_v49 = vld [vmem:[#allocation6 + $0xd0] sm:$0xff]  ;;  %v3229_v18 = vpack.c.bf16 %v1198_v15, %v1194_v14  ;;  %v1203_v26 = vld [vmem:[#allocation6 + $0x1e0] sm:$0xff] }
 0x146   : > { %3134 = vmatprep.subr.bf16.mxu1 %v3133_v52  ;;  %v3217_v48 = vpack.c.bf16 %v1174_v43, %v1170_v42  ;;  %v3157_v52 = vpack.c.bf16 %v1180_v45, %v1176_v44  ;;  %v1193_v19 = vld [vmem:[#allocation6 + $0x190] sm:$0xff]  ;;  %v1202_v27 = vld [vmem:[#allocation6 + $0x1d8] sm:$0xff]  ;;  %v1207_v37 = vld [vmem:[#allocation6 + $0x200] sm:$0xff] }
 0x147   : > { %v1197_v20 = vld [vmem:[#allocation6 + $0x1b0] sm:$0xff]  ;;  %v1206_v29 = vld [vmem:[#allocation6 + $0x1f8] sm:$0xff]  ;;  %v1211_v38 = vld [vmem:[#allocation6 + $0x220] sm:$0xff] }
 0x148   : > { %3072 = vmatpush1.bf16.msra.mxu0 %v3071_v50  ;;  %v1173_v50 = vld [vmem:[#allocation6 + $0xf0] sm:$0xff]  ;;  %v3231_v21 = vpack.c.bf16 %v1197_v20, %v1193_v19  ;;  %v3233_v32 = vpack.c.bf16 %v1206_v29, %v1202_v27  ;;  %v1210_v39 = vld [vmem:[#allocation6 + $0x218] sm:$0xff]  ;;  %v1244_v19 = vld [vmem:[#allocation6 + $0x328] sm:$0xff] }
 0x149   : > { %3074 = vmatprep.subr.bf16.mxu0 %v3073_v55  ;;  %3136 = vmatpush1.bf16.msra.mxu1 %v3135_v61  ;;  %v1182_v55 = vld [vmem:[#allocation6 + $0x138] sm:$0xff]  ;;  %v3219_v58 = vpack.c.bf16 %v1173_v50, %v1169_v49  ;;  %v1177_v61 = vld [vmem:[#allocation6 + $0x110] sm:$0xff]  ;;  %v1215_v49 = vld [vmem:[#allocation6 + $0x240] sm:$0xff] }
 0x14a   : > { %3138 = vmatprep.subr.bf16.mxu1 %v3137_v63  ;;  %v3221_v60 = vpack.c.bf16 %v1182_v55, %v1178_v54  ;;  %v1183_v63 = vld [vmem:[#allocation6 + $0x140] sm:$0xff]  ;;  %v1201_v30 = vld [vmem:[#allocation6 + $0x1d0] sm:$0xff]  ;;  %v1214_v41 = vld [vmem:[#allocation6 + $0x238] sm:$0xff] }
 0x14b   : > { %v3163_v7 = vpack.c.bf16 %v1187_v1, %v1183_v63  ;;  %v1205_v31 = vld [vmem:[#allocation6 + $0x1f0] sm:$0xff]  ;;  %v3237_v44 = vpack.c.bf16 %v1214_v41, %v1210_v39  ;;  %v1219_v50 = vld [vmem:[#allocation6 + $0x260] sm:$0xff]  ;;  %v1218_v51 = vld [vmem:[#allocation6 + $0x258] sm:$0xff] }
 0x14c   : > { %3076 = vmatpush1.bf16.msra.mxu0 %v3075_v62  ;;  %v1181_v62 = vld [vmem:[#allocation6 + $0x130] sm:$0xff]  ;;  %v3235_v33 = vpack.c.bf16 %v1205_v31, %v1201_v30  ;;  %v1222_v53 = vld [vmem:[#allocation6 + $0x278] sm:$0xff]  ;;  %v1248_v30 = vld [vmem:[#allocation6 + $0x348] sm:$0xff] }
 0x14d   : > { %3142 = vmatprep.subr.bf16.mxu0 %v3141_v3  ;;  %3140 = vmatpush1.bf16.msra.mxu1 %v3139_v10  ;;  %v1190_v3 = vld [vmem:[#allocation6 + $0x178] sm:$0xff]  ;;  %v3223_v6 = vpack.c.bf16 %v1181_v62, %v1177_v61  ;;  %v1189_v10 = vld [vmem:[#allocation6 + $0x170] sm:$0xff]  ;;  %v3241_v56 = vpack.c.bf16 %v1222_v53, %v1218_v51  ;;  %v1223_v61 = vld [vmem:[#allocation6 + $0x280] sm:$0xff] }
 0x14e   : > { %3206 = vmatprep.subr.bf16.mxu1 %v3205_v12  ;;  %v3225_v8 = vpack.c.bf16 %v1190_v3, %v1186_v2  ;;  %v3165_v12 = vpack.c.bf16 %v1196_v5, %v1192_v4  ;;  %v1209_v42 = vld [vmem:[#allocation6 + $0x210] sm:$0xff]  ;;  %v1227_v62 = vld [vmem:[#allocation6 + $0x2a0] sm:$0xff]  ;;  %v1226_v63 = vld [vmem:[#allocation6 + $0x298] sm:$0xff] }
 0x14f   : > { %1042 = vmatmul.mubr.f32.vlgmr.msra.gmra.mrb[0].mxu0 %v824_v9  ;;  %v1213_v43 = vld [vmem:[#allocation6 + $0x230] sm:$0xff]  ;;  %v1230_v1 = vld [vmem:[#allocation6 + $0x2b8] sm:$0xff]  ;;  %v1252_v31 = vld [vmem:[#allocation6 + $0x368] sm:$0xff] }
 0x150   : > { %3144 = vmatpush1.bf16.msra.mxu0 %v3143_v11  ;;  %1113 = vmatmul.mubr.f32.vlgmr.msra.gmra.mrb[0].mxu1 %v824_v9  ;;  %v1185_v9 = vld [vmem:[#allocation6 + $0x150] sm:$0xff]  ;;  %v1191_v11 = vld [vmem:[#allocation6 + $0x180] sm:$0xff]  ;;  %v3239_v45 = vpack.c.bf16 %v1213_v43, %v1209_v42  ;;  %v3245_v4 = vpack.c.bf16 %v1230_v1, %v1226_v63  ;;  %v1256_v42 = vld [vmem:[#allocation6 + $0x388] sm:$0xff] }
 0x151   : > { %3146 = vmatprep.subr.bf16.mxu0 %v3145_v16  ;;  %3208 = vmatpush1.bf16.msra.mxu1 %v3207_v22  ;;  %v3227_v16 = vpack.c.bf16 %v1189_v10, %v1185_v9  ;;  %v3167_v17 = vpack.c.bf16 %v1195_v13, %v1191_v11  ;;  %v1200_v22 = vld [vmem:[#allocation6 + $0x1c8] sm:$0xff]  ;;  %v1217_v54 = vld [vmem:[#allocation6 + $0x250] sm:$0xff]  ;;  %v1231_v9 = vld [vmem:[#allocation6 + $0x2c0] sm:$0xff] }
 0x152   : > { %3210 = vmatprep.subr.bf16.mxu1 %v3209_v24  ;;  %v1221_v55 = vld [vmem:[#allocation6 + $0x270] sm:$0xff]  ;;  %v1235_v10 = vld [vmem:[#allocation6 + $0x2e0] sm:$0xff]  ;;  %v1234_v11 = vld [vmem:[#allocation6 + $0x2d8] sm:$0xff] }
 0x153   : > { %v3243_v57 = vpack.c.bf16 %v1221_v55, %v1217_v54  ;;  %v1225_v2 = vld [vmem:[#allocation6 + $0x290] sm:$0xff]  ;;  %v1238_v13 = vld [vmem:[#allocation6 + $0x2f8] sm:$0xff]  ;;  %v1260_v43 = vld [vmem:[#allocation6 + $0x3a8] sm:$0xff] }
 0x154   : > { %3148 = vmatpush1.bf16.msra.mxu0 %v3147_v23  ;;  %v1204_v23 = vld [vmem:[#allocation6 + $0x1e8] sm:$0xff]  ;;  %v1229_v3 = vld [vmem:[#allocation6 + $0x2b0] sm:$0xff] }
 0x155   : > { %3150 = vmatprep.subr.bf16.mxu0 %v3149_v28  ;;  %3212 = vmatpush1.bf16.msra.mxu1 %v3211_v34  ;;  %v3169_v24 = vpack.c.bf16 %v1204_v23, %v1200_v22  ;;  %v3171_v28 = vpack.c.bf16 %v1203_v26, %v1199_v25  ;;  %v1208_v34 = vld [vmem:[#allocation6 + $0x208] sm:$0xff]  ;;  %v3247_v5 = vpack.c.bf16 %v1229_v3, %v1225_v2  ;;  %v1233_v14 = vld [vmem:[#allocation6 + $0x2d0] sm:$0xff]  ;;  %v1243_v22 = vld [vmem:[#allocation6 + $0x320] sm:$0xff] }
 0x156   : > { %3214 = vmatprep.subr.bf16.mxu1 %v3213_v36  ;;  %v1237_v15 = vld [vmem:[#allocation6 + $0x2f0] sm:$0xff]  ;;  %v1242_v23 = vld [vmem:[#allocation6 + $0x318] sm:$0xff]  ;;  %v1264_v54 = vld [vmem:[#allocation6 + $0x3c8] sm:$0xff] }
 0x157   : > { %v1246_v25 = vld [vmem:[#allocation6 + $0x338] sm:$0xff]  ;;  %v1241_v26 = vld [vmem:[#allocation6 + $0x310] sm:$0xff]  ;;  %v1268_v55 = vld [vmem:[#allocation6 + $0x3e8] sm:$0xff] }
 0x158   : > { %3152 = vmatpush1.bf16.msra.mxu0 %v3151_v35  ;;  %v1212_v35 = vld [vmem:[#allocation6 + $0x228] sm:$0xff]  ;;  %v1245_v27 = vld [vmem:[#allocation6 + $0x330] sm:$0xff] }
 0x159   : > { %3154 = vmatprep.subr.bf16.mxu0 %v3153_v40  ;;  %3216 = vmatpush1.bf16.msra.mxu1 %v3215_v46  ;;  %v3173_v36 = vpack.c.bf16 %v1212_v35, %v1208_v34  ;;  %v3175_v40 = vpack.c.bf16 %v1211_v38, %v1207_v37  ;;  %v1216_v46 = vld [vmem:[#allocation6 + $0x248] sm:$0xff]  ;;  %v3255_v29 = vpack.c.bf16 %v1245_v27, %v1241_v26  ;;  %v1251_v34 = vld [vmem:[#allocation6 + $0x360] sm:$0xff]  ;;  %v1250_v35 = vld [vmem:[#allocation6 + $0x358] sm:$0xff] }
 0x15a   : > { %3218 = vmatprep.subr.bf16.mxu1 %v3217_v48  ;;  %v1254_v37 = vld [vmem:[#allocation6 + $0x378] sm:$0xff]  ;;  %v1249_v38 = vld [vmem:[#allocation6 + $0x350] sm:$0xff]  ;;  %v1461_v2 = vld [vmem:[#allocation8 + $0x8] sm:$0xff] }
 0x15b   : > { %v1253_v39 = vld [vmem:[#allocation6 + $0x370] sm:$0xff]  ;;  %v1465_v3 = vld [vmem:[#allocation8 + $0x28] sm:$0xff] }
 0x15c   : > { %3156 = vmatpush1.bf16.msra.mxu0 %v3155_v47  ;;  %v1220_v47 = vld [vmem:[#allocation6 + $0x268] sm:$0xff]  ;;  %v3259_v41 = vpack.c.bf16 %v1253_v39, %v1249_v38  ;;  %v1261_v51 = vld [vmem:[#allocation6 + $0x3b0] sm:$0xff] }
 0x15d   : > { %3158 = vmatprep.subr.bf16.mxu0 %v3157_v52  ;;  %3220 = vmatpush1.bf16.msra.mxu1 %v3219_v58  ;;  %v3177_v48 = vpack.c.bf16 %v1220_v47, %v1216_v46  ;;  %v3179_v52 = vpack.c.bf16 %v1219_v50, %v1215_v49  ;;  %v1224_v58 = vld [vmem:[#allocation6 + $0x288] sm:$0xff]  ;;  %v1259_v46 = vld [vmem:[#allocation6 + $0x3a0] sm:$0xff]  ;;  %v1258_v47 = vld [vmem:[#allocation6 + $0x398] sm:$0xff] }
 0x15e   : > { %3222 = vmatprep.subr.bf16.mxu1 %v3221_v60  ;;  %v1262_v49 = vld [vmem:[#allocation6 + $0x3b8] sm:$0xff]  ;;  %v1257_v50 = vld [vmem:[#allocation6 + $0x390] sm:$0xff] }
 0x15f   : > { %v3263_v53 = vpack.c.bf16 %v1261_v51, %v1257_v50  ;;  %v1269_v63 = vld [vmem:[#allocation6 + $0x3f0] sm:$0xff]  ;;  %v1471_v50 = vld [vmem:[#allocation8 + $0x58] sm:$0xff] }
 0x160   : > { %3160 = vmatpush1.bf16.msra.mxu0 %v3159_v59  ;;  %v1228_v59 = vld [vmem:[#allocation6 + $0x2a8] sm:$0xff]  ;;  %v1475_v51 = vld [vmem:[#allocation8 + $0x78] sm:$0xff] }
 0x161   : > { %3162 = vmatprep.subr.bf16.mxu0 %v3161_v0  ;;  %3224 = vmatpush1.bf16.msra.mxu1 %v3223_v6  ;;  %v3181_v60 = vpack.c.bf16 %v1228_v59, %v1224_v58  ;;  %v3183_v0 = vpack.c.bf16 %v1227_v62, %v1223_v61  ;;  %v1232_v6 = vld [vmem:[#allocation6 + $0x2c8] sm:$0xff]  ;;  %v1267_v58 = vld [vmem:[#allocation6 + $0x3e0] sm:$0xff]  ;;  %v1266_v59 = vld [vmem:[#allocation6 + $0x3d8] sm:$0xff] }
 0x162   : > { %3226 = vmatprep.subr.bf16.mxu1 %v3225_v8  ;;  %v1270_v61 = vld [vmem:[#allocation6 + $0x3f8] sm:$0xff]  ;;  %v1265_v62 = vld [vmem:[#allocation6 + $0x3d0] sm:$0xff] }
 0x163   : > { %v3267_v1 = vpack.c.bf16 %v1269_v63, %v1265_v62  ;;  %v1470_v62 = vld [vmem:[#allocation8 + $0x50] sm:$0xff] }
 0x164   : > { %3164 = vmatpush1.bf16.msra.mxu0 %v3163_v7  ;;  %v1236_v7 = vld [vmem:[#allocation6 + $0x2e8] sm:$0xff]  ;;  %v1474_v63 = vld [vmem:[#allocation8 + $0x70] sm:$0xff] }
 0x165   : > { %3166 = vmatprep.subr.bf16.mxu0 %v3165_v12  ;;  %3228 = vmatpush1.bf16.msra.mxu1 %v3227_v16  ;;  %v3185_v8 = vpack.c.bf16 %v1236_v7, %v1232_v6  ;;  %v3187_v12 = vpack.c.bf16 %v1235_v10, %v1231_v9  ;;  %v3249_v16 = vpack.c.bf16 %v1238_v13, %v1234_v11  ;;  %v1463_v6 = vld [vmem:[#allocation8 + $0x18] sm:$0xff]  ;;  %v957_v9 = vlaneseq }
 0x166   : > { %3230 = vmatprep.subr.bf16.mxu1 %v3229_v18  ;;  %v1240_v18 = vld [vmem:[#allocation6 + $0x308] sm:$0xff]  ;;  %v1467_v7 = vld [vmem:[#allocation8 + $0x38] sm:$0xff] }
 0x167   : > { %v3189_v20 = vpack.c.bf16 %v1244_v19, %v1240_v18  ;;  %v958_v10 = vshrl.u32 %v957_v9, 7  ;;  %v1485_v9 = vld [vmem:[#allocation8 + $0xc8] sm:$0xff] }
 0x168   : > { %3168 = vmatpush1.bf16.msra.mxu0 %v3167_v17  ;;  %v3251_v17 = vpack.c.bf16 %v1237_v15, %v1233_v14 }
 0x169   : > { %3232 = vmatpush1.bf16.msra.mxu1 %v3231_v21  ;;  %3170 = vmatprep.subr.bf16.mxu0 %v3169_v24  ;;  %v1239_v21 = vld [vmem:[#allocation6 + $0x300] sm:$0xff]  ;;  %v4756_v11 = vsub.s32 0, %v958_v10  ;;  %v4761_v13 = vsub.s32 1, %v958_v10  ;;  %v4763_v14 = vsub.s32 2, %v958_v10 }
 0x16a   : > { %3234 = vmatprep.subr.bf16.mxu1 %v3233_v32  ;;  %v3191_v24 = vpack.c.bf16 %v1243_v22, %v1239_v21  ;;  %v3193_v32 = vpack.c.bf16 %v1252_v31, %v1248_v30  ;;  %v4768_v21 = vsub.s32 3, %v958_v10 }
 0x16c   : > { %3172 = vmatpush1.bf16.msra.mxu0 %v3171_v28  ;;  %v3253_v28 = vpack.c.bf16 %v1246_v25, %v1242_v23 }
 0x16d   : > { %3236 = vmatpush1.bf16.msra.mxu1 %v3235_v33  ;;  %3174 = vmatprep.subr.bf16.mxu0 %v3173_v36  ;;  %v1247_v33 = vld [vmem:[#allocation6 + $0x340] sm:$0xff] }
 0x16e   : > { %3238 = vmatprep.subr.bf16.mxu1 %v3237_v44  ;;  %v3195_v36 = vpack.c.bf16 %v1251_v34, %v1247_v33  ;;  %v3197_v44 = vpack.c.bf16 %v1260_v43, %v1256_v42 }
 0x170   : > { %3176 = vmatpush1.bf16.msra.mxu0 %v3175_v40  ;;  %v3257_v40 = vpack.c.bf16 %v1254_v37, %v1250_v35  ;;  %v826_v37 = vld [vmem:[%s5274_s3] sm:$0xff] }
 0x171   : > { %3240 = vmatpush1.bf16.msra.mxu1 %v3239_v45  ;;  %3178 = vmatprep.subr.bf16.mxu0 %v3177_v48  ;;  %v1255_v45 = vld [vmem:[#allocation6 + $0x380] sm:$0xff] }
 0x172   : > { %3242 = vmatprep.subr.bf16.mxu1 %v3241_v56  ;;  %v3199_v48 = vpack.c.bf16 %v1259_v46, %v1255_v45  ;;  %v3201_v56 = vpack.c.bf16 %v1268_v55, %v1264_v54  ;;  %v1464_v45 = vld [vmem:[#allocation8 + $0x20] sm:$0xff]  ;;  %v1469_v46 = vld [vmem:[#allocation8 + $0x48] sm:$0xff] }
 0x173   : > { %v1468_v55 = vld [vmem:[#allocation8 + $0x40] sm:$0xff] }
 0x174   : > { %3180 = vmatpush1.bf16.msra.mxu0 %v3179_v52  ;;  %v3261_v52 = vpack.c.bf16 %v1262_v49, %v1258_v47  ;;  %v1462_v47 = vld [vmem:[#allocation8 + $0x10] sm:$0xff]  ;;  %v1473_v49 = vld [vmem:[#allocation8 + $0x68] sm:$0xff] }
 0x175   : > { %3244 = vmatpush1.bf16.msra.mxu1 %v3243_v57  ;;  %3182 = vmatprep.subr.bf16.mxu0 %v3181_v60  ;;  %v1263_v57 = vld [vmem:[#allocation6 + $0x3c0] sm:$0xff] }
 0x176   : > { %3246 = vmatprep.subr.bf16.mxu1 %v3245_v4  ;;  %v3203_v60 = vpack.c.bf16 %v1267_v58, %v1263_v57  ;;  %v3269_v4 = vpack.c.bf16 %v1465_v3, %v1461_v2  ;;  %v1483_v2 = vld [vmem:[#allocation8 + $0xb8] sm:$0xff] }
 0x177   : > { %v1458_v3 = vld [vmem:[%s5275_s7] sm:$0xff] }
 0x178   : > { %3184 = vmatpush1.bf16.msra.mxu0 %v3183_v0  ;;  %v3265_v0 = vpack.c.bf16 %v1270_v61, %v1266_v59  ;;  %v3273_v59 = vpack.c.bf16 %v1473_v49, %v1469_v46  ;;  %v3337_v61 = vpack.c.bf16 %v1475_v51, %v1471_v50  ;;  %v1504_v46 = vld [vmem:[#allocation8 + $0x160] sm:$0xff]  ;;  %v1509_v49 = vld [vmem:[#allocation8 + $0x188] sm:$0xff]  ;;  %v1502_v51 = vld [vmem:[#allocation8 + $0x150] sm:$0xff] }
 0x179   : > { %3248 = vmatpush1.bf16.msra.mxu1 %v3247_v5  ;;  %3186 = vmatprep.subr.bf16.mxu0 %v3185_v8  ;;  %v2939_v5 = vld [vmem:[%s5271_s2 + $0x8] sm:$0xff]  ;;  %v3333_v8 = vpack.c.bf16 %v1467_v7, %v1463_v6  ;;  %v3339_v7 = vpack.c.bf16 %v1474_v63, %v1470_v62  ;;  %v1510_v63 = vld [vmem:[#allocation8 + $0x190] sm:$0xff]  ;;  %s5280_s2 = sld [smem:[#allocation48_spill]] }
 0x17a   : > { %3250 = vmatprep.subr.bf16.mxu1 %v3249_v16  ;;  %1357 = vmatprep.mubr.f32.mxu0 %v2939_v5  ;;  %v1480_v6 = vld [vmem:[#allocation8 + $0xa0] sm:$0xff] }
 0x17b   : > { %1428 = vmatprep.mubr.f32.mxu1 %v2939_v5  ;;  %v1476_v5 = vld [vmem:[#allocation8 + $0x80] sm:$0xff] }
 0x17c   : > { %3188 = vmatpush1.bf16.msra.mxu0 %v3187_v12  ;;  %v955_v12 = vld [vmem:[%s5273_s19] sm:$0xf] }
 0x17d   : > { %3252 = vmatpush1.bf16.msra.mxu1 %v3251_v17  ;;  %3190 = vmatprep.subr.bf16.mxu0 %v3189_v20  ;;  %v960_v15 = vrot.slane %v955_v12, %v4756_v11  ;;  %v964_v16 = vrot.slane %v955_v12, %v4761_v13  ;;  %v968_v18 = vrot.slane %v955_v12, %v4763_v14 }
 0x17e   : > { %3254 = vmatprep.subr.bf16.mxu1 %v3253_v28  ;;  %v972_v28 = vrot.slane %v955_v12, %v4768_v21  ;;  %v1478_v12 = vld [vmem:[#allocation8 + $0x90] sm:$0xff] }
 0x180   : > { %3192 = vmatpush1.bf16.msra.mxu0 %v3191_v24 }
 0x181   : > { %3256 = vmatpush1.bf16.msra.mxu1 %v3255_v29  ;;  %3194 = vmatprep.subr.bf16.mxu0 %v3193_v32 }
 0x182   : > { %3258 = vmatprep.subr.bf16.mxu1 %v3257_v40 }
 0x184   : > { %3196 = vmatpush1.bf16.msra.mxu0 %v3195_v36 }
 0x185   : > { %3260 = vmatpush1.bf16.msra.mxu1 %v3259_v41  ;;  %3198 = vmatprep.subr.bf16.mxu0 %v3197_v44  ;;  %v1460_v44 = vld [vmem:[#allocation8] sm:$0xff] }
 0x186   : > { %3262 = vmatprep.subr.bf16.mxu1 %v3261_v52  ;;  %v3271_v54 = vpack.c.bf16 %v1464_v45, %v1460_v44  ;;  %v1500_v45 = vld [vmem:[#allocation8 + $0x140] sm:$0xff] }
 0x188   : > { %3200 = vmatpush1.bf16.msra.mxu0 %v3199_v48  ;;  %v1466_v48 = vld [vmem:[#allocation8 + $0x30] sm:$0xff] }
 0x189   : > { %3264 = vmatpush1.bf16.msra.mxu1 %v3263_v53  ;;  %3202 = vmatprep.subr.bf16.mxu0 %v3201_v56  ;;  %v1472_v56 = vld [vmem:[#allocation8 + $0x60] sm:$0xff]  ;;  %v3335_v57 = vpack.c.bf16 %v1466_v48, %v1462_v47 }
 0x18a   : > { %3266 = vmatprep.subr.bf16.mxu1 %v3265_v0  ;;  %v1481_v0 = vld [vmem:[#allocation8 + $0xa8] sm:$0xff] }
 0x18c   : > { %3204 = vmatpush1.bf16.msra.mxu0 %v3203_v60  ;;  %v1477_v60 = vld [vmem:[#allocation8 + $0x88] sm:$0xff] }
 0x18d   : > { %3268 = vmatpush1.bf16.msra.mxu1 %v3267_v1  ;;  %3270 = vmatprep.subr.bf16.mxu0 %v3269_v4  ;;  %v1479_v1 = vld [vmem:[#allocation8 + $0x98] sm:$0xff]  ;;  %v3275_v4 = vpack.c.bf16 %v1472_v56, %v1468_v55  ;;  %v3291_v56 = vpack.c.bf16 %v1504_v46, %v1500_v45  ;;  %v1540_v45 = vld [vmem:[#allocation8 + $0x280] sm:$0xff] }
 0x18e   : > { %3334 = vmatprep.subr.bf16.mxu1 %v3333_v8  ;;  %v3277_v8 = vpack.c.bf16 %v1481_v0, %v1477_v60  ;;  %v3341_v10 = vpack.c.bf16 %v1483_v2, %v1479_v1  ;;  %v1515_v55 = vld [vmem:[#allocation8 + $0x1b8] sm:$0xff]  ;;  %v1514_v0 = vld [vmem:[#allocation8 + $0x1b0] sm:$0xff]  ;;  %v1521_v1 = vld [vmem:[#allocation8 + $0x1e8] sm:$0xff] }
 0x18f   : > { %v1519_v2 = vld [vmem:[#allocation8 + $0x1d8] sm:$0xff]  ;;  %v1544_v46 = vld [vmem:[#allocation8 + $0x2a0] sm:$0xff] }
 0x222   : > { %v1043_v17 = vpop.f32.mrb[0].mxu0 }
 0x223   : > { %v1044_v19 = vadd.f32 %v1043_v17, %v960_v15  ;;  %v1045_v20 = vpop.f32.mrb[1].mxu0  ;;  %v1114_v24 = vpop.f32.mrb[0].mxu1  ;;  %v1482_v15 = vld [vmem:[#allocation8 + $0xb0] sm:$0xff]  ;;  %v1487_v17 = vld [vmem:[#allocation8 + $0xd8] sm:$0xff] }
 0x224   : > { %v1046_v22 = vadd.f32 %v1045_v20, %v964_v16  ;;  %v1115_v26 = vadd.f32 %v1114_v24, %v968_v18  ;;  %v1116_v27 = vpop.f32.mrb[1].mxu1  ;;  %v1489_v16 = vld [vmem:[#allocation8 + $0xe8] sm:$0xff]  ;;  %v1491_v18 = vld [vmem:[#allocation8 + $0xf8] sm:$0xff]  ;;  %v1484_v20 = vld [vmem:[#allocation8 + $0xc0] sm:$0xff] }
 0x225   : > { %v1119_v23 = vmul.f32 0.5, %v1044_v19  ;;  %v1117_v29 = vadd.f32 %v1116_v27, %v972_v28  ;;  %v3279_v19 = vpack.c.bf16 %v1480_v6, %v1476_v5  ;;  %v3281_v24 = vpack.c.bf16 %v1489_v16, %v1485_v9  ;;  %v1486_v27 = vld [vmem:[#allocation8 + $0xd0] sm:$0xff]  ;;  %v1516_v5 = vld [vmem:[#allocation8 + $0x1c0] sm:$0xff]  ;;  %v1525_v9 = vld [vmem:[#allocation8 + $0x208] sm:$0xff] }
 0x226   : > { %v1123_v25 = vmul.f32 0.5, %v1046_v22  ;;  %v1488_v22 = vld [vmem:[#allocation8 + $0xe0] sm:$0xff]  ;;  %v1490_v28 = vld [vmem:[#allocation8 + $0xf0] sm:$0xff]  ;;  %v1529_v16 = vld [vmem:[#allocation8 + $0x228] sm:$0xff] }
 0x227   : > { %3830 = vtanh.f32 %v1119_v23  ;;  %v1128_v30 = vmul.f32 0.5, %v1117_v29  ;;  %v3343_v23 = vpack.c.bf16 %v1482_v15, %v1478_v12  ;;  %v1497_v29 = vld [vmem:[#allocation8 + $0x128] sm:$0xff]  ;;  %v1520_v6 = vld [vmem:[#allocation8 + $0x1e0] sm:$0xff]  ;;  %v1518_v12 = vld [vmem:[#allocation8 + $0x1d0] sm:$0xff] }
 0x228   : > { %3832 = vtanh.f32 %v1123_v25  ;;  %v1493_v25 = vld [vmem:[#allocation8 + $0x108] sm:$0xff]  ;;  %v1522_v15 = vld [vmem:[#allocation8 + $0x1f0] sm:$0xff] }
 0x229   : > { %3834 = vtanh.f32 %v1115_v26  ;;  %v3345_v26 = vpack.c.bf16 %v1491_v18, %v1487_v17  ;;  %v1527_v17 = vld [vmem:[#allocation8 + $0x218] sm:$0xff] }
 0x22a   : > { %3836 = vtanh.f32 %v1128_v30  ;;  %v1495_v30 = vld [vmem:[#allocation8 + $0x118] sm:$0xff] }
 0x22b   : > { %v1531_v18 = vld [vmem:[#allocation8 + $0x238] sm:$0xff] }
 0x231   : > { %v3831_v31 = vpop.eup %3830 }
 0x232   : > { %v3833_v32 = vpop.eup %3832  ;;  %v1121_v33 = vadd.f32 1.0, %v3831_v31  ;;  %v1499_v31 = vld [vmem:[#allocation8 + $0x138] sm:$0xff] }
 0x233   : > { %v3835_v34 = vpop.eup %3834  ;;  %v1125_v35 = vadd.f32 1.0, %v3833_v32  ;;  %v3283_v32 = vpack.c.bf16 %v1488_v22, %v1484_v20  ;;  %v1524_v20 = vld [vmem:[#allocation8 + $0x200] sm:$0xff] }
 0x234   : > { %v1122_v36 = vmul.f32 0.5, %v1121_v33  ;;  %v3837_v42 = vpop.eup %3836  ;;  %v1492_v33 = vld [vmem:[#allocation8 + $0x100] sm:$0xff] }
 0x235   : > { %v1126_v38 = vmul.f32 0.5, %v1125_v35  ;;  %v1130_v43 = vadd.f32 1.0, %v3837_v42  ;;  %v3347_v35 = vpack.c.bf16 %v1490_v28, %v1486_v27  ;;  %v1503_v42 = vld [vmem:[#allocation8 + $0x158] sm:$0xff]  ;;  %v1528_v22 = vld [vmem:[#allocation8 + $0x220] sm:$0xff]  ;;  %v1526_v27 = vld [vmem:[#allocation8 + $0x210] sm:$0xff] }
 0x236   : > { %v1133_v39 = vmul.f32 %v3835_v34, %v1122_v36  ;;  %v1496_v34 = vld [vmem:[#allocation8 + $0x120] sm:$0xff]  ;;  %v3285_v36 = vpack.c.bf16 %v1497_v29, %v1493_v25  ;;  %v1533_v25 = vld [vmem:[#allocation8 + $0x248] sm:$0xff]  ;;  %v1530_v28 = vld [vmem:[#allocation8 + $0x230] sm:$0xff] }
 0x237   : > { %v1132_v40 = vmul.f32 %v1126_v38, %v826_v37  ;;  %v1131_v52 = vmul.f32 0.5, %v1130_v43  ;;  %v1501_v37 = vld [vmem:[#allocation8 + $0x148] sm:$0xff]  ;;  %v3349_v38 = vpack.c.bf16 %v1499_v31, %v1495_v30  ;;  %v1507_v43 = vld [vmem:[#allocation8 + $0x178] sm:$0xff]  ;;  %v3287_v44 = vpack.c.bf16 %v1496_v34, %v1492_v33  ;;  %v1532_v33 = vld [vmem:[#allocation8 + $0x240] sm:$0xff] }
 0x238   : > { %v3353_v50 = vpack.c.bf16 %v1507_v43, %v1503_v42  ;;  %v1537_v29 = vld [vmem:[#allocation8 + $0x268] sm:$0xff]  ;;  %v1535_v30 = vld [vmem:[#allocation8 + $0x258] sm:$0xff]  ;;  %v1536_v34 = vld [vmem:[#allocation8 + $0x260] sm:$0xff] }
 0x239   : > { %v1134_v41 = vadd.f32 %v1133_v39, %v1132_v40  ;;  %v1494_v39 = vld [vmem:[#allocation8 + $0x110] sm:$0xff]  ;;  %v1539_v31 = vld [vmem:[#allocation8 + $0x278] sm:$0xff] }
 0x23a   : > { %v1498_v40 = vld [vmem:[#allocation8 + $0x130] sm:$0xff]  ;;  %v1543_v42 = vld [vmem:[#allocation8 + $0x298] sm:$0xff] }
 0x23b   : > { %3838 = vtanh.f32 %v1134_v41  ;;  %1137 = vst [vmem:[#allocation19] sm:$0xff] %v1134_v41  ;;  %v1505_v41 = vld [vmem:[#allocation8 + $0x168] sm:$0xff]  ;;  %v3351_v47 = vpack.c.bf16 %v1498_v40, %v1494_v39  ;;  %v1534_v39 = vld [vmem:[#allocation8 + $0x250] sm:$0xff]  ;;  %v1547_v43 = vld [vmem:[#allocation8 + $0x2b8] sm:$0xff] }
 0x23c   : > { %v3289_v48 = vpack.c.bf16 %v1505_v41, %v1501_v37  ;;  %v1541_v37 = vld [vmem:[#allocation8 + $0x288] sm:$0xff]  ;;  %v1538_v40 = vld [vmem:[#allocation8 + $0x270] sm:$0xff] }
 0x23d   : > { %v1545_v41 = vld [vmem:[#allocation8 + $0x2a8] sm:$0xff] }
 0x245   : > { %v3839_v53 = vpop.eup %3838 }
 0x246   : > { %v1136_v58 = vmul.f32 %v3839_v53, %v1131_v52  ;;  %v1506_v52 = vld [vmem:[#allocation8 + $0x170] sm:$0xff]  ;;  %v1513_v53 = vld [vmem:[#allocation8 + $0x1a8] sm:$0xff] }
 0x247   : > { %v3293_v60 = vpack.c.bf16 %v1513_v53, %v1509_v49  ;;  %v1549_v49 = vld [vmem:[#allocation8 + $0x2c8] sm:$0xff] }
 0x248   : > { %1138 = vst [vmem:[#allocation18] sm:$0xff] %v1136_v58  ;;  %1358 = vmatmul.mubr.f32.vlgmr.msra.gmra.mrb[2].mxu0 %v1136_v58  ;;  %1429 = vmatmul.mubr.f32.vlgmr.msra.gmra.mrb[2].mxu1 %v1136_v58  ;;  %v1512_v58 = vld [vmem:[#allocation8 + $0x1a0] sm:$0xff]  ;;  %v1553_v53 = vld [vmem:[#allocation8 + $0x2e8] sm:$0xff] }
 0x249   : > { %3272 = vmatpush1.bf16.msra.mxu0 %v3271_v54  ;;  %3336 = vmatpush1.bf16.msra.mxu1 %v3335_v57  ;;  %v1511_v54 = vld [vmem:[#allocation8 + $0x198] sm:$0xff]  ;;  %v1508_v57 = vld [vmem:[#allocation8 + $0x180] sm:$0xff] }
 0x24a   : > { %3274 = vmatprep.subr.bf16.mxu0 %v3273_v59  ;;  %3338 = vmatprep.subr.bf16.mxu1 %v3337_v61  ;;  %v3355_v59 = vpack.c.bf16 %v1506_v52, %v1502_v51  ;;  %v1517_v61 = vld [vmem:[#allocation8 + $0x1c8] sm:$0xff]  ;;  %v3357_v62 = vpack.c.bf16 %v1515_v55, %v1511_v54  ;;  %v1542_v51 = vld [vmem:[#allocation8 + $0x290] sm:$0xff]  ;;  %v1551_v54 = vld [vmem:[#allocation8 + $0x2d8] sm:$0xff] }
 0x24b   : > { %1674 = vmatprep.mubr.f32.mxu0 %v1458_v3  ;;  %1745 = vmatprep.mubr.f32.mxu1 %v1458_v3  ;;  %v1523_v3 = vld [vmem:[#allocation8 + $0x1f8] sm:$0xff]  ;;  %v1546_v52 = vld [vmem:[#allocation8 + $0x2b0] sm:$0xff] }
 0x24c   : > { %v1555_v55 = vld [vmem:[#allocation8 + $0x2f8] sm:$0xff] }
 0x24d   : > { %3276 = vmatpush1.bf16.msra.mxu0 %v3275_v4  ;;  %3340 = vmatpush1.bf16.msra.mxu1 %v3339_v7  ;;  %v3295_v4 = vpack.c.bf16 %v1512_v58, %v1508_v57  ;;  %v3359_v7 = vpack.c.bf16 %v1514_v0, %v1510_v63  ;;  %v1548_v57 = vld [vmem:[#allocation8 + $0x2c0] sm:$0xff]  ;;  %v1550_v63 = vld [vmem:[#allocation8 + $0x2d0] sm:$0xff] }
 0x24e   : > { %3278 = vmatprep.subr.bf16.mxu0 %v3277_v8  ;;  %3342 = vmatprep.subr.bf16.mxu1 %v3341_v10  ;;  %v3297_v8 = vpack.c.bf16 %v1521_v1, %v1517_v61  ;;  %v3361_v10 = vpack.c.bf16 %v1523_v3, %v1519_v2  ;;  %v1552_v58 = vld [vmem:[#allocation8 + $0x2e0] sm:$0xff]  ;;  %v1557_v61 = vld [vmem:[#allocation8 + $0x308] sm:$0xff]  ;;  %v1554_v0 = vld [vmem:[#allocation8 + $0x2f0] sm:$0xff] }
 0x24f   : > { %v1561_v1 = vld [vmem:[#allocation8 + $0x328] sm:$0xff]  ;;  %v1559_v2 = vld [vmem:[#allocation8 + $0x318] sm:$0xff] }
 0x250   : > { %v1563_v3 = vld [vmem:[#allocation8 + $0x338] sm:$0xff] }
 0x251   : > { %3280 = vmatpush1.bf16.msra.mxu0 %v3279_v19  ;;  %3344 = vmatpush1.bf16.msra.mxu1 %v3343_v23  ;;  %v3299_v19 = vpack.c.bf16 %v1520_v6, %v1516_v5  ;;  %v3363_v23 = vpack.c.bf16 %v1522_v15, %v1518_v12  ;;  %v1556_v5 = vld [vmem:[#allocation8 + $0x300] sm:$0xff]  ;;  %v1558_v12 = vld [vmem:[#allocation8 + $0x310] sm:$0xff] }
 0x252   : > { %3282 = vmatprep.subr.bf16.mxu0 %v3281_v24  ;;  %3346 = vmatprep.subr.bf16.mxu1 %v3345_v26  ;;  %v3301_v24 = vpack.c.bf16 %v1529_v16, %v1525_v9  ;;  %v3365_v26 = vpack.c.bf16 %v1531_v18, %v1527_v17  ;;  %v1560_v6 = vld [vmem:[#allocation8 + $0x320] sm:$0xff]  ;;  %v1565_v9 = vld [vmem:[#allocation8 + $0x348] sm:$0xff]  ;;  %v1562_v15 = vld [vmem:[#allocation8 + $0x330] sm:$0xff] }
 0x253   : > { %v1569_v16 = vld [vmem:[#allocation8 + $0x368] sm:$0xff]  ;;  %v1567_v17 = vld [vmem:[#allocation8 + $0x358] sm:$0xff] }
 0x254   : > { %v1571_v18 = vld [vmem:[#allocation8 + $0x378] sm:$0xff] }
 0x255   : > { %3284 = vmatpush1.bf16.msra.mxu0 %v3283_v32  ;;  %3348 = vmatpush1.bf16.msra.mxu1 %v3347_v35  ;;  %v3303_v32 = vpack.c.bf16 %v1528_v22, %v1524_v20  ;;  %v3367_v35 = vpack.c.bf16 %v1530_v28, %v1526_v27  ;;  %v1564_v20 = vld [vmem:[#allocation8 + $0x340] sm:$0xff]  ;;  %v1566_v27 = vld [vmem:[#allocation8 + $0x350] sm:$0xff] }
 0x256   : > { %3286 = vmatprep.subr.bf16.mxu0 %v3285_v36  ;;  %3350 = vmatprep.subr.bf16.mxu1 %v3349_v38  ;;  %v3305_v36 = vpack.c.bf16 %v1537_v29, %v1533_v25  ;;  %v3369_v38 = vpack.c.bf16 %v1539_v31, %v1535_v30  ;;  %v1568_v22 = vld [vmem:[#allocation8 + $0x360] sm:$0xff]  ;;  %v1573_v25 = vld [vmem:[#allocation8 + $0x388] sm:$0xff]  ;;  %v1570_v28 = vld [vmem:[#allocation8 + $0x370] sm:$0xff] }
 0x257   : > { %v1577_v29 = vld [vmem:[#allocation8 + $0x3a8] sm:$0xff]  ;;  %v1575_v30 = vld [vmem:[#allocation8 + $0x398] sm:$0xff] }
 0x258   : > { %v1579_v31 = vld [vmem:[#allocation8 + $0x3b8] sm:$0xff] }
 0x259   : > { %3288 = vmatpush1.bf16.msra.mxu0 %v3287_v44  ;;  %3352 = vmatpush1.bf16.msra.mxu1 %v3351_v47  ;;  %v3307_v44 = vpack.c.bf16 %v1536_v34, %v1532_v33  ;;  %v3371_v47 = vpack.c.bf16 %v1538_v40, %v1534_v39  ;;  %v1572_v33 = vld [vmem:[#allocation8 + $0x380] sm:$0xff]  ;;  %v1574_v39 = vld [vmem:[#allocation8 + $0x390] sm:$0xff] }
 0x25a   : > { %3290 = vmatprep.subr.bf16.mxu0 %v3289_v48  ;;  %3354 = vmatprep.subr.bf16.mxu1 %v3353_v50  ;;  %v3309_v48 = vpack.c.bf16 %v1545_v41, %v1541_v37  ;;  %v3373_v50 = vpack.c.bf16 %v1547_v43, %v1543_v42  ;;  %v1576_v34 = vld [vmem:[#allocation8 + $0x3a0] sm:$0xff]  ;;  %v1581_v37 = vld [vmem:[#allocation8 + $0x3c8] sm:$0xff]  ;;  %v1578_v40 = vld [vmem:[#allocation8 + $0x3b0] sm:$0xff] }
 0x25b   : > { %v1585_v41 = vld [vmem:[#allocation8 + $0x3e8] sm:$0xff]  ;;  %v1583_v42 = vld [vmem:[#allocation8 + $0x3d8] sm:$0xff] }
 0x25c   : > { %v1587_v43 = vld [vmem:[#allocation8 + $0x3f8] sm:$0xff] }
 0x25d   : > { %3292 = vmatpush1.bf16.msra.mxu0 %v3291_v56  ;;  %3356 = vmatpush1.bf16.msra.mxu1 %v3355_v59  ;;  %v3311_v56 = vpack.c.bf16 %v1544_v46, %v1540_v45  ;;  %v3375_v59 = vpack.c.bf16 %v1546_v52, %v1542_v51  ;;  %v1580_v45 = vld [vmem:[#allocation8 + $0x3c0] sm:$0xff]  ;;  %v3391_v46 = vpack.c.bf16 %v1578_v40, %v1574_v39  ;;  %v1586_v51 = vld [vmem:[#allocation8 + $0x3f0] sm:$0xff] }
 0x25e   : > { %3294 = vmatprep.subr.bf16.mxu0 %v3293_v60  ;;  %3358 = vmatprep.subr.bf16.mxu1 %v3357_v62  ;;  %v3313_v60 = vpack.c.bf16 %v1553_v53, %v1549_v49  ;;  %v3377_v62 = vpack.c.bf16 %v1555_v55, %v1551_v54  ;;  %v3393_v49 = vpack.c.bf16 %v1587_v43, %v1583_v42  ;;  %v1457_v54 = vld [vmem:[%s5276_s0] sm:$0xff]  ;;  %v1777_v55 = vld [vmem:[#allocation11 + $0x8] sm:$0xff] }
 0x25f   : > { %v1802_v39 = vld [vmem:[#allocation11 + $0xd0] sm:$0xff]  ;;  %v1813_v42 = vld [vmem:[#allocation11 + $0x128] sm:$0xff]  ;;  %v1811_v43 = vld [vmem:[#allocation11 + $0x118] sm:$0xff] }
 0x260   : > { %v1806_v40 = vld [vmem:[#allocation11 + $0xf0] sm:$0xff] }
 0x261   : > { %3296 = vmatpush1.bf16.msra.mxu0 %v3295_v4  ;;  %3360 = vmatpush1.bf16.msra.mxu1 %v3359_v7  ;;  %v3315_v4 = vpack.c.bf16 %v1552_v58, %v1548_v57  ;;  %v3379_v7 = vpack.c.bf16 %v1554_v0, %v1550_v63  ;;  %v1779_v57 = vld [vmem:[#allocation11 + $0x18] sm:$0xff]  ;;  %v1778_v0 = vld [vmem:[#allocation11 + $0x10] sm:$0xff] }
 0x262   : > { %3298 = vmatprep.subr.bf16.mxu0 %v3297_v8  ;;  %3362 = vmatprep.subr.bf16.mxu1 %v3361_v10  ;;  %v3317_v8 = vpack.c.bf16 %v1561_v1, %v1557_v61  ;;  %v3381_v10 = vpack.c.bf16 %v1563_v3, %v1559_v2  ;;  %v1780_v61 = vld [vmem:[#allocation11 + $0x20] sm:$0xff]  ;;  %v1782_v1 = vld [vmem:[#allocation11 + $0x30] sm:$0xff]  ;;  %v1785_v3 = vld [vmem:[#allocation11 + $0x48] sm:$0xff] }
 0x263   : > { %v3463_v2 = vpack.c.bf16 %v1782_v1, %v1778_v0  ;;  %v1822_v0 = vld [vmem:[#allocation11 + $0x170] sm:$0xff]  ;;  %v1825_v1 = vld [vmem:[#allocation11 + $0x188] sm:$0xff] }
 0x265   : > { %3300 = vmatpush1.bf16.msra.mxu0 %v3299_v19  ;;  %3364 = vmatpush1.bf16.msra.mxu1 %v3363_v23  ;;  %v3319_v19 = vpack.c.bf16 %v1560_v6, %v1556_v5  ;;  %v3383_v23 = vpack.c.bf16 %v1562_v15, %v1558_v12  ;;  %v1787_v5 = vld [vmem:[#allocation11 + $0x58] sm:$0xff]  ;;  %v1786_v15 = vld [vmem:[#allocation11 + $0x50] sm:$0xff] }
 0x266   : > { %3302 = vmatprep.subr.bf16.mxu0 %v3301_v24  ;;  %3366 = vmatprep.subr.bf16.mxu1 %v3365_v26  ;;  %v3321_v24 = vpack.c.bf16 %v1569_v16, %v1565_v9  ;;  %v3385_v26 = vpack.c.bf16 %v1571_v18, %v1567_v17  ;;  %v1788_v9 = vld [vmem:[#allocation11 + $0x60] sm:$0xff]  ;;  %v1790_v16 = vld [vmem:[#allocation11 + $0x70] sm:$0xff]  ;;  %v1793_v17 = vld [vmem:[#allocation11 + $0x88] sm:$0xff] }
 0x267   : > { %v3467_v18 = vpack.c.bf16 %v1790_v16, %v1786_v15  ;;  %v1830_v15 = vld [vmem:[#allocation11 + $0x1b0] sm:$0xff] }
 0x269   : > { %3304 = vmatpush1.bf16.msra.mxu0 %v3303_v32  ;;  %3368 = vmatpush1.bf16.msra.mxu1 %v3367_v35  ;;  %v3323_v32 = vpack.c.bf16 %v1568_v22, %v1564_v20  ;;  %v3387_v35 = vpack.c.bf16 %v1570_v28, %v1566_v27  ;;  %v1795_v20 = vld [vmem:[#allocation11 + $0x98] sm:$0xff]  ;;  %v1794_v27 = vld [vmem:[#allocation11 + $0x90] sm:$0xff] }
 0x26a   : > { %3306 = vmatprep.subr.bf16.mxu0 %v3305_v36  ;;  %3370 = vmatprep.subr.bf16.mxu1 %v3369_v38  ;;  %v3325_v36 = vpack.c.bf16 %v1577_v29, %v1573_v25  ;;  %v3389_v38 = vpack.c.bf16 %v1579_v31, %v1575_v30  ;;  %v1799_v22 = vld [vmem:[#allocation11 + $0xb8] sm:$0xff]  ;;  %v1792_v25 = vld [vmem:[#allocation11 + $0x80] sm:$0xff]  ;;  %v1798_v29 = vld [vmem:[#allocation11 + $0xb0] sm:$0xff] }
 0x26b   : > { %v1801_v30 = vld [vmem:[#allocation11 + $0xc8] sm:$0xff] }
 0x26c   : > { %v1805_v31 = vld [vmem:[#allocation11 + $0xe8] sm:$0xff] }
 0x26d   : > { %3308 = vmatpush1.bf16.msra.mxu0 %v3307_v44  ;;  %3372 = vmatpush1.bf16.msra.mxu1 %v3371_v47  ;;  %v3327_v44 = vpack.c.bf16 %v1576_v34, %v1572_v33  ;;  %v3329_v47 = vpack.c.bf16 %v1585_v41, %v1581_v37  ;;  %v3409_v33 = vpack.c.bf16 %v1805_v31, %v1801_v30  ;;  %v1803_v34 = vld [vmem:[#allocation11 + $0xd8] sm:$0xff]  ;;  %v1809_v41 = vld [vmem:[#allocation11 + $0x108] sm:$0xff] }
 0x26e   : > { %3310 = vmatprep.subr.bf16.mxu0 %v3309_v48  ;;  %3374 = vmatprep.subr.bf16.mxu1 %v3373_v50  ;;  %v1584_v48 = vld [vmem:[#allocation8 + $0x3e0] sm:$0xff]  ;;  %v1582_v50 = vld [vmem:[#allocation8 + $0x3d0] sm:$0xff] }
 0x26f   : > { %v3331_v52 = vpack.c.bf16 %v1584_v48, %v1580_v45  ;;  %v3395_v53 = vpack.c.bf16 %v1586_v51, %v1582_v50  ;;  %v1815_v45 = vld [vmem:[#allocation11 + $0x138] sm:$0xff]  ;;  %v1808_v48 = vld [vmem:[#allocation11 + $0x100] sm:$0xff]  ;;  %v1810_v50 = vld [vmem:[#allocation11 + $0x110] sm:$0xff] }
 0x270   : > { %v3477_v51 = vpack.c.bf16 %v1815_v45, %v1811_v43  ;;  %v1841_v31 = vld [vmem:[#allocation11 + $0x208] sm:$0xff]  ;;  %v1851_v45 = vld [vmem:[#allocation11 + $0x258] sm:$0xff] }
 0x271   : > { %3312 = vmatpush1.bf16.msra.mxu0 %v3311_v56  ;;  %3376 = vmatpush1.bf16.msra.mxu1 %v3375_v59  ;;  %v1781_v56 = vld [vmem:[#allocation11 + $0x28] sm:$0xff]  ;;  %v1783_v59 = vld [vmem:[#allocation11 + $0x38] sm:$0xff] }
 0x272   : > { %3314 = vmatprep.subr.bf16.mxu0 %v3313_v60  ;;  %3378 = vmatprep.subr.bf16.mxu1 %v3377_v62  ;;  %v3397_v58 = vpack.c.bf16 %v1781_v56, %v1777_v55  ;;  %v1776_v60 = vld [vmem:[#allocation11] sm:$0xff]  ;;  %v3461_v62 = vpack.c.bf16 %v1783_v59, %v1779_v57  ;;  %v1819_v55 = vld [vmem:[#allocation11 + $0x158] sm:$0xff]  ;;  %v1849_v43 = vld [vmem:[#allocation11 + $0x248] sm:$0xff] }
 0x273   : > { %v3399_v63 = vpack.c.bf16 %v1780_v61, %v1776_v60  ;;  %v1823_v56 = vld [vmem:[#allocation11 + $0x178] sm:$0xff]  ;;  %v1816_v60 = vld [vmem:[#allocation11 + $0x140] sm:$0xff] }
 0x274   : > { %v1820_v61 = vld [vmem:[#allocation11 + $0x160] sm:$0xff] }
 0x275   : > { %3316 = vmatpush1.bf16.msra.mxu0 %v3315_v4  ;;  %3380 = vmatpush1.bf16.msra.mxu1 %v3379_v7  ;;  %v1789_v4 = vld [vmem:[#allocation11 + $0x68] sm:$0xff]  ;;  %v1791_v7 = vld [vmem:[#allocation11 + $0x78] sm:$0xff] }
 0x276   : > { %3318 = vmatprep.subr.bf16.mxu0 %v3317_v8  ;;  %3382 = vmatprep.subr.bf16.mxu1 %v3381_v10  ;;  %v3401_v6 = vpack.c.bf16 %v1789_v4, %v1785_v3  ;;  %v1784_v8 = vld [vmem:[#allocation11 + $0x40] sm:$0xff]  ;;  %v3465_v10 = vpack.c.bf16 %v1791_v7, %v1787_v5  ;;  %v1827_v3 = vld [vmem:[#allocation11 + $0x198] sm:$0xff]  ;;  %v3419_v5 = vpack.c.bf16 %v1820_v61, %v1816_v60 }
 0x277   : > { %v3403_v12 = vpack.c.bf16 %v1788_v9, %v1784_v8  ;;  %v1831_v4 = vld [vmem:[#allocation11 + $0x1b8] sm:$0xff]  ;;  %v1824_v8 = vld [vmem:[#allocation11 + $0x180] sm:$0xff] }
 0x278   : > { %v1828_v9 = vld [vmem:[#allocation11 + $0x1a0] sm:$0xff] }
 0x279   : > { %3320 = vmatpush1.bf16.msra.mxu0 %v3319_v19  ;;  %3384 = vmatpush1.bf16.msra.mxu1 %v3383_v23  ;;  %v1797_v19 = vld [vmem:[#allocation11 + $0xa8] sm:$0xff]  ;;  %v3423_v16 = vpack.c.bf16 %v1828_v9, %v1824_v8  ;;  %v1856_v60 = vld [vmem:[#allocation11 + $0x280] sm:$0xff] }
 0x27a   : > { %3322 = vmatprep.subr.bf16.mxu0 %v3321_v24  ;;  %3386 = vmatprep.subr.bf16.mxu1 %v3385_v26  ;;  %v3405_v23 = vpack.c.bf16 %v1797_v19, %v1793_v17  ;;  %v3469_v24 = vpack.c.bf16 %v1799_v22, %v1795_v20  ;;  %v1796_v26 = vld [vmem:[#allocation11 + $0xa0] sm:$0xff]  ;;  %v1837_v19 = vld [vmem:[#allocation11 + $0x1e8] sm:$0xff]  ;;  %v1835_v20 = vld [vmem:[#allocation11 + $0x1d8] sm:$0xff] }
 0x27b   : > { %v3407_v28 = vpack.c.bf16 %v1796_v26, %v1792_v25  ;;  %v1836_v25 = vld [vmem:[#allocation11 + $0x1e0] sm:$0xff] }
 0x27c   : > { %v1860_v61 = vld [vmem:[#allocation11 + $0x2a0] sm:$0xff] }
 0x27d   : > { %3324 = vmatpush1.bf16.msra.mxu0 %v3323_v32  ;;  %3388 = vmatpush1.bf16.msra.mxu1 %v3387_v35  ;;  %v3471_v32 = vpack.c.bf16 %v1798_v29, %v1794_v27  ;;  %v1807_v35 = vld [vmem:[#allocation11 + $0xf8] sm:$0xff]  ;;  %v1838_v29 = vld [vmem:[#allocation11 + $0x1f0] sm:$0xff]  ;;  %v1864_v8 = vld [vmem:[#allocation11 + $0x2c0] sm:$0xff] }
 0x27e   : > { %3326 = vmatprep.subr.bf16.mxu0 %v3325_v36  ;;  %3390 = vmatprep.subr.bf16.mxu1 %v3389_v38  ;;  %v1800_v36 = vld [vmem:[#allocation11 + $0xc0] sm:$0xff]  ;;  %v3473_v37 = vpack.c.bf16 %v1807_v35, %v1803_v34  ;;  %v1847_v35 = vld [vmem:[#allocation11 + $0x238] sm:$0xff] }
 0x27f   : > { %v1804_v38 = vld [vmem:[#allocation11 + $0xe0] sm:$0xff] }
 0x280   : > { %v1868_v9 = vld [vmem:[#allocation11 + $0x2e0] sm:$0xff] }
 0x281   : > { %3328 = vmatpush1.bf16.msra.mxu0 %v3327_v44  ;;  %3392 = vmatpush1.bf16.msra.mxu1 %v3391_v46  ;;  %v3411_v44 = vpack.c.bf16 %v1804_v38, %v1800_v36  ;;  %v3475_v46 = vpack.c.bf16 %v1806_v40, %v1802_v39  ;;  %v1840_v36 = vld [vmem:[#allocation11 + $0x200] sm:$0xff]  ;;  %v1842_v40 = vld [vmem:[#allocation11 + $0x210] sm:$0xff] }
 0x282   : > { %3330 = vmatprep.subr.bf16.mxu0 %v3329_v47  ;;  %3394 = vmatprep.subr.bf16.mxu1 %v3393_v49  ;;  %v3413_v47 = vpack.c.bf16 %v1813_v42, %v1809_v41  ;;  %v1812_v49 = vld [vmem:[#allocation11 + $0x120] sm:$0xff]  ;;  %v1846_v41 = vld [vmem:[#allocation11 + $0x230] sm:$0xff] }
 0x283   : > { %v3415_v57 = vpack.c.bf16 %v1812_v49, %v1808_v48  ;;  %v3495_v42 = vpack.c.bf16 %v1846_v41, %v1842_v40  ;;  %v1848_v48 = vld [vmem:[#allocation11 + $0x240] sm:$0xff]  ;;  %v1882_v40 = vld [vmem:[#allocation11 + $0x350] sm:$0xff] }
 0x284   : > { %v1852_v49 = vld [vmem:[#allocation11 + $0x260] sm:$0xff]  ;;  %v1886_v41 = vld [vmem:[#allocation11 + $0x370] sm:$0xff] }
 0x285   : > { %3332 = vmatpush1.bf16.msra.mxu0 %v3331_v52  ;;  %3396 = vmatpush1.bf16.msra.mxu1 %v3395_v53  ;;  %v1814_v52 = vld [vmem:[#allocation11 + $0x130] sm:$0xff]  ;;  %v1817_v53 = vld [vmem:[#allocation11 + $0x148] sm:$0xff] }
 0x286   : > { %3398 = vmatprep.subr.bf16.mxu0 %v3397_v58  ;;  %3462 = vmatprep.subr.bf16.mxu1 %v3461_v62  ;;  %v3479_v58 = vpack.c.bf16 %v1814_v52, %v1810_v50  ;;  %v1818_v62 = vld [vmem:[#allocation11 + $0x150] sm:$0xff] }
 0x287   : > { %v1850_v52 = vld [vmem:[#allocation11 + $0x250] sm:$0xff] }
 0x288   : > { %1675 = vmatmul.mubr.f32.vlgmr.msra.gmra.mrb[4].mxu0 %v1457_v54  ;;  %1746 = vmatmul.mubr.f32.vlgmr.msra.gmra.mrb[4].mxu1 %v1457_v54  ;;  %v1821_v54 = vld [vmem:[#allocation11 + $0x168] sm:$0xff] }
 0x289   : > { %3400 = vmatpush1.bf16.msra.mxu0 %v3399_v63  ;;  %3464 = vmatpush1.bf16.msra.mxu1 %v3463_v2  ;;  %v3417_v59 = vpack.c.bf16 %v1821_v54, %v1817_v53  ;;  %v3481_v63 = vpack.c.bf16 %v1823_v56, %v1819_v55  ;;  %v1829_v2 = vld [vmem:[#allocation11 + $0x1a8] sm:$0xff]  ;;  %v1854_v53 = vld [vmem:[#allocation11 + $0x270] sm:$0xff] }
 0x28a   : > { %3402 = vmatprep.subr.bf16.mxu0 %v3401_v6  ;;  %3466 = vmatprep.subr.bf16.mxu1 %v3465_v10  ;;  %v3483_v6 = vpack.c.bf16 %v1822_v0, %v1818_v62  ;;  %v3421_v7 = vpack.c.bf16 %v1829_v2, %v1825_v1  ;;  %v3485_v10 = vpack.c.bf16 %v1831_v4, %v1827_v3  ;;  %v1857_v55 = vld [vmem:[#allocation11 + $0x288] sm:$0xff]  ;;  %v1858_v0 = vld [vmem:[#allocation11 + $0x290] sm:$0xff] }
 0x28b   : > { %v3499_v54 = vpack.c.bf16 %v1854_v53, %v1850_v52  ;;  %v1861_v56 = vld [vmem:[#allocation11 + $0x2a8] sm:$0xff]  ;;  %v1862_v1 = vld [vmem:[#allocation11 + $0x2b0] sm:$0xff] }
 0x28c   : > { %v3503_v2 = vpack.c.bf16 %v1862_v1, %v1858_v0  ;;  %v1865_v3 = vld [vmem:[#allocation11 + $0x2c8] sm:$0xff]  ;;  %v1890_v52 = vld [vmem:[#allocation11 + $0x390] sm:$0xff] }
 0x28d   : > { %3404 = vmatpush1.bf16.msra.mxu0 %v3403_v12  ;;  %3468 = vmatpush1.bf16.msra.mxu1 %v3467_v18  ;;  %v1826_v12 = vld [vmem:[#allocation11 + $0x190] sm:$0xff]  ;;  %v1833_v18 = vld [vmem:[#allocation11 + $0x1c8] sm:$0xff] }
 0x28e   : > { %3406 = vmatprep.subr.bf16.mxu0 %v3405_v23  ;;  %3470 = vmatprep.subr.bf16.mxu1 %v3469_v24  ;;  %v3487_v17 = vpack.c.bf16 %v1830_v15, %v1826_v12  ;;  %v3425_v22 = vpack.c.bf16 %v1837_v19, %v1833_v18  ;;  %v1839_v23 = vld [vmem:[#allocation11 + $0x1f8] sm:$0xff]  ;;  %v1832_v24 = vld [vmem:[#allocation11 + $0x1c0] sm:$0xff]  ;;  %v1869_v4 = vld [vmem:[#allocation11 + $0x2e8] sm:$0xff]  ;;  %v3443_v12 = vpack.c.bf16 %v1868_v9, %v1864_v8 }
 0x28f   : > { %v3489_v26 = vpack.c.bf16 %v1839_v23, %v1835_v20  ;;  %v3427_v27 = vpack.c.bf16 %v1836_v25, %v1832_v24  ;;  %v1866_v15 = vld [vmem:[#allocation11 + $0x2d0] sm:$0xff]  ;;  %v1873_v18 = vld [vmem:[#allocation11 + $0x308] sm:$0xff]  ;;  %v1875_v20 = vld [vmem:[#allocation11 + $0x318] sm:$0xff] }
 0x290   : > { %v1877_v19 = vld [vmem:[#allocation11 + $0x328] sm:$0xff]  ;;  %v1879_v23 = vld [vmem:[#allocation11 + $0x338] sm:$0xff]  ;;  %v1872_v24 = vld [vmem:[#allocation11 + $0x300] sm:$0xff] }
 0x291   : > { %3408 = vmatpush1.bf16.msra.mxu0 %v3407_v28  ;;  %3472 = vmatpush1.bf16.msra.mxu1 %v3471_v32  ;;  %v1834_v28 = vld [vmem:[#allocation11 + $0x1d0] sm:$0xff]  ;;  %v1845_v32 = vld [vmem:[#allocation11 + $0x228] sm:$0xff]  ;;  %v1876_v25 = vld [vmem:[#allocation11 + $0x320] sm:$0xff] }
 0x292   : > { %3410 = vmatprep.subr.bf16.mxu0 %v3409_v33  ;;  %3474 = vmatprep.subr.bf16.mxu1 %v3473_v37  ;;  %v3491_v30 = vpack.c.bf16 %v1838_v29, %v1834_v28  ;;  %v1843_v33 = vld [vmem:[#allocation11 + $0x218] sm:$0xff]  ;;  %v3429_v34 = vpack.c.bf16 %v1845_v32, %v1841_v31  ;;  %v1844_v37 = vld [vmem:[#allocation11 + $0x220] sm:$0xff]  ;;  %v1874_v28 = vld [vmem:[#allocation11 + $0x310] sm:$0xff] }
 0x293   : > { %v3493_v38 = vpack.c.bf16 %v1847_v35, %v1843_v33  ;;  %v3431_v39 = vpack.c.bf16 %v1844_v37, %v1840_v36  ;;  %v1878_v29 = vld [vmem:[#allocation11 + $0x330] sm:$0xff]  ;;  %v1881_v31 = vld [vmem:[#allocation11 + $0x348] sm:$0xff]  ;;  %v1883_v33 = vld [vmem:[#allocation11 + $0x358] sm:$0xff] }
 0x294   : > { %v1885_v32 = vld [vmem:[#allocation11 + $0x368] sm:$0xff]  ;;  %v1887_v35 = vld [vmem:[#allocation11 + $0x378] sm:$0xff]  ;;  %v1880_v36 = vld [vmem:[#allocation11 + $0x340] sm:$0xff] }
 0x295   : > { %3412 = vmatpush1.bf16.msra.mxu0 %v3411_v44  ;;  %3476 = vmatpush1.bf16.msra.mxu1 %v3475_v46  ;;  %v1853_v44 = vld [vmem:[#allocation11 + $0x268] sm:$0xff]  ;;  %v1884_v37 = vld [vmem:[#allocation11 + $0x360] sm:$0xff]  ;;  %v1894_v53 = vld [vmem:[#allocation11 + $0x3b0] sm:$0xff] }
 0x296   : > { %3414 = vmatprep.subr.bf16.mxu0 %v3413_v47  ;;  %3478 = vmatprep.subr.bf16.mxu1 %v3477_v51  ;;  %v3433_v46 = vpack.c.bf16 %v1853_v44, %v1849_v43  ;;  %v1855_v47 = vld [vmem:[#allocation11 + $0x278] sm:$0xff]  ;;  %v3435_v51 = vpack.c.bf16 %v1852_v49, %v1848_v48  ;;  %v1889_v43 = vld [vmem:[#allocation11 + $0x388] sm:$0xff]  ;;  %v1888_v48 = vld [vmem:[#allocation11 + $0x380] sm:$0xff] }
 0x297   : > { %v3497_v50 = vpack.c.bf16 %v1855_v47, %v1851_v45  ;;  %v1893_v44 = vld [vmem:[#allocation11 + $0x3a8] sm:$0xff]  ;;  %v1891_v45 = vld [vmem:[#allocation11 + $0x398] sm:$0xff]  ;;  %v1892_v49 = vld [vmem:[#allocation11 + $0x3a0] sm:$0xff] }
 0x298   : > { %v1895_v47 = vld [vmem:[#allocation11 + $0x3b8] sm:$0xff]  ;;  %v1898_v0 = vld [vmem:[#allocation11 + $0x3d0] sm:$0xff] }
 0x299   : > { %3416 = vmatpush1.bf16.msra.mxu0 %v3415_v57  ;;  %3480 = vmatpush1.bf16.msra.mxu1 %v3479_v58  ;;  %v1859_v57 = vld [vmem:[#allocation11 + $0x298] sm:$0xff]  ;;  %v3437_v58 = vpack.c.bf16 %v1861_v56, %v1857_v55  ;;  %v1897_v55 = vld [vmem:[#allocation11 + $0x3c8] sm:$0xff]  ;;  %v1902_v1 = vld [vmem:[#allocation11 + $0x3f0] sm:$0xff] }
 0x29a   : > { %3418 = vmatprep.subr.bf16.mxu0 %v3417_v59  ;;  %3482 = vmatprep.subr.bf16.mxu1 %v3481_v63  ;;  %v1863_v59 = vld [vmem:[#allocation11 + $0x2b8] sm:$0xff]  ;;  %v3439_v63 = vpack.c.bf16 %v1860_v61, %v1856_v60  ;;  %v1901_v56 = vld [vmem:[#allocation11 + $0x3e8] sm:$0xff]  ;;  %v1896_v60 = vld [vmem:[#allocation11 + $0x3c0] sm:$0xff] }
 0x29b   : > { %v3501_v62 = vpack.c.bf16 %v1863_v59, %v1859_v57  ;;  %v1899_v57 = vld [vmem:[#allocation11 + $0x3d8] sm:$0xff]  ;;  %v1900_v61 = vld [vmem:[#allocation11 + $0x3e0] sm:$0xff] }
 0x29c   : > { %v1903_v59 = vld [vmem:[#allocation11 + $0x3f8] sm:$0xff] }
 0x29d   : > { %3420 = vmatpush1.bf16.msra.mxu0 %v3419_v5  ;;  %3484 = vmatpush1.bf16.msra.mxu1 %v3483_v6  ;;  %v1867_v5 = vld [vmem:[#allocation11 + $0x2d8] sm:$0xff]  ;;  %v3441_v6 = vpack.c.bf16 %v1869_v4, %v1865_v3  ;;  %v1271_v4 = vld [vmem:[%s5277_s9] sm:$0xf] }
 0x29e   : > { %3422 = vmatprep.subr.bf16.mxu0 %v3421_v7  ;;  %3486 = vmatprep.subr.bf16.mxu1 %v3485_v10  ;;  %v1871_v7 = vld [vmem:[#allocation11 + $0x2f8] sm:$0xff] }
 0x29f   : > { %v3505_v10 = vpack.c.bf16 %v1871_v7, %v1867_v5  ;;  %v2941_v3 = vld [vmem:[%s5275_s7 + $0x8] sm:$0xff]  ;;  %v1276_v5 = vrot.slane %v1271_v4, %v4756_v11 }
 0x2a0   : > { %1990 = vmatprep.mubr.f32.mxu0 %v2941_v3  ;;  %2061 = vmatprep.mubr.f32.mxu1 %v2941_v3 }
 0x2a1   : > { %3424 = vmatpush1.bf16.msra.mxu0 %v3423_v16  ;;  %3488 = vmatpush1.bf16.msra.mxu1 %v3487_v17  ;;  %v1870_v16 = vld [vmem:[#allocation11 + $0x2f0] sm:$0xff] }
 0x2a2   : > { %3426 = vmatprep.subr.bf16.mxu0 %v3425_v22  ;;  %3490 = vmatprep.subr.bf16.mxu1 %v3489_v26  ;;  %v3507_v17 = vpack.c.bf16 %v1870_v16, %v1866_v15  ;;  %v3445_v22 = vpack.c.bf16 %v1877_v19, %v1873_v18  ;;  %v3509_v26 = vpack.c.bf16 %v1879_v23, %v1875_v20 }
 0x2a3   : > { %v1288_v20 = vrot.slane %v1271_v4, %v4768_v21 }
 0x2a5   : > { %3428 = vmatpush1.bf16.msra.mxu0 %v3427_v27  ;;  %3492 = vmatpush1.bf16.msra.mxu1 %v3491_v30  ;;  %v3447_v27 = vpack.c.bf16 %v1876_v25, %v1872_v24  ;;  %v3511_v30 = vpack.c.bf16 %v1878_v29, %v1874_v28  ;;  %v2940_v29 = vld [vmem:[%s5274_s3 + $0x8] sm:$0xff] }
 0x2a6   : > { %3430 = vmatprep.subr.bf16.mxu0 %v3429_v34  ;;  %3494 = vmatprep.subr.bf16.mxu1 %v3493_v38  ;;  %v3449_v34 = vpack.c.bf16 %v1885_v32, %v1881_v31  ;;  %v3513_v38 = vpack.c.bf16 %v1887_v35, %v1883_v33 }
 0x2a9   : > { %3432 = vmatpush1.bf16.msra.mxu0 %v3431_v39  ;;  %3496 = vmatpush1.bf16.msra.mxu1 %v3495_v42  ;;  %v3451_v39 = vpack.c.bf16 %v1884_v37, %v1880_v36  ;;  %v3515_v42 = vpack.c.bf16 %v1886_v41, %v1882_v40  ;;  %v1588_v40 = vld [vmem:[#allocation9] sm:$0xf] }
 0x2aa   : > { %3434 = vmatprep.subr.bf16.mxu0 %v3433_v46  ;;  %3498 = vmatprep.subr.bf16.mxu1 %v3497_v50  ;;  %v3453_v46 = vpack.c.bf16 %v1893_v44, %v1889_v43  ;;  %v3517_v50 = vpack.c.bf16 %v1895_v47, %v1891_v45  ;;  %v1593_v41 = vrot.slane %v1588_v40, %v4756_v11 }
 0x2ab   : > { %v1601_v43 = vrot.slane %v1588_v40, %v4763_v14 }
 0x2ad   : > { %3436 = vmatpush1.bf16.msra.mxu0 %v3435_v51  ;;  %3500 = vmatpush1.bf16.msra.mxu1 %v3499_v54  ;;  %v3455_v51 = vpack.c.bf16 %v1892_v49, %v1888_v48  ;;  %v3519_v54 = vpack.c.bf16 %v1894_v53, %v1890_v52  ;;  %v1605_v53 = vrot.slane %v1588_v40, %v4768_v21 }
 0x2ae   : > { %3438 = vmatprep.subr.bf16.mxu0 %v3437_v58  ;;  %3502 = vmatprep.subr.bf16.mxu1 %v3501_v62  ;;  %v3457_v58 = vpack.c.bf16 %v1901_v56, %v1897_v55  ;;  %v3521_v62 = vpack.c.bf16 %v1903_v59, %v1899_v57 }
 0x2b1   : > { %3440 = vmatpush1.bf16.msra.mxu0 %v3439_v63  ;;  %3504 = vmatpush1.bf16.msra.mxu1 %v3503_v2  ;;  %v3459_v63 = vpack.c.bf16 %v1900_v61, %v1896_v60  ;;  %v3523_v2 = vpack.c.bf16 %v1902_v1, %v1898_v0 }
 0x2b2   : > { %3442 = vmatprep.subr.bf16.mxu0 %v3441_v6  ;;  %3506 = vmatprep.subr.bf16.mxu1 %v3505_v10  ;;  %v1280_v6 = vrot.slane %v1271_v4, %v4761_v13  ;;  %v1284_v10 = vrot.slane %v1271_v4, %v4763_v14 }
 0x2b5   : > { %3444 = vmatpush1.bf16.msra.mxu0 %v3443_v12  ;;  %3508 = vmatpush1.bf16.msra.mxu1 %v3507_v17 }
 0x2b6   : > { %3446 = vmatprep.subr.bf16.mxu0 %v3445_v22  ;;  %3510 = vmatprep.subr.bf16.mxu1 %v3509_v26 }
 0x2b9   : > { %3448 = vmatpush1.bf16.msra.mxu0 %v3447_v27  ;;  %3512 = vmatpush1.bf16.msra.mxu1 %v3511_v30 }
 0x2ba   : > { %3450 = vmatprep.subr.bf16.mxu0 %v3449_v34  ;;  %3514 = vmatprep.subr.bf16.mxu1 %v3513_v38 }
 0x2bd   : > { %3452 = vmatpush1.bf16.msra.mxu0 %v3451_v39  ;;  %3516 = vmatpush1.bf16.msra.mxu1 %v3515_v42  ;;  %v1597_v42 = vrot.slane %v1588_v40, %v4761_v13 }
 0x2be   : > { %3454 = vmatprep.subr.bf16.mxu0 %v3453_v46  ;;  %3518 = vmatprep.subr.bf16.mxu1 %v3517_v50 }
 0x2c1   : > { %3456 = vmatpush1.bf16.msra.mxu0 %v3455_v51  ;;  %3520 = vmatpush1.bf16.msra.mxu1 %v3519_v54 }
 0x2c2   : > { %3458 = vmatprep.subr.bf16.mxu0 %v3457_v58  ;;  %3522 = vmatprep.subr.bf16.mxu1 %v3521_v62  ;;  %v1459_v62 = vld [vmem:[%s5278_s23] sm:$0xff] }
 0x2c5   : > { %3460 = vmatpush1.bf16.msra.mxu0 %v3459_v63  ;;  %3524 = vmatpush1.bf16.msra.mxu1 %v3523_v2 }
 0x31b   : > { %v1359_v7 = vpop.f32.mrb[2].mxu0  ;;  %v1430_v8 = vpop.f32.mrb[2].mxu1 }
 0x31c   : > { %v1360_v9 = vadd.f32 %v1359_v7, %v1276_v5  ;;  %v1361_v12 = vpop.f32.mrb[3].mxu0  ;;  %v1432_v15 = vpop.f32.mrb[3].mxu1  ;;  %v1431_v19 = vadd.f32 %v1430_v8, %v1284_v10  ;;  %v2092_v8 = vld [vmem:[%s5279_s18] sm:$0xff] }
 0x31d   : > { %v1362_v16 = vadd.f32 %v1361_v12, %v1280_v6  ;;  %v1433_v22 = vadd.f32 %v1432_v15, %v1288_v20  ;;  %v4306_v12 = vmov 0.0|0.0   ;;  %v2094_v15 = vld [vmem:[%s5279_s18 + $0x10] sm:$0xff] }
 0x31e   : > { %v1435_v17 = vmul.f32 0.5, %v1360_v9  ;;  %v2093_v9 = vld [vmem:[%s5279_s18 + $0x8] sm:$0xff]  ;;  %3525 = vmatprep.subr.bf16.mxu0 %v4306_v12 }
 0x31f   : > { %v1439_v18 = vmul.f32 0.5, %v1362_v16  ;;  %v1444_v23 = vmul.f32 0.5, %v1433_v22  ;;  %v3526_v10 = vpack.c.bf16 %v2093_v9, %v2092_v8  ;;  %v2095_v16 = vld [vmem:[%s5279_s18 + $0x18] sm:$0xff]  ;;  %v2098_v22 = vld [vmem:[%s5279_s18 + $0x30] sm:$0xff] }
 0x320   : > { %3840 = vtanh.f32 %v1435_v17  ;;  %v3529_v17 = vpack.c.bf16 %v2095_v16, %v2094_v15 }
 0x321   : > { %3842 = vtanh.f32 %v1439_v18  ;;  %v2096_v18 = vld [vmem:[%s5279_s18 + $0x20] sm:$0xff] }
 0x322   : > { %3844 = vtanh.f32 %v1431_v19  ;;  %v2097_v19 = vld [vmem:[%s5279_s18 + $0x28] sm:$0xff] }
 0x323   : > { %3846 = vtanh.f32 %v1444_v23  ;;  %v3532_v20 = vpack.c.bf16 %v2097_v19, %v2096_v18  ;;  %v2099_v23 = vld [vmem:[%s5279_s18 + $0x38] sm:$0xff] }
 0x32a   : > { %v3841_v24 = vpop.eup %3840 }
 0x32b   : > { %v3843_v25 = vpop.eup %3842  ;;  %v1437_v26 = vadd.f32 1.0, %v3841_v24  ;;  %v3535_v24 = vpack.c.bf16 %v2099_v23, %v2098_v22 }
 0x32c   : > { %v1441_v27 = vadd.f32 1.0, %v3843_v25  ;;  %v3845_v30 = vpop.eup %3844  ;;  %v2100_v25 = vld [vmem:[%s5279_s18 + $0x40] sm:$0xff] }
 0x32d   : > { %v1438_v28 = vmul.f32 0.5, %v1437_v26  ;;  %v3847_v35 = vpop.eup %3846  ;;  %v2101_v26 = vld [vmem:[%s5279_s18 + $0x48] sm:$0xff] }
 0x32e   : > { %v1442_v31 = vmul.f32 0.5, %v1441_v27  ;;  %v1446_v36 = vadd.f32 1.0, %v3847_v35  ;;  %v3538_v27 = vpack.c.bf16 %v2101_v26, %v2100_v25  ;;  %v2107_v35 = vld [vmem:[%s5279_s18 + $0x78] sm:$0xff] }
 0x32f   : > { %v1449_v32 = vmul.f32 %v3845_v30, %v1438_v28  ;;  %v2102_v28 = vld [vmem:[%s5279_s18 + $0x50] sm:$0xff] }
 0x330   : > { %v1448_v33 = vmul.f32 %v2940_v29, %v1442_v31  ;;  %v1447_v37 = vmul.f32 0.5, %v1446_v36  ;;  %v2103_v29 = vld [vmem:[%s5279_s18 + $0x58] sm:$0xff]  ;;  %v2104_v31 = vld [vmem:[%s5279_s18 + $0x60] sm:$0xff] }
 0x331   : > { %v3541_v30 = vpack.c.bf16 %v2103_v29, %v2102_v28 }
 0x332   : > { %v1450_v34 = vadd.f32 %v1449_v32, %v1448_v33  ;;  %v2105_v32 = vld [vmem:[%s5279_s18 + $0x68] sm:$0xff] }
 0x333   : > { %v3544_v33 = vpack.c.bf16 %v2105_v32, %v2104_v31 }
 0x334   : > { %3848 = vtanh.f32 %v1450_v34  ;;  %1454 = vst [vmem:[#allocation19 + $0x8] sm:$0xff] %v1450_v34  ;;  %v2106_v34 = vld [vmem:[%s5279_s18 + $0x70] sm:$0xff] }
 0x335   : > { %v3547_v36 = vpack.c.bf16 %v2107_v35, %v2106_v34 }
 0x33e   : > { %v3849_v38 = vpop.eup %3848 }
 0x33f   : > { %v4793_v39 = vmul.f32 %v3849_v38, %v1447_v37  ;;  %v4308_v37 = vmov 0.0   ;;  %v1904_v38 = vld [vmem:[#allocation12] sm:$0xf] }
 0x340   : > { %v1909_v40 = vrot.slane %v1904_v38, %v4756_v11 }
 0x341   : > { %1456 = vst [vmem:[#allocation18 + $0x8] sm:$0xff] %v4793_v39 }
 0x35b   : > { %v1676_v44 = vpop.f32.mrb[4].mxu0  ;;  %v1747_v45 = vpop.f32.mrb[4].mxu1 }
 0x35c   : > { %v1677_v46 = vadd.f32 %v1676_v44, %v1593_v41  ;;  %v1678_v47 = vpop.f32.mrb[5].mxu0  ;;  %v1749_v48 = vpop.f32.mrb[5].mxu1  ;;  %v1748_v51 = vadd.f32 %v1747_v45, %v1601_v43  ;;  %v1913_v41 = vrot.slane %v1904_v38, %v4761_v13  ;;  %v1917_v45 = vrot.slane %v1904_v38, %v4763_v14  ;;  %v2942_v14 = vld [vmem:[%s5278_s23 + $0x8] sm:$0xff] }
 0x35d   : > { %v1679_v49 = vadd.f32 %v1678_v47, %v1597_v42  ;;  %v1750_v54 = vadd.f32 %v1749_v48, %v1605_v53 }
 0x35e   : > { %v1752_v50 = vmul.f32 0.5, %v1677_v46 }
 0x35f   : > { %v1756_v52 = vmul.f32 0.5, %v1679_v49  ;;  %v1761_v55 = vmul.f32 0.5, %v1750_v54 }
 0x360   : > { %3850 = vtanh.f32 %v1752_v50 }
 0x361   : > { %3852 = vtanh.f32 %v1756_v52  ;;  %v1921_v52 = vrot.slane %v1904_v38, %v4768_v21 }
 0x362   : > { %3854 = vtanh.f32 %v1748_v51 }
 0x363   : > { %3856 = vtanh.f32 %v1761_v55 }
 0x36a   : > { %v3851_v56 = vpop.eup %3850 }
 0x36b   : > { %v3853_v57 = vpop.eup %3852  ;;  %v1754_v58 = vadd.f32 1.0, %v3851_v56 }
 0x36c   : > { %v3855_v59 = vpop.eup %3854  ;;  %v1758_v60 = vadd.f32 1.0, %v3853_v57 }
 0x36d   : > { %v1755_v61 = vmul.f32 0.5, %v1754_v58  ;;  %v3857_v3 = vpop.eup %3856 }
 0x36e   : > { %v1759_v63 = vmul.f32 0.5, %v1758_v60  ;;  %v1763_v4 = vadd.f32 1.0, %v3857_v3 }
 0x36f   : > { %v1766_v0 = vmul.f32 %v3855_v59, %v1755_v61 }
 0x370   : > { %v1765_v1 = vmul.f32 %v1759_v63, %v1459_v62  ;;  %v1764_v5 = vmul.f32 0.5, %v1763_v4  ;;  %v2943_v4 = vld [vmem:[%s5280_s2] ss:$0 sm:$0xff] }
 0x372   : > { %v1767_v2 = vadd.f32 %v1766_v0, %v1765_v1 }
 0x374   : > { %3858 = vtanh.f32 %v1767_v2  ;;  %1770 = vst [vmem:[#allocation22] sm:$0xff] %v1767_v2 }
 0x37e   : > { %v3859_v6 = vpop.eup %3858 }
 0x37f   : > { %v1769_v7 = vmul.f32 %v3859_v6, %v1764_v5 }
 0x381   : > { %1771 = vst [vmem:[#allocation21] sm:$0xff] %v1769_v7  ;;  %1991 = vmatmul.mubr.f32.vlgmr.msra.gmra.mrb[6].mxu0 %v1769_v7  ;;  %2062 = vmatmul.mubr.f32.vlgmr.msra.gmra.mrb[6].mxu1 %v1769_v7 }
 0x382   : > { %3527 = vmatpush3.bf16.msra.mxu0 %v3526_v10  ;;  %3010 = vmatprep.mubr.msk.f32.mxu0 %vm4307_vm0, %v4308_v37 }
 0x383   : > { %3528 = vmatprep.subr.bf16.mxu0 %v4306_v12 }
 0x386   : > { %3530 = vmatpush3.bf16.msra.mxu0 %v3529_v17 }
 0x387   : > { %3531 = vmatprep.subr.bf16.mxu0 %v4306_v12 }
 0x38a   : > { %3533 = vmatpush3.bf16.msra.mxu0 %v3532_v20 }
 0x38b   : > { %3534 = vmatprep.subr.bf16.mxu0 %v4306_v12 }
 0x38e   : > { %3536 = vmatpush3.bf16.msra.mxu0 %v3535_v24 }
 0x38f   : > { %3537 = vmatprep.subr.bf16.mxu0 %v4306_v12 }
 0x392   : > { %3539 = vmatpush3.bf16.msra.mxu0 %v3538_v27 }
 0x393   : > { %3540 = vmatprep.subr.bf16.mxu0 %v4306_v12 }
 0x396   : > { %3542 = vmatpush3.bf16.msra.mxu0 %v3541_v30 }
 0x397   : > { %3543 = vmatprep.subr.bf16.mxu0 %v4306_v12 }
 0x39a   : > { %3545 = vmatpush3.bf16.msra.mxu0 %v3544_v33 }
 0x39b   : > { %3546 = vmatprep.subr.bf16.mxu0 %v4306_v12 }
 0x39e   : > { %3548 = vmatpush3.bf16.msra.mxu0 %v3547_v36 }
 0x454   : > { %v1992_v42 = vpop.f32.mrb[6].mxu0  ;;  %v2063_v43 = vpop.f32.mrb[6].mxu1 }
 0x455   : > { %v1993_v44 = vadd.f32 %v1992_v42, %v1909_v40  ;;  %v1994_v46 = vpop.f32.mrb[7].mxu0  ;;  %v2065_v47 = vpop.f32.mrb[7].mxu1  ;;  %v2064_v51 = vadd.f32 %v2063_v43, %v1917_v45 }
 0x456   : > { %v1995_v48 = vadd.f32 %v1994_v46, %v1913_v41  ;;  %v2066_v53 = vadd.f32 %v2065_v47, %v1921_v52 }
 0x457   : > { %v2068_v49 = vmul.f32 0.5, %v1993_v44 }
 0x458   : > { %v2072_v50 = vmul.f32 0.5, %v1995_v48  ;;  %v2077_v11 = vmul.f32 0.5, %v2066_v53 }
 0x459   : > { %3860 = vtanh.f32 %v2068_v49 }
 0x45a   : > { %3862 = vtanh.f32 %v2072_v50 }
 0x45b   : > { %3864 = vtanh.f32 %v2064_v51 }
 0x45c   : > { %3866 = vtanh.f32 %v2077_v11 }
 0x463   : > { %v3861_v54 = vpop.eup %3860 }
 0x464   : > { %v3863_v13 = vpop.eup %3862  ;;  %v2070_v55 = vadd.f32 1.0, %v3861_v54 }
 0x465   : > { %v2074_v56 = vadd.f32 1.0, %v3863_v13  ;;  %v3865_v58 = vpop.eup %3864 }
 0x466   : > { %v2071_v57 = vmul.f32 0.5, %v2070_v55  ;;  %v3867_v21 = vpop.eup %3866 }
 0x467   : > { %v2075_v59 = vmul.f32 0.5, %v2074_v56  ;;  %v2079_v63 = vadd.f32 1.0, %v3867_v21 }
 0x468   : > { %v2082_v60 = vmul.f32 %v3865_v58, %v2071_v57 }
 0x469   : > { %v2081_v61 = vmul.f32 %v2942_v14, %v2075_v59  ;;  %v2080_v0 = vmul.f32 0.5, %v2079_v63 }
 0x46b   : > { %v2083_v62 = vadd.f32 %v2082_v60, %v2081_v61 }
 0x46d   : > { %3868 = vtanh.f32 %v2083_v62  ;;  %2087 = vst [vmem:[#allocation22 + $0x8] sm:$0xff] %v2083_v62 }
 0x477   : > { %v3869_v1 = vpop.eup %3868 }
 0x478   : > { %v2085_v2 = vmul.f32 %v3869_v1, %v2080_v0 }
 0x47a   : > { %2089 = vst [vmem:[#allocation21 + $0x8] sm:$0xff] %v2085_v2  ;;  %v2090_v3 = vadd.f32 %v2085_v2, %v4793_v39  ;;  %3011 = vmatmul.mubr.f32.vlgmr.msra.gmra.mrb[8].mxu0 %v2085_v2 }
 0x47c   : > { %2091 = vst [vmem:[#allocation2] sm:$0xff] %v2090_v3 }
 0x54d   : > { %v2181_v5 = vpop.f32.mrb[8].mxu0 }
 0x54e   : > { %v2182_v6 = vadd.f32 %v2943_v4, %v2181_v5  ;;  %v3012_v7 = vpop.f32.mrb[9].mxu0 }
 0x550   : > { %2185 = vst [vmem:[#allocation16] sm:$0xff] %v2182_v6 }
 0x551 PF: > { %v2188_v39 = vld [vmem:[%s4729_s27 + $0x8] sm:$0xff]  ;;  %v2190_v9 = vld [vmem:[%s4729_s27 + $0x18] sm:$0xff]  ;;  %v2187_v15 = vld [vmem:[%s4729_s27] sm:$0xff]  ;;  %v4309_v17 = vmov 0.0   ;;  %s4310_s3 = smov [#allocation16]   ;;  %s4311_s7 = smov [#allocation19]  }
 0x552   : > { %v2196_v8 = vld [vmem:[%s4729_s27 + $0x48] sm:$0xff]  ;;  %v2198_v12 = vld [vmem:[%s4729_s27 + $0x58] sm:$0xff]  ;;  %v2195_v16 = vld [vmem:[%s4729_s27 + $0x40] sm:$0xff]  ;;  %2421 = vmatprep.mubr.f32.mxu0 %v4309_v17  ;;  %2492 = vmatprep.mubr.f32.mxu1 %v4309_v17  ;;  %s2675_s5 = sshll.u32 %s4310_s3, 4  ;;  %s2698_s0 = sshll.u32 %s4311_s7, 4  ;;  %s2676_s5 = int_to_ptr.vmem [resolvable:$true] %s2675_s5  ;;  %s2699_s0 = int_to_ptr.vmem [resolvable:$true] %s2698_s0 }
 0x553   : > { %v3549_v10 = vpack.c.bf16 %v2196_v8, %v2188_v39  ;;  %v3581_v18 = vpack.c.bf16 %v2198_v12, %v2190_v9  ;;  %v3551_v19 = vpack.c.bf16 %v2195_v16, %v2187_v15  ;;  %v2189_v20 = vld [vmem:[%s4729_s27 + $0x10] sm:$0xff]  ;;  %v2204_v23 = vld [vmem:[%s4729_s27 + $0x88] sm:$0xff]  ;;  %v2206_v26 = vld [vmem:[%s4729_s27 + $0x98] sm:$0xff]  ;;  %s4068_s20 = scalar_lea.vmem %s2676_s5, 128  ;;  %p5281_p0 = scmp.eq.s32.totalorder %s4459_s26, 1 }
 0x554   : > { %v2197_v22 = vld [vmem:[%s4729_s27 + $0x50] sm:$0xff]  ;;  %v2212_v25 = vld [vmem:[%s4729_s27 + $0xc8] sm:$0xff]  ;;  %v2214_v27 = vld [vmem:[%s4729_s27 + $0xd8] sm:$0xff]  ;;  %p4069_p2 = scmp.ne.s32.totalorder %s2676_s5, %s4068_s20  ;;  %p4075_p9 = scmp.lt.s32.totalorder %s2676_s5, %s2676_s5 }
 0x555   : > { %3550 = vmatprep.subr.bf16.mxu0 %v3549_v10  ;;  %v3583_v24 = vpack.c.bf16 %v2197_v22, %v2189_v20  ;;  %3582 = vmatprep.subr.bf16.mxu1 %v3581_v18  ;;  %v3553_v28 = vpack.c.bf16 %v2212_v25, %v2204_v23  ;;  %v3585_v29 = vpack.c.bf16 %v2214_v27, %v2206_v26  ;;  %v2203_v30 = vld [vmem:[%s4729_s27 + $0x80] sm:$0xff]  ;;  %v2205_v32 = vld [vmem:[%s4729_s27 + $0x90] sm:$0xff]  ;;  %v2220_v35 = vld [vmem:[%s4729_s27 + $0x108] sm:$0xff]  ;;  %p4076_p4 = scmp.lt.s32.totalorder %s4068_s20, %s4068_s20 }
 0x556   : > { %3552 = vmatpush1.bf16.msra.mxu0 %v3551_v19  ;;  %v2211_v31 = vld [vmem:[%s4729_s27 + $0xc0] sm:$0xff]  ;;  %v2213_v34 = vld [vmem:[%s4729_s27 + $0xd0] sm:$0xff]  ;;  %v2228_v36 = vld [vmem:[%s4729_s27 + $0x148] sm:$0xff]  ;;  %p4070_p7 = pnand %p4069_p2, %p5281_p0 }
 0x557   : > { %3584 = vmatpush1.bf16.msra.mxu1 %v3583_v24  ;;  %v3555_v33 = vpack.c.bf16 %v2211_v31, %v2203_v30  ;;  %3554 = vmatprep.subr.bf16.mxu0 %v3553_v28  ;;  %v3587_v37 = vpack.c.bf16 %v2213_v34, %v2205_v32  ;;  %v3557_v38 = vpack.c.bf16 %v2228_v36, %v2220_v35  ;;  %v2222_v40 = vld [vmem:[%s4729_s27 + $0x118] sm:$0xff]  ;;  %v2219_v42 = vld [vmem:[%s4729_s27 + $0x100] sm:$0xff]  ;;  %v2221_v45 = vld [vmem:[%s4729_s27 + $0x110] sm:$0xff]  ;;  %p4077_p3 = por %p4076_p4, %p4075_p9 }
 0x558   : > { %3586 = vmatprep.subr.bf16.mxu1 %v3585_v29  ;;  %v2230_v41 = vld [vmem:[%s4729_s27 + $0x158] sm:$0xff]  ;;  %v2227_v44 = vld [vmem:[%s4729_s27 + $0x140] sm:$0xff]  ;;  %v2229_v46 = vld [vmem:[%s4729_s27 + $0x150] sm:$0xff]  ;;  %p4071_p6 = pneg %p4070_p7 }
 0x559   : > { %v3589_v43 = vpack.c.bf16 %v2230_v41, %v2222_v40  ;;  %v3559_v47 = vpack.c.bf16 %v2227_v44, %v2219_v42  ;;  %v2236_v48 = vld [vmem:[%s4729_s27 + $0x188] sm:$0xff]  ;;  %v2238_v50 = vld [vmem:[%s4729_s27 + $0x198] sm:$0xff]  ;;  %v3591_v51 = vpack.c.bf16 %v2229_v46, %v2221_v45  ;;  %v2235_v11 = vld [vmem:[%s4729_s27 + $0x180] sm:$0xff] }
 0x55a   : > { %3556 = vmatpush1.bf16.msra.mxu0 %v3555_v33  ;;  %v2244_v49 = vld [vmem:[%s4729_s27 + $0x1c8] sm:$0xff]  ;;  %v2246_v53 = vld [vmem:[%s4729_s27 + $0x1d8] sm:$0xff]  ;;  %v2243_v54 = vld [vmem:[%s4729_s27 + $0x1c0] sm:$0xff]  ;;  %p4078_p5 = pnand %p4077_p3, %p4071_p6 }
 0x55b   : > { %3588 = vmatpush1.bf16.msra.mxu1 %v3587_v37  ;;  %3558 = vmatprep.subr.bf16.mxu0 %v3557_v38  ;;  %v3561_v52 = vpack.c.bf16 %v2244_v49, %v2236_v48  ;;  %v3593_v13 = vpack.c.bf16 %v2246_v53, %v2238_v50  ;;  %v2237_v55 = vld [vmem:[%s4729_s27 + $0x190] sm:$0xff]  ;;  %v2252_v57 = vld [vmem:[%s4729_s27 + $0x208] sm:$0xff]  ;;  %v2254_v58 = vld [vmem:[%s4729_s27 + $0x218] sm:$0xff]  ;;  %v3563_v60 = vpack.c.bf16 %v2243_v54, %v2235_v11 }
 0x55c   : > { %3590 = vmatprep.subr.bf16.mxu1 %v3589_v43  ;;  %v2245_v56 = vld [vmem:[%s4729_s27 + $0x1d0] sm:$0xff]  ;;  %v2260_v14 = vld [vmem:[%s4729_s27 + $0x248] sm:$0xff]  ;;  %v2262_v59 = vld [vmem:[%s4729_s27 + $0x258] sm:$0xff] }
 0x55d   : > { %v3595_v61 = vpack.c.bf16 %v2245_v56, %v2237_v55  ;;  %v3565_v62 = vpack.c.bf16 %v2260_v14, %v2252_v57  ;;  %v2251_v21 = vld [vmem:[%s4729_s27 + $0x200] sm:$0xff]  ;;  %v2253_v0 = vld [vmem:[%s4729_s27 + $0x210] sm:$0xff]  ;;  %v3597_v1 = vpack.c.bf16 %v2262_v59, %v2254_v58  ;;  %v2268_v3 = vld [vmem:[%s4729_s27 + $0x288] sm:$0xff] }
 0x55e   : > { %3560 = vmatpush1.bf16.msra.mxu0 %v3559_v47  ;;  %v2259_v63 = vld [vmem:[%s4729_s27 + $0x240] sm:$0xff]  ;;  %v2261_v2 = vld [vmem:[%s4729_s27 + $0x250] sm:$0xff]  ;;  %v2276_v4 = vld [vmem:[%s4729_s27 + $0x2c8] sm:$0xff] }
 0x55f   : > { %3592 = vmatpush1.bf16.msra.mxu1 %v3591_v51  ;;  %3562 = vmatprep.subr.bf16.mxu0 %v3561_v52  ;;  %v2270_v5 = vld [vmem:[%s4729_s27 + $0x298] sm:$0xff]  ;;  %v3567_v7 = vpack.c.bf16 %v2259_v63, %v2251_v21  ;;  %v3599_v39 = vpack.c.bf16 %v2261_v2, %v2253_v0  ;;  %v3569_v8 = vpack.c.bf16 %v2276_v4, %v2268_v3  ;;  %v2267_v9 = vld [vmem:[%s4729_s27 + $0x280] sm:$0xff]  ;;  %v2269_v12 = vld [vmem:[%s4729_s27 + $0x290] sm:$0xff] }
 0x560   : > { %3594 = vmatprep.subr.bf16.mxu1 %v3593_v13  ;;  %v2278_v6 = vld [vmem:[%s4729_s27 + $0x2d8] sm:$0xff]  ;;  %v2275_v10 = vld [vmem:[%s4729_s27 + $0x2c0] sm:$0xff]  ;;  %v2277_v16 = vld [vmem:[%s4729_s27 + $0x2d0] sm:$0xff] }
 0x561   : > { %v3601_v15 = vpack.c.bf16 %v2278_v6, %v2270_v5  ;;  %v2284_v18 = vld [vmem:[%s4729_s27 + $0x308] sm:$0xff]  ;;  %v2286_v20 = vld [vmem:[%s4729_s27 + $0x318] sm:$0xff]  ;;  %v3571_v23 = vpack.c.bf16 %v2275_v10, %v2267_v9  ;;  %v3603_v24 = vpack.c.bf16 %v2277_v16, %v2269_v12  ;;  %v2283_v26 = vld [vmem:[%s4729_s27 + $0x300] sm:$0xff] }
 0x562   : > { %3564 = vmatpush1.bf16.msra.mxu0 %v3563_v60  ;;  %v2292_v19 = vld [vmem:[%s4729_s27 + $0x348] sm:$0xff]  ;;  %v2294_v22 = vld [vmem:[%s4729_s27 + $0x358] sm:$0xff]  ;;  %v2291_v27 = vld [vmem:[%s4729_s27 + $0x340] sm:$0xff] }
 0x563   : > { %3596 = vmatpush1.bf16.msra.mxu1 %v3595_v61  ;;  %3566 = vmatprep.subr.bf16.mxu0 %v3565_v62  ;;  %v3573_v25 = vpack.c.bf16 %v2292_v19, %v2284_v18  ;;  %v2285_v28 = vld [vmem:[%s4729_s27 + $0x310] sm:$0xff]  ;;  %v3605_v29 = vpack.c.bf16 %v2294_v22, %v2286_v20  ;;  %v2300_v31 = vld [vmem:[%s4729_s27 + $0x388] sm:$0xff]  ;;  %v2302_v33 = vld [vmem:[%s4729_s27 + $0x398] sm:$0xff]  ;;  %v3575_v35 = vpack.c.bf16 %v2291_v27, %v2283_v26 }
 0x564   : > { %3598 = vmatprep.subr.bf16.mxu1 %v3597_v1  ;;  %v2293_v30 = vld [vmem:[%s4729_s27 + $0x350] sm:$0xff]  ;;  %v2308_v32 = vld [vmem:[%s4729_s27 + $0x3c8] sm:$0xff]  ;;  %v2310_v34 = vld [vmem:[%s4729_s27 + $0x3d8] sm:$0xff] }
 0x565   : > { %v3607_v36 = vpack.c.bf16 %v2293_v30, %v2285_v28  ;;  %v3577_v37 = vpack.c.bf16 %v2308_v32, %v2300_v31  ;;  %v2299_v38 = vld [vmem:[%s4729_s27 + $0x380] sm:$0xff]  ;;  %v2301_v41 = vld [vmem:[%s4729_s27 + $0x390] sm:$0xff]  ;;  %v3609_v42 = vpack.c.bf16 %v2310_v34, %v2302_v33  ;;  %v2192_v44 = vld [vmem:[%s4729_s27 + $0x28] sm:$0xff] }
 0x566   : > { %3568 = vmatpush1.bf16.msra.mxu0 %v3567_v7  ;;  %v2307_v40 = vld [vmem:[%s4729_s27 + $0x3c0] sm:$0xff]  ;;  %v2309_v43 = vld [vmem:[%s4729_s27 + $0x3d0] sm:$0xff]  ;;  %v2200_v45 = vld [vmem:[%s4729_s27 + $0x68] sm:$0xff] }
 0x567   : > { %3600 = vmatpush1.bf16.msra.mxu1 %v3599_v39  ;;  %3570 = vmatprep.subr.bf16.mxu0 %v3569_v8  ;;  %v2194_v46 = vld [vmem:[%s4729_s27 + $0x38] sm:$0xff]  ;;  %v3579_v48 = vpack.c.bf16 %v2307_v40, %v2299_v38  ;;  %v3611_v49 = vpack.c.bf16 %v2309_v43, %v2301_v41  ;;  %v3613_v50 = vpack.c.bf16 %v2200_v45, %v2192_v44  ;;  %v2191_v51 = vld [vmem:[%s4729_s27 + $0x20] sm:$0xff]  ;;  %v2193_v53 = vld [vmem:[%s4729_s27 + $0x30] sm:$0xff] }
 0x568   : > { %3602 = vmatprep.subr.bf16.mxu1 %v3601_v15  ;;  %v2202_v47 = vld [vmem:[%s4729_s27 + $0x78] sm:$0xff]  ;;  %v2199_v52 = vld [vmem:[%s4729_s27 + $0x60] sm:$0xff]  ;;  %v2201_v54 = vld [vmem:[%s4729_s27 + $0x70] sm:$0xff] }
 0x569   : > { %v3645_v11 = vpack.c.bf16 %v2202_v47, %v2194_v46  ;;  %v2208_v13 = vld [vmem:[%s4729_s27 + $0xa8] sm:$0xff]  ;;  %v2210_v56 = vld [vmem:[%s4729_s27 + $0xb8] sm:$0xff]  ;;  %v4940_v14 = vld [vmem:[#allocation2] sm:$0xff]  ;;  %v3615_v58 = vpack.c.bf16 %v2199_v52, %v2191_v51  ;;  %v3647_v59 = vpack.c.bf16 %v2201_v54, %v2193_v53 }
 0x56a   : > { %3572 = vmatpush1.bf16.msra.mxu0 %v3571_v23  ;;  %v2216_v55 = vld [vmem:[%s4729_s27 + $0xe8] sm:$0xff]  ;;  %v2218_v57 = vld [vmem:[%s4729_s27 + $0xf8] sm:$0xff]  ;;  %v2207_v61 = vld [vmem:[%s4729_s27 + $0xa0] sm:$0xff] }
 0x56b   : > { %3604 = vmatpush1.bf16.msra.mxu1 %v3603_v24  ;;  %3574 = vmatprep.subr.bf16.mxu0 %v3573_v25  ;;  %v3617_v60 = vpack.c.bf16 %v2216_v55, %v2208_v13  ;;  %v2215_v62 = vld [vmem:[%s4729_s27 + $0xe0] sm:$0xff]  ;;  %v2209_v21 = vld [vmem:[%s4729_s27 + $0xb0] sm:$0xff]  ;;  %v3649_v63 = vpack.c.bf16 %v2218_v57, %v2210_v56  ;;  %v2224_v1 = vld [vmem:[%s4729_s27 + $0x128] sm:$0xff] }
 0x56c   : > { %3606 = vmatprep.subr.bf16.mxu1 %v3605_v29  ;;  %v2217_v0 = vld [vmem:[%s4729_s27 + $0xf0] sm:$0xff]  ;;  %v2232_v2 = vld [vmem:[%s4729_s27 + $0x168] sm:$0xff]  ;;  %v2226_v3 = vld [vmem:[%s4729_s27 + $0x138] sm:$0xff]  ;;  %v3619_v5 = vpack.c.bf16 %v2215_v62, %v2207_v61 }
 0x56d   : > { %v2234_v4 = vld [vmem:[%s4729_s27 + $0x178] sm:$0xff]  ;;  %v3651_v6 = vpack.c.bf16 %v2217_v0, %v2209_v21  ;;  %v3621_v7 = vpack.c.bf16 %v2232_v2, %v2224_v1  ;;  %v2223_v39 = vld [vmem:[%s4729_s27 + $0x120] sm:$0xff]  ;;  %v2225_v9 = vld [vmem:[%s4729_s27 + $0x130] sm:$0xff] }
 0x56e   : > { %3576 = vmatpush1.bf16.msra.mxu0 %v3575_v35  ;;  %v2231_v8 = vld [vmem:[%s4729_s27 + $0x160] sm:$0xff]  ;;  %v3653_v10 = vpack.c.bf16 %v2234_v4, %v2226_v3  ;;  %v2233_v12 = vld [vmem:[%s4729_s27 + $0x170] sm:$0xff]  ;;  %v2240_v15 = vld [vmem:[%s4729_s27 + $0x1a8] sm:$0xff] }
 0x56f   : > { %3608 = vmatpush1.bf16.msra.mxu1 %v3607_v36  ;;  %3578 = vmatprep.subr.bf16.mxu0 %v3577_v37  ;;  %v2248_v16 = vld [vmem:[%s4729_s27 + $0x1e8] sm:$0xff]  ;;  %v2242_v18 = vld [vmem:[%s4729_s27 + $0x1b8] sm:$0xff]  ;;  %v3623_v20 = vpack.c.bf16 %v2231_v8, %v2223_v39  ;;  %v3655_v22 = vpack.c.bf16 %v2233_v12, %v2225_v9  ;;  %v2239_v24 = vld [vmem:[%s4729_s27 + $0x1a0] sm:$0xff] }
 0x570   : > { %3610 = vmatprep.subr.bf16.mxu1 %v3609_v42  ;;  %v2250_v19 = vld [vmem:[%s4729_s27 + $0x1f8] sm:$0xff]  ;;  %v3625_v23 = vpack.c.bf16 %v2248_v16, %v2240_v15  ;;  %v2247_v25 = vld [vmem:[%s4729_s27 + $0x1e0] sm:$0xff]  ;;  %v2241_v26 = vld [vmem:[%s4729_s27 + $0x1b0] sm:$0xff] }
 0x571   : > { %v3657_v27 = vpack.c.bf16 %v2250_v19, %v2242_v18  ;;  %v2249_v28 = vld [vmem:[%s4729_s27 + $0x1f0] sm:$0xff]  ;;  %v2256_v29 = vld [vmem:[%s4729_s27 + $0x228] sm:$0xff]  ;;  %v2258_v30 = vld [vmem:[%s4729_s27 + $0x238] sm:$0xff]  ;;  %v3627_v32 = vpack.c.bf16 %v2247_v25, %v2239_v24 }
 0x572   : > { %3580 = vmatpush1.bf16.msra.mxu0 %v3579_v48  ;;  %v2266_v31 = vld [vmem:[%s4729_s27 + $0x278] sm:$0xff]  ;;  %v3659_v33 = vpack.c.bf16 %v2249_v28, %v2241_v26  ;;  %v2255_v35 = vld [vmem:[%s4729_s27 + $0x220] sm:$0xff]  ;;  %v2257_v37 = vld [vmem:[%s4729_s27 + $0x230] sm:$0xff] }
 0x573   : > { %3612 = vmatpush1.bf16.msra.mxu1 %v3611_v49  ;;  %3614 = vmatprep.subr.bf16.mxu0 %v3613_v50  ;;  %v2263_v36 = vld [vmem:[%s4729_s27 + $0x260] sm:$0xff]  ;;  %v3661_v38 = vpack.c.bf16 %v2266_v31, %v2258_v30  ;;  %v2265_v40 = vld [vmem:[%s4729_s27 + $0x270] sm:$0xff]  ;;  %v2272_v41 = vld [vmem:[%s4729_s27 + $0x2a8] sm:$0xff] }
 0x574   : > { %3646 = vmatprep.subr.bf16.mxu1 %v3645_v11  ;;  %v2280_v42 = vld [vmem:[%s4729_s27 + $0x2e8] sm:$0xff]  ;;  %v2274_v43 = vld [vmem:[%s4729_s27 + $0x2b8] sm:$0xff]  ;;  %v3631_v45 = vpack.c.bf16 %v2263_v36, %v2255_v35  ;;  %v3663_v46 = vpack.c.bf16 %v2265_v40, %v2257_v37  ;;  %v2271_v48 = vld [vmem:[%s4729_s27 + $0x2a0] sm:$0xff] }
 0x575   : > { %2422 = vmatmul.mubr.f32.vlgmr.msra.gmra.mrb[0].mxu0 %v4940_v14  ;;  %v2282_v44 = vld [vmem:[%s4729_s27 + $0x2f8] sm:$0xff]  ;;  %v3633_v47 = vpack.c.bf16 %v2280_v42, %v2272_v41  ;;  %v2279_v49 = vld [vmem:[%s4729_s27 + $0x2e0] sm:$0xff]  ;;  %v2273_v50 = vld [vmem:[%s4729_s27 + $0x2b0] sm:$0xff] }
 0x576   : > { %2493 = vmatmul.mubr.f32.vlgmr.msra.gmra.mrb[0].mxu1 %v4940_v14  ;;  %3616 = vmatpush1.bf16.msra.mxu0 %v3615_v58  ;;  %v3665_v51 = vpack.c.bf16 %v2282_v44, %v2274_v43  ;;  %v2281_v52 = vld [vmem:[%s4729_s27 + $0x2f0] sm:$0xff]  ;;  %v2288_v53 = vld [vmem:[%s4729_s27 + $0x328] sm:$0xff]  ;;  %v2290_v54 = vld [vmem:[%s4729_s27 + $0x338] sm:$0xff]  ;;  %v3635_v55 = vpack.c.bf16 %v2279_v49, %v2271_v48 }
 0x577   : > { %3648 = vmatpush1.bf16.msra.mxu1 %v3647_v59  ;;  %3618 = vmatprep.subr.bf16.mxu0 %v3617_v60  ;;  %v2296_v11 = vld [vmem:[%s4729_s27 + $0x368] sm:$0xff]  ;;  %v2298_v13 = vld [vmem:[%s4729_s27 + $0x378] sm:$0xff]  ;;  %v3667_v56 = vpack.c.bf16 %v2281_v52, %v2273_v50  ;;  %v2287_v58 = vld [vmem:[%s4729_s27 + $0x320] sm:$0xff] }
 0x578   : > { %3650 = vmatprep.subr.bf16.mxu1 %v3649_v63  ;;  %2563 = vmatprep.mubr.f32.mxu0 %v4309_v17  ;;  %v3637_v57 = vpack.c.bf16 %v2296_v11, %v2288_v53  ;;  %v2295_v59 = vld [vmem:[%s4729_s27 + $0x360] sm:$0xff]  ;;  %v2289_v60 = vld [vmem:[%s4729_s27 + $0x330] sm:$0xff]  ;;  %v3669_v61 = vpack.c.bf16 %v2298_v13, %v2290_v54  ;;  %v2304_v21 = vld [vmem:[%s4729_s27 + $0x3a8] sm:$0xff] }
 0x579   : > { %2634 = vmatprep.mubr.f32.mxu1 %v4309_v17  ;;  %v2264_v17 = vld [vmem:[%s4729_s27 + $0x268] sm:$0xff]  ;;  %v2297_v62 = vld [vmem:[%s4729_s27 + $0x370] sm:$0xff]  ;;  %v2306_v0 = vld [vmem:[%s4729_s27 + $0x3b8] sm:$0xff]  ;;  %v3639_v2 = vpack.c.bf16 %v2295_v59, %v2287_v58 }
 0x57a   : > { %3620 = vmatpush1.bf16.msra.mxu0 %v3619_v5  ;;  %v3629_v34 = vpack.c.bf16 %v2264_v17, %v2256_v29  ;;  %v2312_v63 = vld [vmem:[%s4729_s27 + $0x3e8] sm:$0xff]  ;;  %v2314_v1 = vld [vmem:[%s4729_s27 + $0x3f8] sm:$0xff]  ;;  %v3671_v3 = vpack.c.bf16 %v2297_v62, %v2289_v60  ;;  %v2303_v5 = vld [vmem:[%s4729_s27 + $0x3a0] sm:$0xff] }
 0x57b   : > { %3652 = vmatpush1.bf16.msra.mxu1 %v3651_v6  ;;  %3622 = vmatprep.subr.bf16.mxu0 %v3621_v7  ;;  %v3641_v4 = vpack.c.bf16 %v2312_v63, %v2304_v21  ;;  %v2311_v6 = vld [vmem:[%s4729_s27 + $0x3e0] sm:$0xff]  ;;  %v3673_v7 = vpack.c.bf16 %v2314_v1, %v2306_v0  ;;  %v2305_v39 = vld [vmem:[%s4729_s27 + $0x3b0] sm:$0xff] }
 0x57c   : > { %3654 = vmatprep.subr.bf16.mxu1 %v3653_v10  ;;  %v2313_v8 = vld [vmem:[%s4729_s27 + $0x3f0] sm:$0xff]  ;;  %v3643_v9 = vpack.c.bf16 %v2311_v6, %v2303_v5 }
 0x57d   : > { %v3675_v10 = vpack.c.bf16 %v2313_v8, %v2305_v39 }
 0x57e   : > { %3624 = vmatpush1.bf16.msra.mxu0 %v3623_v20 }
 0x57f   : > { %3656 = vmatpush1.bf16.msra.mxu1 %v3655_v22  ;;  %3626 = vmatprep.subr.bf16.mxu0 %v3625_v23 }
 0x580   : > { %3658 = vmatprep.subr.bf16.mxu1 %v3657_v27 }
 0x582   : > { %3628 = vmatpush1.bf16.msra.mxu0 %v3627_v32 }
 0x583   : > { %3660 = vmatpush1.bf16.msra.mxu1 %v3659_v33  ;;  %3630 = vmatprep.subr.bf16.mxu0 %v3629_v34 }
 0x584   : > { %3662 = vmatprep.subr.bf16.mxu1 %v3661_v38 }
 0x586   : > { %3632 = vmatpush1.bf16.msra.mxu0 %v3631_v45 }
 0x587   : > { %3664 = vmatpush1.bf16.msra.mxu1 %v3663_v46  ;;  %3634 = vmatprep.subr.bf16.mxu0 %v3633_v47 }
 0x588   : > { %3666 = vmatprep.subr.bf16.mxu1 %v3665_v51 }
 0x58a   : > { %3636 = vmatpush1.bf16.msra.mxu0 %v3635_v55 }
 0x58b   : > { %3668 = vmatpush1.bf16.msra.mxu1 %v3667_v56  ;;  %3638 = vmatprep.subr.bf16.mxu0 %v3637_v57 }
 0x58c   : > { %3670 = vmatprep.subr.bf16.mxu1 %v3669_v61 }
 0x58e   : > { %3640 = vmatpush1.bf16.msra.mxu0 %v3639_v2 }
 0x58f   : > { %3672 = vmatpush1.bf16.msra.mxu1 %v3671_v3  ;;  %3642 = vmatprep.subr.bf16.mxu0 %v3641_v4 }
 0x590   : > { %3674 = vmatprep.subr.bf16.mxu1 %v3673_v7 }
 0x592   : > { %3644 = vmatpush1.bf16.msra.mxu0 %v3643_v9 }
 0x593   : > { %3676 = vmatpush1.bf16.msra.mxu1 %v3675_v10 }
 0x595   : > { %2564 = vmatmul.mubr.f32.vlgmr.msra.gmra.mrb[2].mxu0 %v4940_v14 }
 0x596   : > { %2635 = vmatmul.mubr.f32.vlgmr.msra.gmra.mrb[2].mxu1 %v4940_v14 }
 0x597   : > { %4081 = shalt.err (!%p4078_p5)
}
 0x598   : > { %s5282_s19 = sld [smem:[#allocation50_spill]]  ;;  %p5283_p11 = pmov %p5281_p0 }
 0x59e   : > { %s4082_s2 = scalar_lea.hbm %s5282_s19, 128 }
 0x59f   : > { %p4083_p8 = scmp.ne.s32.totalorder %s5282_s19, %s4082_s2  ;;  %p4088_p1 = scmp.lt.u32.totalorder %s4082_s2, %s5282_s19 }
 0x5a1   : > { %p4084_p10 = pnand %p4083_p8, %p5283_p11 }
 0x5a3   : > { %p4085_p12 = pneg %p4084_p10 }
 0x5a5   : > { %p4090_p13 = pnand %p4088_p1, %p4085_p12 }
 0x5a7   : > { %4093 = shalt.err (!%p4090_p13)
}
 0x5a8   : > { %p5284_p2 = pmov %p5281_p0  ;;  %s4094_s27 = scalar_lea.vmem %s2699_s0, 256 }
 0x5a9   : > { %p4095_p0 = scmp.ne.s32.totalorder %s2699_s0, %s4094_s27  ;;  %p4101_p4 = scmp.lt.s32.totalorder %s2699_s0, %s2699_s0 }
 0x5aa   : > { %3705 = dma.vmem_to_hbm [thread:$0]  (%p5284_p2), %s2676_s5, 128, %s5282_s19, [#allocation17]  }
 0x5ab   : > { %p5285_p7 = pmov %p5284_p2  ;;  %p4102_p3 = scmp.lt.s32.totalorder %s4094_s27, %s4094_s27 }
 0x5ad   : > { %p4096_p6 = pnand %p4095_p0, %p5285_p7  ;;  %p4103_p5 = por %p4102_p3, %p4101_p4 }
 0x5af   : > { %p4097_p9 = pneg %p4096_p6 }
 0x5b1   : > { %p4104_p8 = pnand %p4103_p5, %p4097_p9 }
 0x5b3   : > { %4107 = shalt.err (!%p4104_p8)
}
 0x5b4   : > { %s5286_s21 = sld [smem:[#allocation52_spill]]  ;;  %p5287_p10 = pmov %p5284_p2 }
 0x5ba   : > { %s4108_s2 = scalar_lea.hbm %s5286_s21, 256 }
 0x5bb   : > { %p4109_p11 = scmp.ne.s32.totalorder %s5286_s21, %s4108_s2  ;;  %p4114_p13 = scmp.lt.u32.totalorder %s4108_s2, %s5286_s21 }
 0x5bd   : > { %p4110_p12 = pnand %p4109_p11, %p5287_p10 }
 0x5bf   : > { %p4111_p1 = pneg %p4110_p12 }
 0x5c1   : > { %p4116_p2 = pnand %p4114_p13, %p4111_p1 }
 0x5c3   : > { %4119 = shalt.err (!%p4116_p2)
}
 0x5c4   : > { %s5222_s20 = smov 128   ;;  %s4313_s27 = smov 8  }
 0x5c5   : > { %p5288_p0 = pmov %p5285_p7  ;;  %s4314_s3 = smov [#allocation18]  }
 0x5c6   : > { %s2685_s10 = sshll.u32 %s4314_s3, 4  ;;  %s4315_s11 = smov [#allocation21]   ;;  %s2686_s10 = int_to_ptr.vmem [resolvable:$true] %s2685_s10 }
 0x5c7   : > { %3709 = dma.vmem_to_hbm [thread:$0]  (%p5288_p0), %s2699_s0, 256, %s5286_s21, [#allocation20], %s5222_s20, %s5222_s20, %s4313_s27  }
 0x5c8   : > { %s2711_s5 = sshll.u32 %s4315_s11, 4  ;;  %s4120_s2 = scalar_lea.vmem %s2686_s10, 256  ;;  %s2712_s5 = int_to_ptr.vmem [resolvable:$true] %s2711_s5 }
 0x5c9   : > { %p4121_p7 = scmp.ne.s32.totalorder %s2686_s10, %s4120_s2  ;;  %p5289_p6 = pmov %p5288_p0 }
 0x5ca   : > { %p4127_p3 = scmp.lt.s32.totalorder %s2686_s10, %s2686_s10  ;;  %p4128_p5 = scmp.lt.s32.totalorder %s4120_s2, %s4120_s2 }
 0x5cb   : > { %p4122_p9 = pnand %p4121_p7, %p5289_p6 }
 0x5cc   : > { %p4129_p8 = por %p4128_p5, %p4127_p3 }
 0x5cd   : > { %p4123_p4 = pneg %p4122_p9 }
 0x5cf   : > { %p4130_p11 = pnand %p4129_p8, %p4123_p4 }
 0x5d1   : > { %4133 = shalt.err (!%p4130_p11)
}
 0x5d2   : > { %s5290_s13 = sld [smem:[#allocation51_spill]]  ;;  %p5291_p12 = pmov %p5288_p0 }
 0x5d8   : > { %s4134_s0 = scalar_lea.hbm %s5290_s13, 256 }
 0x5d9   : > { %p4135_p10 = scmp.ne.s32.totalorder %s5290_s13, %s4134_s0  ;;  %p4140_p2 = scmp.lt.u32.totalorder %s4134_s0, %s5290_s13 }
 0x5db   : > { %p4136_p1 = pnand %p4135_p10, %p5291_p12 }
 0x5dd   : > { %p4137_p13 = pneg %p4136_p1 }
 0x5df   : > { %p4142_p0 = pnand %p4140_p2, %p4137_p13 }
 0x5e1   : > { %4145 = shalt.err (!%p4142_p0)
}
 0x5e2   : > { %p5292_p7 = pmov %p5289_p6  ;;  %s4146_s7 = scalar_lea.vmem %s2712_s5, 256 }
 0x5e3   : > { %p4147_p6 = scmp.ne.s32.totalorder %s2712_s5, %s4146_s7  ;;  %p4153_p5 = scmp.lt.s32.totalorder %s2712_s5, %s2712_s5 }
 0x5e4   : > { %3707 = dma.vmem_to_hbm [thread:$0]  (%p5292_p7), %s2686_s10, 256, %s5290_s13, [#allocation17], %s5222_s20, %s5222_s20, %s4313_s27  }
 0x5e5   : > { %p5293_p9 = pmov %p5292_p7  ;;  %p4154_p8 = scmp.lt.s32.totalorder %s4146_s7, %s4146_s7 }
 0x5e7   : > { %p4148_p4 = pnand %p4147_p6, %p5293_p9  ;;  %p4155_p11 = por %p4154_p8, %p4153_p5 }
 0x5e9   : > { %p4149_p3 = pneg %p4148_p4 }
 0x5eb   : > { %p4156_p10 = pnand %p4155_p11, %p4149_p3 }
 0x5ed   : > { %4159 = shalt.err (!%p4156_p10)
}
 0x5ee   : > { %s5294_s9 = sld [smem:[#allocation53_spill]]  ;;  %p5295_p1 = pmov %p5292_p7 }
 0x5f4   : > { %s4160_s11 = scalar_lea.hbm %s5294_s9, 256 }
 0x5f5   : > { %p4161_p12 = scmp.ne.s32.totalorder %s5294_s9, %s4160_s11  ;;  %p4166_p0 = scmp.lt.u32.totalorder %s4160_s11, %s5294_s9 }
 0x5f7   : > { %p4162_p13 = pnand %p4161_p12, %p5295_p1 }
 0x5f9   : > { %p4163_p2 = pneg %p4162_p13 }
 0x5fb   : > { %p4168_p7 = pnand %p4166_p0, %p4163_p2 }
 0x5fd   : > { %4171 = shalt.err (!%p4168_p7)
}
 0x5fe   : > { %p5296_p6 = pmov %p5295_p1  ;;  %s4316_s8 = smov [#allocation22]  }
 0x5ff   : > { %s2724_s3 = sshll.u32 %s4316_s8, 4  ;;  %p5297_p4 = pmov %p5295_p1  ;;  %s2725_s3 = int_to_ptr.vmem [resolvable:$true] %s2724_s3 }
 0x600   : > { %3711 = dma.vmem_to_hbm [thread:$0]  (%p5296_p6), %s2712_s5, 256, %s5294_s9, [#allocation20], %s5222_s20, %s5222_s20, %s4313_s27  }
 0x601   : > { %s4172_s12 = scalar_lea.vmem %s2725_s3, 256  ;;  %p4179_p8 = scmp.lt.s32.totalorder %s2725_s3, %s2725_s3 }
 0x602   : > { %p4173_p9 = scmp.ne.s32.totalorder %s2725_s3, %s4172_s12  ;;  %p4180_p11 = scmp.lt.s32.totalorder %s4172_s12, %s4172_s12 }
 0x604   : > { %p4174_p3 = pnand %p4173_p9, %p5297_p4  ;;  %p4181_p10 = por %p4180_p11, %p4179_p8 }
 0x606   : > { %p4175_p5 = pneg %p4174_p3 }
 0x608   : > { %p4182_p12 = pnand %p4181_p10, %p4175_p5 }
 0x60a   : > { %4185 = shalt.err (!%p4182_p12)
}
 0x60b   : > { %s5298_s2 = sld [smem:[#allocation54_spill]]  ;;  %p5299_p13 = pmov %p5297_p4 }
 0x611   : > { %s4186_s7 = scalar_lea.hbm %s5298_s2, 256 }
 0x612   : > { %p4187_p1 = scmp.ne.s32.totalorder %s5298_s2, %s4186_s7  ;;  %p4192_p7 = scmp.lt.u32.totalorder %s4186_s7, %s5298_s2 }
 0x614   : > { %p4188_p2 = pnand %p4187_p1, %p5299_p13 }
 0x616   : > { %p4189_p0 = pneg %p4188_p2 }
 0x618   : > { %p4194_p6 = pnand %p4192_p7, %p4189_p0 }
 0x61a   : > { %4197 = shalt.err (!%p4194_p6)
}
 0x61b   : > { %p5300_p9 = pmov %p5297_p4  ;;  %s5301_s12 = smov 128   ;;  %v2317_v14 = vlaneseq }
 0x61c   : > { %s5302_s20 = scalar_lea.vmem %s5193_s17, %s5318_s1  ;;  %s2960_s1 = sshll.u32 %s4459_s26, 10 }
 0x61d   : > { %3713 = dma.vmem_to_hbm [thread:$0]  (%p5300_p9), %s2725_s3, 256, %s5298_s2, [#allocation23], %s5301_s12, %s5301_s12, %s4313_s27   ;;  %v2318_v12 = vshrl.u32 %v2317_v14, 7 }
 0x61e   : > { %v2315_v16 = vld [vmem:[%s5302_s20] sm:$0xff]  ;;  %s2664_s27 = sshll.u32 %s4743_s29, 4  ;;  %s5303_s8 = sld [smem:[#allocation49_spill]]  ;;  %s5119_s27 = int_to_ptr.vmem [resolvable:$true] %s2664_s27 }
 0x61f   : > { %v2319_v15 = vsub.s32 0, %v2318_v12  ;;  %v2327_v18 = vsub.s32 2, %v2318_v12  ;;  %v2323_v19 = vsub.s32 1, %v2318_v12  ;;  %v2331_v20 = vsub.s32 3, %v2318_v12  ;;  %s2650_s11 = scalar_lea.sflag [#allocation5], %s4726_s14  ;;  %s4198_s10 = scalar_lea.vmem %s5119_s27, 1024 }
 0x620   : > { %v2335_v33 = vsub.s32 4, %v2318_v12  ;;  %v2343_v34 = vsub.s32 6, %v2318_v12  ;;  %v2339_v35 = vsub.s32 5, %v2318_v12  ;;  %v2347_v36 = vsub.s32 7, %v2318_v12  ;;  %p4199_p4 = scmp.ne.s32.totalorder %s5119_s27, %s4198_s10  ;;  %p5304_p3 = scmp.ne.s32.totalorder %s5258_s28, 0 }
 0x621   : > { %v2320_v22 = vrot.slane %v2315_v16, %v2319_v15  ;;  %v2328_v23 = vrot.slane %v2315_v16, %v2327_v18  ;;  %v2324_v24 = vrot.slane %v2315_v16, %v2323_v19  ;;  %v2332_v25 = vrot.slane %v2315_v16, %v2331_v20  ;;  %s4317_s0 = smov [#allocation15]  }
 0x622   : > { %v2336_v37 = vrot.slane %v2315_v16, %v2335_v33  ;;  %v2344_v38 = vrot.slane %v2315_v16, %v2343_v34  ;;  %v2340_v40 = vrot.slane %v2315_v16, %v2339_v35  ;;  %v2348_v41 = vrot.slane %v2315_v16, %v2347_v36  ;;  %p4200_p5 = pnand %p4199_p4, %p5304_p3  ;;  %s4202_s5 = sshll.u32 %s4317_s0, 4  ;;  %s4203_s5 = int_to_ptr.vmem [resolvable:$false] %s4202_s5 }
 0x623   : > { %s4204_s20 = scalar_lea.vmem %s4203_s5, 2048  ;;  %p4205_p11 = scmp.lt.s32.totalorder %s5119_s27, %s4203_s5 }
 0x624   : > { %s5117_s12 = scalar_lea.hbm %s5303_s8, %s2960_s1  ;;  %p4201_p8 = pneg %p4200_p5 }
 0x625   : > { %p4206_p10 = scmp.lt.s32.totalorder %s4204_s20, %s4198_s10 }
 0x627   : > { %p4207_p12 = por %p4206_p10, %p4205_p11 }
 0x629   : > { %p4208_p1 = pnand %p4207_p12, %p4201_p8 }
 0x648   : > { %v2423_v26 = vpop.f32.mrb[0].mxu0 }
 0x649   : > { %v2424_v27 = vadd.f32 %v2423_v26, %v2320_v22  ;;  %v2494_v28 = vpop.f32.mrb[0].mxu1  ;;  %v2425_v29 = vpop.f32.mrb[1].mxu0 }
 0x64a   : > { %v2495_v17 = vadd.f32 %v2494_v28, %v2328_v23  ;;  %v2426_v30 = vadd.f32 %v2425_v29, %v2324_v24  ;;  %v2496_v31 = vpop.f32.mrb[1].mxu1 }
 0x64b   : > { %2641 = vst [vmem:[%s4743_s29] sm:$0xff] %v2424_v27  ;;  %v2497_v32 = vadd.f32 %v2496_v31, %v2332_v25 }
 0x64c   : > { %2643 = vst [vmem:[%s4743_s29 + $0x10] sm:$0xff] %v2495_v17  ;;  %2642 = vst [vmem:[%s4743_s29 + $0x8] sm:$0xff] %v2426_v30 }
 0x64d   : > { %2644 = vst [vmem:[%s4743_s29 + $0x18] sm:$0xff] %v2497_v32 }
 0x668   : > { %v2565_v42 = vpop.f32.mrb[2].mxu0 }
 0x669   : > { %v2566_v43 = vadd.f32 %v2565_v42, %v2336_v37  ;;  %v2636_v44 = vpop.f32.mrb[2].mxu1  ;;  %v2567_v45 = vpop.f32.mrb[3].mxu0 }
 0x66a   : > { %v2637_v46 = vadd.f32 %v2636_v44, %v2344_v38  ;;  %v2568_v47 = vadd.f32 %v2567_v45, %v2340_v40  ;;  %v2638_v48 = vpop.f32.mrb[3].mxu1 }
 0x66b   : > { %2645 = vst [vmem:[%s4743_s29 + $0x20] sm:$0xff] %v2566_v43  ;;  %v2639_v49 = vadd.f32 %v2638_v48, %v2348_v41 }
 0x66c   : > { %2647 = vst [vmem:[%s4743_s29 + $0x30] sm:$0xff] %v2637_v46  ;;  %2646 = vst [vmem:[%s4743_s29 + $0x28] sm:$0xff] %v2568_v47 }
 0x66d   : > { %2648 = vst [vmem:[%s4743_s29 + $0x38] sm:$0xff] %v2639_v49 }
 0x66e   : > { %4211 = shalt.err (!%p4208_p1)
}
 0x66f   : > { %s4212_s14 = scalar_lea.hbm %s5117_s12, 1024  ;;  %s4216_s3 = scalar_lea.hbm %s5303_s8, 2048 }
 0x670   : > { %p4213_p13 = scmp.ne.s32.totalorder %s5117_s12, %s4212_s14  ;;  %p4217_p7 = scmp.lt.u32.totalorder %s5117_s12, %s5303_s8 }
 0x671   : > { %p4218_p6 = scmp.lt.u32.totalorder %s4216_s3, %s4212_s14  ;;  %p4220_p4 = scmp.lt.u32.totalorder %s4212_s14, %s5117_s12 }
 0x672   : > { %p4214_p2 = pnand %p4213_p13, %p5304_p3 }
 0x673   : > { %p4219_p9 = por %p4218_p6, %p4217_p7 }
 0x674   : > { %p4215_p0 = pneg %p4214_p2 }
 0x675   : > { %p4221_p5 = por %p4220_p4, %p4219_p9 }
 0x677   : > { %p4222_p8 = pnand %p4221_p5, %p4215_p0 }
 0x679   : > { %4225 = shalt.err (!%p4222_p8)
}
 0x67a   : > { %3703 = dma.vmem_to_hbm [thread:$0]  (%p5304_p3), %s5119_s27, 1024, %s5117_s12, %s2650_s11  }
 0x67b   : > { %p5305_p11 = scmp.eq.s32.totalorder %s4459_s26, 1 }
 0x67d   : > { %4263 = dma.done.wait (%p5305_p11), [#allocation17], 384   ;;  %p5306_p10 = pmov %p5305_p11 }
 0x67f   : > { %4265 = vsyncadd (%p5306_p10), [#allocation17], 4294966912  ;;  %p5307_p12 = pmov %p5306_p10 }
 0x680   : > { %p5308_p1 = pmov %p5306_p10 }
 0x681   : > { %4267 = dma.done.wait (%p5307_p12), [#allocation20], 512  }
 0x682   : > { %4269 = vsyncadd (%p5308_p1), [#allocation20], 4294966784  ;;  %p5309_p13 = pmov %p5308_p1 }
 0x683   : > { %p5310_p2 = pmov %p5308_p1 }
 0x684   : > { %4271 = dma.done.wait (%p5309_p13), [#allocation23], 256  }
 0x685   : > { %4273 = vsyncadd (%p5310_p2), [#allocation23], 4294967040 }
 0x686 PF: > { %s2759_s28 = sand.u32 1, %s4280_s4   ;;  %p5311_p3 = scmp.ne.s32.totalorder %s5259_s22, 0 }
 0x687   : > { %p5312_p0 = scmp.ge.s32.totalorder %s4292_s25, 2  ;;  %s2760_s27 = scalar_lea.sflag [#allocation5], %s2759_s28 }
 0x689   : > { %p3749_p7 = pnand %p5312_p0, %p5311_p3 }
 0x68b   : > { %4275 = dma.done.wait (!%p3749_p7), %s2760_s27, 1024  }
 0x68c   : > { %4277 = vsyncadd (!%p3749_p7), %s2760_s27, 4294966272  ;;  %p41_p6 = scmp.ge.s32.totalorder %s4627_s6, 4   ;;  %s5313_s4 = smov %s4284_s30 }
 0x68d   : > { %s5314_s30 = smov %s4288_s24  ;;  %s5315_s24 = smov %s4638_s15 }
 0x68e   : > { %s5316_s25 = smov %s4627_s6  ;;  %43 = sbr.rel (!%p41_p6) target bundleno = 33 (0x21), region = 215 }
 0x695   :  { %2765 = vsyncpa [#allocation4], 1 }
 0x696   :  { %2767 = vsyncpa [#allocation4 + $0x1], 1 }
 0x697   :  { %2768 = vsyncpa [#allocation7], 1 }
 0x698   :  { %2769 = vsyncpa [#allocation10], 1 }
 0x699   :  { %2770 = vsyncpa [#allocation13], 1 }
 0x69a   :  { %2771 = vsyncpa [#allocation5], 1 }
 0x69b   :  { %2773 = vsyncpa [#allocation5 + $0x1], 1 }
 0x69c   :  { %2774 = vsyncpa [#allocation17], 1 }
 0x69d   :  { %2775 = vsyncpa [#allocation20], 1 }
 0x69e   :  { %2776 = vsyncpa [#allocation23], 1 }

</bundles_post_ra>
